<compile_context>
chip_gen: v5e
topology: v5e:2x2
jax: 0.10.0
libtpu: 0.0.40
codegen_flags: <defaults>
</compile_context>

<pallas_src>
import jax
import jax.numpy as jnp
from jax.experimental import pallas as pl
from jax.experimental.pallas import tpu as pltpu

KSIZE = 4
PAD = 1
LEAK = 0.2
EPS = 1e-5
LANE = 128
TILE_P = 1024          # rows of the patches matrix per grid step (sweep 512-2048)
VMEM_LIMIT = 32 * 1024 * 1024


# ---------------------------------------------------------------------------
# glue helpers (plain JAX, runs inside the jitted forward)
# ---------------------------------------------------------------------------
def _round_up(n, m):
    return -(-n // m) * m


def _pick_tile(p_true):
    """Row-tile size: TILE_P for big problems, a single 8-aligned tile otherwise."""
    if p_true >= TILE_P:
        return TILE_P
    return max(8, _round_up(p_true, 8))


def _im2col_nhwc(x_nhwc, stride_hw):
    """(N, H, W, C) -> ([N*Hout*Wout, K*K*C], Hout, Wout); pad=1, kernel=4.

    Column order is (kh, kw, c), matching an HWIO-flattened weight."""
    n, h, w, c = x_nhwc.shape
    sh, sw = stride_hw
    xp = jnp.pad(x_nhwc, ((0, 0), (PAD, PAD), (PAD, PAD), (0, 0)))
    hout = (h + 2 * PAD - KSIZE) // sh + 1
    wout = (w + 2 * PAD - KSIZE) // sw + 1
    cols = [xp[:, kh:kh + sh * hout:sh, kw:kw + sw * wout:sw, :]
            for kh in range(KSIZE) for kw in range(KSIZE)]
    patches = jnp.concatenate(cols, axis=-1)          # (N, Hout, Wout, 16*C)
    return patches.reshape(n * hout * wout, KSIZE * KSIZE * c), hout, wout


def _prep_weight(w_oihw, cout_pad=None):
    """OIHW -> HWIO-flattened [K, Cout(_pad)] bf16."""
    cout, cin, kh, kw = w_oihw.shape
    w_mat = jnp.transpose(w_oihw, (2, 3, 1, 0)).reshape(kh * kw * cin, cout)
    if cout_pad is not None and cout_pad > cout:
        w_mat = jnp.pad(w_mat, ((0, 0), (0, cout_pad - cout)))
    return w_mat.astype(jnp.bfloat16)


# ---------------------------------------------------------------------------
# Pallas kernels
# ---------------------------------------------------------------------------
def _conv_lrelu_stats_kernel(patches_ref, w_ref, sum_ref, sq_ref):
    """Pass 1: conv (bf16 MXU, f32 acc) + LeakyReLU, emit per-tile partial
    channel sums / sum-of-squares.  No activation write (recomputed in pass 2).
    The (tile//8, 8, C) view keeps the reduction on the VALU (layout-free)."""
    acc = jnp.dot(patches_ref[...], w_ref[...],
                  preferred_element_type=jnp.float32)
    y = jnp.where(acc > 0, acc, LEAK * acc)            # LeakyReLU(0.2)
    yg = y.reshape(y.shape[0] // 8, 8, y.shape[1])
    # Padded rows are exactly zero -> contribute nothing; the true element
    # count is divided out in the wrapper.
    sum_ref[...] = jnp.sum(yg, axis=0)
    sq_ref[...] = jnp.sum(yg * yg, axis=0)


def _conv_lrelu_affine_kernel(patches_ref, w_ref, scale_ref, shift_ref, out_ref):
    """Pass 2: recompute conv + LeakyReLU, apply folded BatchNorm affine,
    store the final activation in bf16 (channel-dense, no lane padding)."""
    acc = jnp.dot(patches_ref[...], w_ref[...],
                  preferred_element_type=jnp.float32)
    y = jnp.where(acc > 0, acc, LEAK * acc)
    out_ref[...] = (y * scale_ref[...] + shift_ref[...]).astype(out_ref.dtype)


def _conv_bias_kernel(patches_ref, w_ref, b_ref, out_ref):
    out_ref[...] = jnp.dot(patches_ref[...], w_ref[...],
                           preferred_element_type=jnp.float32) + b_ref[...]


# ---------------------------------------------------------------------------
# pallas_call wrappers
# ---------------------------------------------------------------------------
def _conv_lrelu_stats(patches_bf16, w_bf16, tile):
    p_pad, k = patches_bf16.shape
    cout = w_bf16.shape[1]
    ntiles = p_pad // tile
    return pl.pallas_call(
        _conv_lrelu_stats_kernel,
        out_shape=(jax.ShapeDtypeStruct((ntiles * 8, cout), jnp.float32),
                   jax.ShapeDtypeStruct((ntiles * 8, cout), jnp.float32)),
        grid=(ntiles,),
        in_specs=[pl.BlockSpec((tile, k), lambda i: (i, 0)),
                  pl.BlockSpec((k, cout), lambda i: (0, 0))],   # resident weight
        out_specs=(pl.BlockSpec((8, cout), lambda i: (i, 0)),   # per-tile partials
                   pl.BlockSpec((8, cout), lambda i: (i, 0))),
        compiler_params=pltpu.CompilerParams(
            dimension_semantics=("parallel",),   # no cross-step state -> megacore OK
            vmem_limit_bytes=VMEM_LIMIT),
    )(patches_bf16, w_bf16)


def _conv_lrelu_affine(patches_bf16, w_bf16, scale, shift, tile):
    p_pad, k = patches_bf16.shape
    cout = w_bf16.shape[1]
    return pl.pallas_call(
        _conv_lrelu_affine_kernel,
        out_shape=jax.ShapeDtypeStruct((p_pad, cout), jnp.bfloat16),
        grid=(p_pad // tile,),
        in_specs=[pl.BlockSpec((tile, k), lambda i: (i, 0)),
                  pl.BlockSpec((k, cout), lambda i: (0, 0)),
                  pl.BlockSpec((1, cout), lambda i: (0, 0)),
                  pl.BlockSpec((1, cout), lambda i: (0, 0))],
        out_specs=pl.BlockSpec((tile, cout), lambda i: (i, 0)),
        compiler_params=pltpu.CompilerParams(
            dimension_semantics=("parallel",),
            vmem_limit_bytes=VMEM_LIMIT),
    )(patches_bf16, w_bf16, scale, shift)


def _conv_bias(patches_bf16, w_bf16, b_f32, tile):
    p_pad, k = patches_bf16.shape
    cout_p = w_bf16.shape[1]
    return pl.pallas_call(
        _conv_bias_kernel,
        out_shape=jax.ShapeDtypeStruct((p_pad, cout_p), jnp.float32),
        grid=(p_pad // tile,),
        in_specs=[pl.BlockSpec((tile, k), lambda i: (i, 0)),
                  pl.BlockSpec((k, cout_p), lambda i: (0, 0)),
                  pl.BlockSpec((1, cout_p), lambda i: (0, 0))],
        out_specs=pl.BlockSpec((tile, cout_p), lambda i: (i, 0)),
        compiler_params=pltpu.CompilerParams(
            dimension_semantics=("parallel",),
            vmem_limit_bytes=VMEM_LIMIT),
    )(patches_bf16, w_bf16, b_f32)


# ---------------------------------------------------------------------------
# layer wrappers (NHWC bf16 in, NHWC bf16 out)
# ---------------------------------------------------------------------------
def _conv_lrelu_bn_layer(x_nhwc, w_oihw, gamma, beta, stride_hw):
    n = x_nhwc.shape[0]
    cout = w_oihw.shape[0]

    patches, hout, wout = _im2col_nhwc(x_nhwc, stride_hw)     # bf16
    p_true, k = patches.shape
    tile = _pick_tile(p_true)
    p_pad = _round_up(p_true, tile)
    patches_p = jnp.pad(patches, ((0, p_pad - p_true), (0, 0)))
    w_p = _prep_weight(w_oihw)                                 # (K, cout) bf16

    # Pass 1: conv + LeakyReLU -> per-tile partial sum / sum-sq (f32).
    ssum_t, ssq_t = _conv_lrelu_stats(patches_p, w_p, tile)
    ssum = jnp.sum(ssum_t, axis=0, keepdims=True)              # (1, cout)
    ssq = jnp.sum(ssq_t, axis=0, keepdims=True)

    # Fold BatchNorm2d (training-mode batch stats, biased variance) into a
    # per-channel scale/shift in f32.
    # TODO(synk): E[y^2]-mean^2 clamp still loses precision when var << mean^2;
    # a centered second pass would fix it at the cost of one more patches read.
    inv_p = 1.0 / float(p_true)
    mean = ssum * inv_p
    var = jnp.maximum(ssq * inv_p - mean * mean, 0.0)
    scale = gamma.reshape(1, cout) * jax.lax.rsqrt(var + EPS)
    shift = beta.reshape(1, cout) - mean * scale

    # Pass 2: recompute conv + LeakyReLU, apply affine, store bf16.
    out = _conv_lrelu_affine(patches_p, w_p,
                             scale.astype(jnp.float32),
                             shift.astype(jnp.float32), tile)
    return out[:p_true].reshape(n, hout, wout, cout)


def _conv_bias_layer(x_nhwc, w_oihw, bias, stride_hw):
    n = x_nhwc.shape[0]
    cout = w_oihw.shape[0]
    cout_p = _round_up(cout, LANE)   # final map is tiny; lane pad kept for safety

    patches, hout, wout = _im2col_nhwc(x_nhwc, stride_hw)
    p_true, k = patches.shape
    tile = _pick_tile(p_true)
    p_pad = _round_up(p_true, tile)
    patches_p = jnp.pad(patches, ((0, p_pad - p_true), (0, 0)))
    w_p = _prep_weight(w_oihw, cout_p)
    b_p = jnp.pad(bias, (0, cout_p - cout)).reshape(1, cout_p).astype(jnp.float32)

    out_p = _conv_bias(patches_p, w_p, b_p, tile)
    return out_p[:p_true, :cout].reshape(n, hout, wout, cout)


def patch_discriminator_forward(x_nchw, params):
    """x: (N, C, H, W) float32 -> (N, 1, H', W') patch logits (float32)."""
    x = jnp.transpose(x_nchw, (0, 2, 3, 1)).astype(jnp.bfloat16)   # NHWC + bf16 once
    h = _conv_lrelu_bn_layer(x, params["w1"], params["g1"], params["b1"], (2, 1))
    h = _conv_lrelu_bn_layer(h, params["w2"], params["g2"], params["b2"], (2, 1))
    h = _conv_lrelu_bn_layer(h, params["w3"], params["g3"], params["b3"], (2, 1))
    out = _conv_bias_layer(h, params["w4"], params["bias4"], (1, 1))
    return jnp.transpose(out, (0, 3, 1, 2))                        # -> NCHW once


patch_discriminator_forward_jit = jax.jit(patch_discriminator_forward)


# ---------------------------------------------------------------------------
# deterministic parameter init (BatchNorm2d => conv bias=False except last)
# ---------------------------------------------------------------------------
def init_params(key, in_channels=4, base_filters=16):
    ks = jax.random.split(key, 5)
    f = base_filters

    def conv_w(k, cout, cin):
        return jax.random.normal(k, (cout, cin, KSIZE, KSIZE), jnp.float32) * 0.05

    return {
        "w1": conv_w(ks[0], f, in_channels),
        "g1": jnp.ones((f,), jnp.float32), "b1": jnp.zeros((f,), jnp.float32),
        "w2": conv_w(ks[1], 2 * f, f),
        "g2": jnp.ones((2 * f,), jnp.float32), "b2": jnp.zeros((2 * f,), jnp.float32),
        "w3": conv_w(ks[2], 4 * f, 2 * f),
        "g3": jnp.ones((4 * f,), jnp.float32), "b3": jnp.zeros((4 * f,), jnp.float32),
        "w4": conv_w(ks[3], 1, 4 * f),
        "bias4": jax.random.normal(ks[4], (1,), jnp.float32) * 0.05,
    }


# ---------------------------------------------------------------------------
# pure-JAX f32 reference (for correctness check)
# ---------------------------------------------------------------------------
def _ref_forward(x, params):
    def conv(x, w, stride, b=None):
        out = jax.lax.conv_general_dilated(
            x, w, window_strides=stride, padding=[(PAD, PAD), (PAD, PAD)],
            dimension_numbers=("NCHW", "OIHW", "NCHW"))
        if b is not None:
            out = out + b[None, :, None, None]
        return out

    def lrelu(x):
        return jnp.where(x > 0, x, LEAK * x)

    def bn(x, g, b):
        mean = jnp.mean(x, axis=(0, 2, 3), keepdims=True)
        var = jnp.mean((x - mean) ** 2, axis=(0, 2, 3), keepdims=True)
        return ((x - mean) * jax.lax.rsqrt(var + EPS)
                * g[None, :, None, None] + b[None, :, None, None])

    h = bn(lrelu(conv(x, params["w1"], (2, 1))), params["g1"], params["b1"])
    h = bn(lrelu(conv(h, params["w2"], (2, 1))), params["g2"], params["b2"])
    h = bn(lrelu(conv(h, params["w3"], (2, 1))), params["g3"], params["b3"])
    return conv(h, params["w4"], (1, 1), params["bias4"])


if __name__ == "__main__":
    key = jax.random.PRNGKey(0)
    kx, kp = jax.random.split(key)
    x = jax.random.normal(kx, (2, 4, 16, 16), jnp.float32)
    params = init_params(kp)

    out = patch_discriminator_forward_jit(x, params)
    out = jax.block_until_ready(out)

    assert out.shape == (2, 1, 1, 12), out.shape
    ref = _ref_forward(x, params)
    # Tolerance accounts for bf16 MXU inputs AND bf16 inter-layer activation
    # storage vs. the f32 reference (errors compound across 4 conv layers +
    # batch-norm rescaling) — intentional for a GAN discriminator.
    assert jnp.allclose(out, ref, atol=1e-1, rtol=1e-1), float(
        jnp.max(jnp.abs(out - ref)))

    print("KERNEL_OK")
</pallas_src>

<mosaic_0001>
module attributes {stable_mosaic.version = 11 : i64} {
  func.func @_conv_lrelu_stats_kernel(%arg0: i32, %arg1: memref<240x64xbf16, #tpu.memory_space<vmem>>, %arg2: memref<64x16xbf16, #tpu.memory_space<vmem>>, %arg3: memref<8x16xf32, #tpu.memory_space<vmem>>, %arg4: memref<8x16xf32, #tpu.memory_space<vmem>>) attributes {dimension_semantics = [#tpu.dimension_semantics<parallel>], iteration_bounds = array<i64: 1>, scalar_prefetch = 0 : i64, scratch_operands = 0 : i64, tpu.core_type = #tpu.core_type<tc>, window_params = [{transform_indices = @transform_0, window_bounds = array<i64: 240, 64>}, {pipeline_mode = #tpu.pipeline_mode<synchronous>, transform_indices = @transform_1, window_bounds = array<i64: 64, 16>}, {transform_indices = @transform_2, window_bounds = array<i64: 8, 16>}, {transform_indices = @transform_3, window_bounds = array<i64: 8, 16>}]} {
    %c0 = arith.constant 0 : index
    %c0_0 = arith.constant 0 : index
    %0 = vector.load %arg1[%c0, %c0_0] : memref<240x64xbf16, #tpu.memory_space<vmem>>, vector<240x64xbf16>
    %c0_1 = arith.constant 0 : index
    %c0_2 = arith.constant 0 : index
    %1 = vector.load %arg2[%c0_1, %c0_2] : memref<64x16xbf16, #tpu.memory_space<vmem>>, vector<64x16xbf16>
    %cst = arith.constant dense<0.000000e+00> : vector<240x16xf32>
    %2 = tpu.matmul %0, %1, %cst {dimension_numbers = #tpu.dot_dimension_numbers<[1], [0], [0], [1], [0, 0, 1, 1], [], []>} : vector<240x64xbf16>, vector<64x16xbf16>, vector<240x16xf32> -> vector<240x16xf32>
    %cst_3 = arith.constant 0.000000e+00 : f32
    %3 = vector.broadcast %cst_3 : f32 to vector<240x16xf32>
    %4 = arith.cmpf ogt, %2, %3 : vector<240x16xf32>
    %cst_4 = arith.constant 2.000000e-01 : f32
    %5 = vector.broadcast %cst_4 : f32 to vector<240x16xf32>
    %6 = arith.mulf %5, %2 : vector<240x16xf32>
    %7 = arith.select %4, %2, %6 : vector<240x16xi1>, vector<240x16xf32>
    %8 = vector.shape_cast %7 : vector<240x16xf32> to vector<30x8x16xf32>
    %cst_5 = arith.constant dense<0.000000e+00> : vector<8x16xf32>
    %9 = vector.multi_reduction <add>, %8, %cst_5 [0] : vector<30x8x16xf32> to vector<8x16xf32>
    %c0_6 = arith.constant 0 : index
    %c0_7 = arith.constant 0 : index
    %10 = vector.load %arg3[%c0_6, %c0_7] : memref<8x16xf32, #tpu.memory_space<vmem>>, vector<8x16xf32>
    tpu.vector_store %arg3[%c0_6, %c0_7], %9 {strides = array<i32>} : memref<8x16xf32, #tpu.memory_space<vmem>>, vector<8x16xf32>,
    %11 = arith.mulf %8, %8 : vector<30x8x16xf32>
    %cst_8 = arith.constant dense<0.000000e+00> : vector<8x16xf32>
    %12 = vector.multi_reduction <add>, %11, %cst_8 [0] : vector<30x8x16xf32> to vector<8x16xf32>
    %c0_9 = arith.constant 0 : index
    %c0_10 = arith.constant 0 : index
    %13 = vector.load %arg4[%c0_9, %c0_10] : memref<8x16xf32, #tpu.memory_space<vmem>>, vector<8x16xf32>
    tpu.vector_store %arg4[%c0_9, %c0_10], %12 {strides = array<i32>} : memref<8x16xf32, #tpu.memory_space<vmem>>, vector<8x16xf32>,
    return
  }
  func.func @transform_0(%arg0: i32) -> (i32, i32) {
    %c0_i32 = arith.constant 0 : i32
    %c0_i32_0 = arith.constant 0 : i32
    return %arg0, %c0_i32 : i32, i32
  }
  func.func @transform_1(%arg0: i32) -> (i32, i32) {
    %c0_i32 = arith.constant 0 : i32
    %c0_i32_0 = arith.constant 0 : i32
    %c0_i32_1 = arith.constant 0 : i32
    return %c0_i32, %c0_i32_0 : i32, i32
  }
  func.func @transform_2(%arg0: i32) -> (i32, i32) {
    %c0_i32 = arith.constant 0 : i32
    %c0_i32_0 = arith.constant 0 : i32
    return %arg0, %c0_i32 : i32, i32
  }
  func.func @transform_3(%arg0: i32) -> (i32, i32) {
    %c0_i32 = arith.constant 0 : i32
    %c0_i32_0 = arith.constant 0 : i32
    return %arg0, %c0_i32 : i32, i32
  }
}

module attributes {stable_mosaic.version = 11 : i64} {
  func.func @_conv_lrelu_affine_kernel(%arg0: i32, %arg1: memref<240x64xbf16, #tpu.memory_space<vmem>>, %arg2: memref<64x16xbf16, #tpu.memory_space<vmem>>, %arg3: memref<1x16xf32, #tpu.memory_space<vmem>>, %arg4: memref<1x16xf32, #tpu.memory_space<vmem>>, %arg5: memref<240x16xbf16, #tpu.memory_space<vmem>>) attributes {dimension_semantics = [#tpu.dimension_semantics<parallel>], iteration_bounds = array<i64: 1>, scalar_prefetch = 0 : i64, scratch_operands = 0 : i64, tpu.core_type = #tpu.core_type<tc>, window_params = [{transform_indices = @transform_0, window_bounds = array<i64: 240, 64>}, {pipeline_mode = #tpu.pipeline_mode<synchronous>, transform_indices = @transform_1, window_bounds = array<i64: 64, 16>}, {pipeline_mode = #tpu.pipeline_mode<synchronous>, transform_indices = @transform_2, window_bounds = array<i64: 1, 16>}, {pipeline_mode = #tpu.pipeline_mode<synchronous>, transform_indices = @transform_3, window_bounds = array<i64: 1, 16>}, {transform_indices = @transform_4, window_bounds = array<i64: 240, 16>}]} {
    %c0 = arith.constant 0 : index
    %c0_0 = arith.constant 0 : index
    %0 = vector.load %arg1[%c0, %c0_0] : memref<240x64xbf16, #tpu.memory_space<vmem>>, vector<240x64xbf16>
    %c0_1 = arith.constant 0 : index
    %c0_2 = arith.constant 0 : index
    %1 = vector.load %arg2[%c0_1, %c0_2] : memref<64x16xbf16, #tpu.memory_space<vmem>>, vector<64x16xbf16>
    %cst = arith.constant dense<0.000000e+00> : vector<240x16xf32>
    %2 = tpu.matmul %0, %1, %cst {dimension_numbers = #tpu.dot_dimension_numbers<[1], [0], [0], [1], [0, 0, 1, 1], [], []>} : vector<240x64xbf16>, vector<64x16xbf16>, vector<240x16xf32> -> vector<240x16xf32>
    %cst_3 = arith.constant 0.000000e+00 : f32
    %3 = vector.broadcast %cst_3 : f32 to vector<240x16xf32>
    %4 = arith.cmpf ogt, %2, %3 : vector<240x16xf32>
    %cst_4 = arith.constant 2.000000e-01 : f32
    %5 = vector.broadcast %cst_4 : f32 to vector<240x16xf32>
    %6 = arith.mulf %5, %2 : vector<240x16xf32>
    %7 = arith.select %4, %2, %6 : vector<240x16xi1>, vector<240x16xf32>
    %c0_5 = arith.constant 0 : index
    %c0_6 = arith.constant 0 : index
    %8 = vector.load %arg3[%c0_5, %c0_6] : memref<1x16xf32, #tpu.memory_space<vmem>>, vector<1x16xf32>
    %9 = vector.broadcast %8 : vector<1x16xf32> to vector<240x16xf32>
    %10 = arith.mulf %7, %9 : vector<240x16xf32>
    %c0_7 = arith.constant 0 : index
    %c0_8 = arith.constant 0 : index
    %11 = vector.load %arg4[%c0_7, %c0_8] : memref<1x16xf32, #tpu.memory_space<vmem>>, vector<1x16xf32>
    %12 = vector.broadcast %11 : vector<1x16xf32> to vector<240x16xf32>
    %13 = arith.addf %10, %12 : vector<240x16xf32>
    %14 = arith.truncf %13 : vector<240x16xf32> to vector<240x16xbf16>
    %c0_9 = arith.constant 0 : index
    %c0_10 = arith.constant 0 : index
    %15 = vector.load %arg5[%c0_9, %c0_10] : memref<240x16xbf16, #tpu.memory_space<vmem>>, vector<240x16xbf16>
    tpu.vector_store %arg5[%c0_9, %c0_10], %14 {strides = array<i32>} : memref<240x16xbf16, #tpu.memory_space<vmem>>, vector<240x16xbf16>,
    return
  }
  func.func @transform_0(%arg0: i32) -> (i32, i32) {
    %c0_i32 = arith.constant 0 : i32
    %c0_i32_0 = arith.constant 0 : i32
    return %arg0, %c0_i32 : i32, i32
  }
  func.func @transform_1(%arg0: i32) -> (i32, i32) {
    %c0_i32 = arith.constant 0 : i32
    %c0_i32_0 = arith.constant 0 : i32
    %c0_i32_1 = arith.constant 0 : i32
    return %c0_i32, %c0_i32_0 : i32, i32
  }
  func.func @transform_2(%arg0: i32) -> (i32, i32) {
    %c0_i32 = arith.constant 0 : i32
    %c0_i32_0 = arith.constant 0 : i32
    %c0_i32_1 = arith.constant 0 : i32
    return %c0_i32, %c0_i32_0 : i32, i32
  }
  func.func @transform_3(%arg0: i32) -> (i32, i32) {
    %c0_i32 = arith.constant 0 : i32
    %c0_i32_0 = arith.constant 0 : i32
    %c0_i32_1 = arith.constant 0 : i32
    return %c0_i32, %c0_i32_0 : i32, i32
  }
  func.func @transform_4(%arg0: i32) -> (i32, i32) {
    %c0_i32 = arith.constant 0 : i32
    %c0_i32_0 = arith.constant 0 : i32
    return %arg0, %c0_i32 : i32, i32
  }
}

module attributes {stable_mosaic.version = 11 : i64} {
  func.func @_conv_lrelu_stats_kernel(%arg0: i32, %arg1: memref<112x256xbf16, #tpu.memory_space<vmem>>, %arg2: memref<256x32xbf16, #tpu.memory_space<vmem>>, %arg3: memref<8x32xf32, #tpu.memory_space<vmem>>, %arg4: memref<8x32xf32, #tpu.memory_space<vmem>>) attributes {dimension_semantics = [#tpu.dimension_semantics<parallel>], iteration_bounds = array<i64: 1>, scalar_prefetch = 0 : i64, scratch_operands = 0 : i64, tpu.core_type = #tpu.core_type<tc>, window_params = [{transform_indices = @transform_0, window_bounds = array<i64: 112, 256>}, {pipeline_mode = #tpu.pipeline_mode<synchronous>, transform_indices = @transform_1, window_bounds = array<i64: 256, 32>}, {transform_indices = @transform_2, window_bounds = array<i64: 8, 32>}, {transform_indices = @transform_3, window_bounds = array<i64: 8, 32>}]} {
    %c0 = arith.constant 0 : index
    %c0_0 = arith.constant 0 : index
    %0 = vector.load %arg1[%c0, %c0_0] : memref<112x256xbf16, #tpu.memory_space<vmem>>, vector<112x256xbf16>
    %c0_1 = arith.constant 0 : index
    %c0_2 = arith.constant 0 : index
    %1 = vector.load %arg2[%c0_1, %c0_2] : memref<256x32xbf16, #tpu.memory_space<vmem>>, vector<256x32xbf16>
    %cst = arith.constant dense<0.000000e+00> : vector<112x32xf32>
    %2 = tpu.matmul %0, %1, %cst {dimension_numbers = #tpu.dot_dimension_numbers<[1], [0], [0], [1], [0, 0, 1, 1], [], []>} : vector<112x256xbf16>, vector<256x32xbf16>, vector<112x32xf32> -> vector<112x32xf32>
    %cst_3 = arith.constant 0.000000e+00 : f32
    %3 = vector.broadcast %cst_3 : f32 to vector<112x32xf32>
    %4 = arith.cmpf ogt, %2, %3 : vector<112x32xf32>
    %cst_4 = arith.constant 2.000000e-01 : f32
    %5 = vector.broadcast %cst_4 : f32 to vector<112x32xf32>
    %6 = arith.mulf %5, %2 : vector<112x32xf32>
    %7 = arith.select %4, %2, %6 : vector<112x32xi1>, vector<112x32xf32>
    %8 = vector.shape_cast %7 : vector<112x32xf32> to vector<14x8x32xf32>
    %cst_5 = arith.constant dense<0.000000e+00> : vector<8x32xf32>
    %9 = vector.multi_reduction <add>, %8, %cst_5 [0] : vector<14x8x32xf32> to vector<8x32xf32>
    %c0_6 = arith.constant 0 : index
    %c0_7 = arith.constant 0 : index
    %10 = vector.load %arg3[%c0_6, %c0_7] : memref<8x32xf32, #tpu.memory_space<vmem>>, vector<8x32xf32>
    tpu.vector_store %arg3[%c0_6, %c0_7], %9 {strides = array<i32>} : memref<8x32xf32, #tpu.memory_space<vmem>>, vector<8x32xf32>,
    %11 = arith.mulf %8, %8 : vector<14x8x32xf32>
    %cst_8 = arith.constant dense<0.000000e+00> : vector<8x32xf32>
    %12 = vector.multi_reduction <add>, %11, %cst_8 [0] : vector<14x8x32xf32> to vector<8x32xf32>
    %c0_9 = arith.constant 0 : index
    %c0_10 = arith.constant 0 : index
    %13 = vector.load %arg4[%c0_9, %c0_10] : memref<8x32xf32, #tpu.memory_space<vmem>>, vector<8x32xf32>
    tpu.vector_store %arg4[%c0_9, %c0_10], %12 {strides = array<i32>} : memref<8x32xf32, #tpu.memory_space<vmem>>, vector<8x32xf32>,
    return
  }
  func.func @transform_0(%arg0: i32) -> (i32, i32) {
    %c0_i32 = arith.constant 0 : i32
    %c0_i32_0 = arith.constant 0 : i32
    return %arg0, %c0_i32 : i32, i32
  }
  func.func @transform_1(%arg0: i32) -> (i32, i32) {
    %c0_i32 = arith.constant 0 : i32
    %c0_i32_0 = arith.constant 0 : i32
    %c0_i32_1 = arith.constant 0 : i32
    return %c0_i32, %c0_i32_0 : i32, i32
  }
  func.func @transform_2(%arg0: i32) -> (i32, i32) {
    %c0_i32 = arith.constant 0 : i32
    %c0_i32_0 = arith.constant 0 : i32
    return %arg0, %c0_i32 : i32, i32
  }
  func.func @transform_3(%arg0: i32) -> (i32, i32) {
    %c0_i32 = arith.constant 0 : i32
    %c0_i32_0 = arith.constant 0 : i32
    return %arg0, %c0_i32 : i32, i32
  }
}

module attributes {stable_mosaic.version = 11 : i64} {
  func.func @_conv_lrelu_affine_kernel(%arg0: i32, %arg1: memref<112x256xbf16, #tpu.memory_space<vmem>>, %arg2: memref<256x32xbf16, #tpu.memory_space<vmem>>, %arg3: memref<1x32xf32, #tpu.memory_space<vmem>>, %arg4: memref<1x32xf32, #tpu.memory_space<vmem>>, %arg5: memref<112x32xbf16, #tpu.memory_space<vmem>>) attributes {dimension_semantics = [#tpu.dimension_semantics<parallel>], iteration_bounds = array<i64: 1>, scalar_prefetch = 0 : i64, scratch_operands = 0 : i64, tpu.core_type = #tpu.core_type<tc>, window_params = [{transform_indices = @transform_0, window_bounds = array<i64: 112, 256>}, {pipeline_mode = #tpu.pipeline_mode<synchronous>, transform_indices = @transform_1, window_bounds = array<i64: 256, 32>}, {pipeline_mode = #tpu.pipeline_mode<synchronous>, transform_indices = @transform_2, window_bounds = array<i64: 1, 32>}, {pipeline_mode = #tpu.pipeline_mode<synchronous>, transform_indices = @transform_3, window_bounds = array<i64: 1, 32>}, {transform_indices = @transform_4, window_bounds = array<i64: 112, 32>}]} {
    %c0 = arith.constant 0 : index
    %c0_0 = arith.constant 0 : index
    %0 = vector.load %arg1[%c0, %c0_0] : memref<112x256xbf16, #tpu.memory_space<vmem>>, vector<112x256xbf16>
    %c0_1 = arith.constant 0 : index
    %c0_2 = arith.constant 0 : index
    %1 = vector.load %arg2[%c0_1, %c0_2] : memref<256x32xbf16, #tpu.memory_space<vmem>>, vector<256x32xbf16>
    %cst = arith.constant dense<0.000000e+00> : vector<112x32xf32>
    %2 = tpu.matmul %0, %1, %cst {dimension_numbers = #tpu.dot_dimension_numbers<[1], [0], [0], [1], [0, 0, 1, 1], [], []>} : vector<112x256xbf16>, vector<256x32xbf16>, vector<112x32xf32> -> vector<112x32xf32>
    %cst_3 = arith.constant 0.000000e+00 : f32
    %3 = vector.broadcast %cst_3 : f32 to vector<112x32xf32>
    %4 = arith.cmpf ogt, %2, %3 : vector<112x32xf32>
    %cst_4 = arith.constant 2.000000e-01 : f32
    %5 = vector.broadcast %cst_4 : f32 to vector<112x32xf32>
    %6 = arith.mulf %5, %2 : vector<112x32xf32>
    %7 = arith.select %4, %2, %6 : vector<112x32xi1>, vector<112x32xf32>
    %c0_5 = arith.constant 0 : index
    %c0_6 = arith.constant 0 : index
    %8 = vector.load %arg3[%c0_5, %c0_6] : memref<1x32xf32, #tpu.memory_space<vmem>>, vector<1x32xf32>
    %9 = vector.broadcast %8 : vector<1x32xf32> to vector<112x32xf32>
    %10 = arith.mulf %7, %9 : vector<112x32xf32>
    %c0_7 = arith.constant 0 : index
    %c0_8 = arith.constant 0 : index
    %11 = vector.load %arg4[%c0_7, %c0_8] : memref<1x32xf32, #tpu.memory_space<vmem>>, vector<1x32xf32>
    %12 = vector.broadcast %11 : vector<1x32xf32> to vector<112x32xf32>
    %13 = arith.addf %10, %12 : vector<112x32xf32>
    %14 = arith.truncf %13 : vector<112x32xf32> to vector<112x32xbf16>
    %c0_9 = arith.constant 0 : index
    %c0_10 = arith.constant 0 : index
    %15 = vector.load %arg5[%c0_9, %c0_10] : memref<112x32xbf16, #tpu.memory_space<vmem>>, vector<112x32xbf16>
    tpu.vector_store %arg5[%c0_9, %c0_10], %14 {strides = array<i32>} : memref<112x32xbf16, #tpu.memory_space<vmem>>, vector<112x32xbf16>,
    return
  }
  func.func @transform_0(%arg0: i32) -> (i32, i32) {
    %c0_i32 = arith.constant 0 : i32
    %c0_i32_0 = arith.constant 0 : i32
    return %arg0, %c0_i32 : i32, i32
  }
  func.func @transform_1(%arg0: i32) -> (i32, i32) {
    %c0_i32 = arith.constant 0 : i32
    %c0_i32_0 = arith.constant 0 : i32
    %c0_i32_1 = arith.constant 0 : i32
    return %c0_i32, %c0_i32_0 : i32, i32
  }
  func.func @transform_2(%arg0: i32) -> (i32, i32) {
    %c0_i32 = arith.constant 0 : i32
    %c0_i32_0 = arith.constant 0 : i32
    %c0_i32_1 = arith.constant 0 : i32
    return %c0_i32, %c0_i32_0 : i32, i32
  }
  func.func @transform_3(%arg0: i32) -> (i32, i32) {
    %c0_i32 = arith.constant 0 : i32
    %c0_i32_0 = arith.constant 0 : i32
    %c0_i32_1 = arith.constant 0 : i32
    return %c0_i32, %c0_i32_0 : i32, i32
  }
  func.func @transform_4(%arg0: i32) -> (i32, i32) {
    %c0_i32 = arith.constant 0 : i32
    %c0_i32_0 = arith.constant 0 : i32
    return %arg0, %c0_i32 : i32, i32
  }
}

module attributes {stable_mosaic.version = 11 : i64} {
  func.func @_conv_lrelu_stats_kernel(%arg0: i32, %arg1: memref<56x512xbf16, #tpu.memory_space<vmem>>, %arg2: memref<512x64xbf16, #tpu.memory_space<vmem>>, %arg3: memref<8x64xf32, #tpu.memory_space<vmem>>, %arg4: memref<8x64xf32, #tpu.memory_space<vmem>>) attributes {dimension_semantics = [#tpu.dimension_semantics<parallel>], iteration_bounds = array<i64: 1>, scalar_prefetch = 0 : i64, scratch_operands = 0 : i64, tpu.core_type = #tpu.core_type<tc>, window_params = [{transform_indices = @transform_0, window_bounds = array<i64: 56, 512>}, {pipeline_mode = #tpu.pipeline_mode<synchronous>, transform_indices = @transform_1, window_bounds = array<i64: 512, 64>}, {transform_indices = @transform_2, window_bounds = array<i64: 8, 64>}, {transform_indices = @transform_3, window_bounds = array<i64: 8, 64>}]} {
    %c0 = arith.constant 0 : index
    %c0_0 = arith.constant 0 : index
    %0 = vector.load %arg1[%c0, %c0_0] : memref<56x512xbf16, #tpu.memory_space<vmem>>, vector<56x512xbf16>
    %c0_1 = arith.constant 0 : index
    %c0_2 = arith.constant 0 : index
    %1 = vector.load %arg2[%c0_1, %c0_2] : memref<512x64xbf16, #tpu.memory_space<vmem>>, vector<512x64xbf16>
    %cst = arith.constant dense<0.000000e+00> : vector<56x64xf32>
    %2 = tpu.matmul %0, %1, %cst {dimension_numbers = #tpu.dot_dimension_numbers<[1], [0], [0], [1], [0, 0, 1, 1], [], []>} : vector<56x512xbf16>, vector<512x64xbf16>, vector<56x64xf32> -> vector<56x64xf32>
    %cst_3 = arith.constant 0.000000e+00 : f32
    %3 = vector.broadcast %cst_3 : f32 to vector<56x64xf32>
    %4 = arith.cmpf ogt, %2, %3 : vector<56x64xf32>
    %cst_4 = arith.constant 2.000000e-01 : f32
    %5 = vector.broadcast %cst_4 : f32 to vector<56x64xf32>
    %6 = arith.mulf %5, %2 : vector<56x64xf32>
    %7 = arith.select %4, %2, %6 : vector<56x64xi1>, vector<56x64xf32>
    %8 = vector.shape_cast %7 : vector<56x64xf32> to vector<7x8x64xf32>
    %cst_5 = arith.constant dense<0.000000e+00> : vector<8x64xf32>
    %9 = vector.multi_reduction <add>, %8, %cst_5 [0] : vector<7x8x64xf32> to vector<8x64xf32>
    %c0_6 = arith.constant 0 : index
    %c0_7 = arith.constant 0 : index
    %10 = vector.load %arg3[%c0_6, %c0_7] : memref<8x64xf32, #tpu.memory_space<vmem>>, vector<8x64xf32>
    tpu.vector_store %arg3[%c0_6, %c0_7], %9 {strides = array<i32>} : memref<8x64xf32, #tpu.memory_space<vmem>>, vector<8x64xf32>,
    %11 = arith.mulf %8, %8 : vector<7x8x64xf32>
    %cst_8 = arith.constant dense<0.000000e+00> : vector<8x64xf32>
    %12 = vector.multi_reduction <add>, %11, %cst_8 [0] : vector<7x8x64xf32> to vector<8x64xf32>
    %c0_9 = arith.constant 0 : index
    %c0_10 = arith.constant 0 : index
    %13 = vector.load %arg4[%c0_9, %c0_10] : memref<8x64xf32, #tpu.memory_space<vmem>>, vector<8x64xf32>
    tpu.vector_store %arg4[%c0_9, %c0_10], %12 {strides = array<i32>} : memref<8x64xf32, #tpu.memory_space<vmem>>, vector<8x64xf32>,
    return
  }
  func.func @transform_0(%arg0: i32) -> (i32, i32) {
    %c0_i32 = arith.constant 0 : i32
    %c0_i32_0 = arith.constant 0 : i32
    return %arg0, %c0_i32 : i32, i32
  }
  func.func @transform_1(%arg0: i32) -> (i32, i32) {
    %c0_i32 = arith.constant 0 : i32
    %c0_i32_0 = arith.constant 0 : i32
    %c0_i32_1 = arith.constant 0 : i32
    return %c0_i32, %c0_i32_0 : i32, i32
  }
  func.func @transform_2(%arg0: i32) -> (i32, i32) {
    %c0_i32 = arith.constant 0 : i32
    %c0_i32_0 = arith.constant 0 : i32
    return %arg0, %c0_i32 : i32, i32
  }
  func.func @transform_3(%arg0: i32) -> (i32, i32) {
    %c0_i32 = arith.constant 0 : i32
    %c0_i32_0 = arith.constant 0 : i32
    return %arg0, %c0_i32 : i32, i32
  }
}

module attributes {stable_mosaic.version = 11 : i64} {
  func.func @_conv_lrelu_affine_kernel(%arg0: i32, %arg1: memref<56x512xbf16, #tpu.memory_space<vmem>>, %arg2: memref<512x64xbf16, #tpu.memory_space<vmem>>, %arg3: memref<1x64xf32, #tpu.memory_space<vmem>>, %arg4: memref<1x64xf32, #tpu.memory_space<vmem>>, %arg5: memref<56x64xbf16, #tpu.memory_space<vmem>>) attributes {dimension_semantics = [#tpu.dimension_semantics<parallel>], iteration_bounds = array<i64: 1>, scalar_prefetch = 0 : i64, scratch_operands = 0 : i64, tpu.core_type = #tpu.core_type<tc>, window_params = [{transform_indices = @transform_0, window_bounds = array<i64: 56, 512>}, {pipeline_mode = #tpu.pipeline_mode<synchronous>, transform_indices = @transform_1, window_bounds = array<i64: 512, 64>}, {pipeline_mode = #tpu.pipeline_mode<synchronous>, transform_indices = @transform_2, window_bounds = array<i64: 1, 64>}, {pipeline_mode = #tpu.pipeline_mode<synchronous>, transform_indices = @transform_3, window_bounds = array<i64: 1, 64>}, {transform_indices = @transform_4, window_bounds = array<i64: 56, 64>}]} {
    %c0 = arith.constant 0 : index
    %c0_0 = arith.constant 0 : index
    %0 = vector.load %arg1[%c0, %c0_0] : memref<56x512xbf16, #tpu.memory_space<vmem>>, vector<56x512xbf16>
    %c0_1 = arith.constant 0 : index
    %c0_2 = arith.constant 0 : index
    %1 = vector.load %arg2[%c0_1, %c0_2] : memref<512x64xbf16, #tpu.memory_space<vmem>>, vector<512x64xbf16>
    %cst = arith.constant dense<0.000000e+00> : vector<56x64xf32>
    %2 = tpu.matmul %0, %1, %cst {dimension_numbers = #tpu.dot_dimension_numbers<[1], [0], [0], [1], [0, 0, 1, 1], [], []>} : vector<56x512xbf16>, vector<512x64xbf16>, vector<56x64xf32> -> vector<56x64xf32>
    %cst_3 = arith.constant 0.000000e+00 : f32
    %3 = vector.broadcast %cst_3 : f32 to vector<56x64xf32>
    %4 = arith.cmpf ogt, %2, %3 : vector<56x64xf32>
    %cst_4 = arith.constant 2.000000e-01 : f32
    %5 = vector.broadcast %cst_4 : f32 to vector<56x64xf32>
    %6 = arith.mulf %5, %2 : vector<56x64xf32>
    %7 = arith.select %4, %2, %6 : vector<56x64xi1>, vector<56x64xf32>
    %c0_5 = arith.constant 0 : index
    %c0_6 = arith.constant 0 : index
    %8 = vector.load %arg3[%c0_5, %c0_6] : memref<1x64xf32, #tpu.memory_space<vmem>>, vector<1x64xf32>
    %9 = vector.broadcast %8 : vector<1x64xf32> to vector<56x64xf32>
    %10 = arith.mulf %7, %9 : vector<56x64xf32>
    %c0_7 = arith.constant 0 : index
    %c0_8 = arith.constant 0 : index
    %11 = vector.load %arg4[%c0_7, %c0_8] : memref<1x64xf32, #tpu.memory_space<vmem>>, vector<1x64xf32>
    %12 = vector.broadcast %11 : vector<1x64xf32> to vector<56x64xf32>
    %13 = arith.addf %10, %12 : vector<56x64xf32>
    %14 = arith.truncf %13 : vector<56x64xf32> to vector<56x64xbf16>
    %c0_9 = arith.constant 0 : index
    %c0_10 = arith.constant 0 : index
    %15 = vector.load %arg5[%c0_9, %c0_10] : memref<56x64xbf16, #tpu.memory_space<vmem>>, vector<56x64xbf16>
    tpu.vector_store %arg5[%c0_9, %c0_10], %14 {strides = array<i32>} : memref<56x64xbf16, #tpu.memory_space<vmem>>, vector<56x64xbf16>,
    return
  }
  func.func @transform_0(%arg0: i32) -> (i32, i32) {
    %c0_i32 = arith.constant 0 : i32
    %c0_i32_0 = arith.constant 0 : i32
    return %arg0, %c0_i32 : i32, i32
  }
  func.func @transform_1(%arg0: i32) -> (i32, i32) {
    %c0_i32 = arith.constant 0 : i32
    %c0_i32_0 = arith.constant 0 : i32
    %c0_i32_1 = arith.constant 0 : i32
    return %c0_i32, %c0_i32_0 : i32, i32
  }
  func.func @transform_2(%arg0: i32) -> (i32, i32) {
    %c0_i32 = arith.constant 0 : i32
    %c0_i32_0 = arith.constant 0 : i32
    %c0_i32_1 = arith.constant 0 : i32
    return %c0_i32, %c0_i32_0 : i32, i32
  }
  func.func @transform_3(%arg0: i32) -> (i32, i32) {
    %c0_i32 = arith.constant 0 : i32
    %c0_i32_0 = arith.constant 0 : i32
    %c0_i32_1 = arith.constant 0 : i32
    return %c0_i32, %c0_i32_0 : i32, i32
  }
  func.func @transform_4(%arg0: i32) -> (i32, i32) {
    %c0_i32 = arith.constant 0 : i32
    %c0_i32_0 = arith.constant 0 : i32
    return %arg0, %c0_i32 : i32, i32
  }
}

module attributes {stable_mosaic.version = 11 : i64} {
  func.func @_conv_bias_kernel(%arg0: i32, %arg1: memref<24x1024xbf16, #tpu.memory_space<vmem>>, %arg2: memref<1024x128xbf16, #tpu.memory_space<vmem>>, %arg3: memref<1x128xf32, #tpu.memory_space<vmem>>, %arg4: memref<24x128xf32, #tpu.memory_space<vmem>>) attributes {dimension_semantics = [#tpu.dimension_semantics<parallel>], iteration_bounds = array<i64: 1>, scalar_prefetch = 0 : i64, scratch_operands = 0 : i64, tpu.core_type = #tpu.core_type<tc>, window_params = [{transform_indices = @transform_0, window_bounds = array<i64: 24, 1024>}, {pipeline_mode = #tpu.pipeline_mode<synchronous>, transform_indices = @transform_1, window_bounds = array<i64: 1024, 128>}, {pipeline_mode = #tpu.pipeline_mode<synchronous>, transform_indices = @transform_2, window_bounds = array<i64: 1, 128>}, {transform_indices = @transform_3, window_bounds = array<i64: 24, 128>}]} {
    %c0 = arith.constant 0 : index
    %c0_0 = arith.constant 0 : index
    %0 = vector.load %arg1[%c0, %c0_0] : memref<24x1024xbf16, #tpu.memory_space<vmem>>, vector<24x1024xbf16>
    %c0_1 = arith.constant 0 : index
    %c0_2 = arith.constant 0 : index
    %1 = vector.load %arg2[%c0_1, %c0_2] : memref<1024x128xbf16, #tpu.memory_space<vmem>>, vector<1024x128xbf16>
    %cst = arith.constant dense<0.000000e+00> : vector<24x128xf32>
    %2 = tpu.matmul %0, %1, %cst {dimension_numbers = #tpu.dot_dimension_numbers<[1], [0], [0], [1], [0, 0, 1, 1], [], []>} : vector<24x1024xbf16>, vector<1024x128xbf16>, vector<24x128xf32> -> vector<24x128xf32>
    %c0_3 = arith.constant 0 : index
    %c0_4 = arith.constant 0 : index
    %3 = vector.load %arg3[%c0_3, %c0_4] : memref<1x128xf32, #tpu.memory_space<vmem>>, vector<1x128xf32>
    %4 = vector.broadcast %3 : vector<1x128xf32> to vector<24x128xf32>
    %5 = arith.addf %2, %4 : vector<24x128xf32>
    %c0_5 = arith.constant 0 : index
    %c0_6 = arith.constant 0 : index
    %6 = vector.load %arg4[%c0_5, %c0_6] : memref<24x128xf32, #tpu.memory_space<vmem>>, vector<24x128xf32>
    tpu.vector_store %arg4[%c0_5, %c0_6], %5 {strides = array<i32>} : memref<24x128xf32, #tpu.memory_space<vmem>>, vector<24x128xf32>,
    return
  }
  func.func @transform_0(%arg0: i32) -> (i32, i32) {
    %c0_i32 = arith.constant 0 : i32
    %c0_i32_0 = arith.constant 0 : i32
    return %arg0, %c0_i32 : i32, i32
  }
  func.func @transform_1(%arg0: i32) -> (i32, i32) {
    %c0_i32 = arith.constant 0 : i32
    %c0_i32_0 = arith.constant 0 : i32
    %c0_i32_1 = arith.constant 0 : i32
    return %c0_i32, %c0_i32_0 : i32, i32
  }
  func.func @transform_2(%arg0: i32) -> (i32, i32) {
    %c0_i32 = arith.constant 0 : i32
    %c0_i32_0 = arith.constant 0 : i32
    %c0_i32_1 = arith.constant 0 : i32
    return %c0_i32, %c0_i32_0 : i32, i32
  }
  func.func @transform_3(%arg0: i32) -> (i32, i32) {
    %c0_i32 = arith.constant 0 : i32
    %c0_i32_0 = arith.constant 0 : i32
    return %arg0, %c0_i32 : i32, i32
  }
}

</mosaic_0001>

<bundles_post_ra>
// kernel: patch_discriminator_forward.7
= control target key start
LH: loop header
LB: loop body
LE: loop exit
PB: predicated region body
PF: predicated region fallthrough
CT: control target
= control target key end

     0   :  { %vm151_vm0 = vcmask 523264   ;;  %vm371_vm6 = vcmask 130048   ;;  %s897_s1 = inlined_call_operand.vmem [shape: bf16[64,16], index: 1, kind: input, shape index: {}]   ;;  %s898_s0 = inlined_call_operand.vmem [shape: bf16[240,64], index: 0, kind: input, shape index: {}]   ;;  %s899_s2 = inlined_call_operand.vmem [shape: f32[8,16], index: 2, kind: output, shape index: {0}]   ;;  %s900_s3 = inlined_call_operand.vmem [shape: f32[8,16], index: 3, kind: output, shape index: {1}]  }
   0x1   :  { %v639_v0 = vld [vmem:[%s897_s1 + $0x18] sm:$0xff]  ;;  %v638_v1 = vld [vmem:[%s897_s1 + $0x10] sm:$0xff]  ;;  %v637_v2 = vld [vmem:[%s897_s1 + $0x8] sm:$0xff] }
   0x2   :  { %201 = vmatpush.bf16.msra.mxu0 %v639_v0  ;;  %640 = vmatpush.bf16.msra.mxu1 %v639_v0  ;;  %v636_v3 = vld [vmem:[%s897_s1] sm:$0xff]  ;;  %v622_v8 = vld [vmem:[%s898_s0 + $0x8] sm:$0xff]  ;;  %v623_v12 = vld [vmem:[%s898_s0 + $0x10] sm:$0xff] }
   0x3   :  { %641 = vmatpush.bf16.msra.mxu2 %v639_v0  ;;  %642 = vmatpush.bf16.msra.mxu3 %v639_v0  ;;  %v621_v4 = vld [vmem:[%s898_s0] sm:$0xff]  ;;  %v626_v9 = vld [vmem:[%s898_s0 + $0x28] sm:$0xff]  ;;  %v627_v13 = vld [vmem:[%s898_s0 + $0x30] sm:$0xff] }
   0x4   :  { %v625_v5 = vld [vmem:[%s898_s0 + $0x20] sm:$0xff]  ;;  %v630_v10 = vld [vmem:[%s898_s0 + $0x48] sm:$0xff]  ;;  %v631_v14 = vld [vmem:[%s898_s0 + $0x50] sm:$0xff] }
   0x5   :  { %v629_v6 = vld [vmem:[%s898_s0 + $0x40] sm:$0xff]  ;;  %v634_v11 = vld [vmem:[%s898_s0 + $0x68] sm:$0xff]  ;;  %v635_v15 = vld [vmem:[%s898_s0 + $0x70] sm:$0xff] }
   0x6   :  { %202 = vmatpush.bf16.msra.mxu0 %v638_v1  ;;  %643 = vmatpush.bf16.msra.mxu1 %v638_v1  ;;  %v633_v7 = vld [vmem:[%s898_s0 + $0x60] sm:$0xff]  ;;  %v624_v16 = vld [vmem:[%s898_s0 + $0x18] sm:$0xff] }
   0x7   :  { %644 = vmatpush.bf16.msra.mxu2 %v638_v1  ;;  %645 = vmatpush.bf16.msra.mxu3 %v638_v1  ;;  %v628_v17 = vld [vmem:[%s898_s0 + $0x38] sm:$0xff] }
   0x8   :  { %v632_v18 = vld [vmem:[%s898_s0 + $0x58] sm:$0xff] }
   0xa   :  { %203 = vmatpush.bf16.msra.mxu0 %v637_v2  ;;  %646 = vmatpush.bf16.msra.mxu1 %v637_v2 }
   0xb   :  { %647 = vmatpush.bf16.msra.mxu2 %v637_v2  ;;  %648 = vmatpush.bf16.msra.mxu3 %v637_v2 }
   0xe   :  { %204 = vmatpush.bf16.msra.mxu0 %v636_v3  ;;  %649 = vmatpush.bf16.msra.mxu1 %v636_v3 }
   0xf   :  { %650 = vmatpush.bf16.msra.mxu2 %v636_v3  ;;  %651 = vmatpush.bf16.msra.mxu3 %v636_v3 }
  0x11   :  { %606 = vmatmul.msk.bf16.vlgmr.msra.gmra.mxu0 %vm151_vm0, %v621_v4  ;;  %610 = vmatmul.msk.bf16.vlgmr.msra.gmra.mxu1 %vm151_vm0, %v625_v5 }
  0x12   :  { %614 = vmatmul.msk.bf16.vlgmr.msra.gmra.mxu2 %vm151_vm0, %v629_v6  ;;  %618 = vmatmul.msk.bf16.vlgmr.msra.gmra.mxu3 %vm151_vm0, %v633_v7 }
  0x21   :  { %607 = vmatmul.msk.bf16.gmra.mxu0 %vm151_vm0, %v622_v8  ;;  %611 = vmatmul.msk.bf16.gmra.mxu1 %vm151_vm0, %v626_v9 }
  0x22   :  { %615 = vmatmul.msk.bf16.gmra.mxu2 %vm151_vm0, %v630_v10  ;;  %619 = vmatmul.msk.bf16.gmra.mxu3 %vm151_vm0, %v634_v11 }
  0x31   :  { %608 = vmatmul.msk.bf16.gmra.mxu0 %vm151_vm0, %v623_v12  ;;  %612 = vmatmul.msk.bf16.gmra.mxu1 %vm151_vm0, %v627_v13 }
  0x32   :  { %616 = vmatmul.msk.bf16.gmra.mxu2 %vm151_vm0, %v631_v14  ;;  %620 = vmatmul.msk.bf16.gmra.mxu3 %vm151_vm0, %v635_v15 }
  0x41   :  { %609 = vmatmul.msk.bf16.gmra.mxu0 %vm151_vm0, %v624_v16  ;;  %613 = vmatmul.msk.bf16.gmra.mxu1 %vm151_vm0, %v628_v17 }
  0x42   :  { %617 = vmatmul.msk.bf16.gmra.mxu2 %vm151_vm0, %v632_v18 }
  0x8e   :  { %v206_v19 = vpop.f32.mrf.mxu0  ;;  %v744_v20 = vpop.f32.mrf.mxu1 }
  0x8f   :  { %v311_v33 = vmul.f32 0.2, %v206_v19  ;;  %vm281_vm2 = vcmp.gt.f32.partialorder %v206_v19, 0.0  ;;  %v319_v3 = vmul.f32 0.2, %v744_v20  ;;  %vm289_vm9 = vcmp.gt.f32.partialorder %v744_v20, 0.0 }
  0x91   :  { %v341_v40 = vsel %vm281_vm2, %v206_v19, %v311_v33  ;;  %v349_v17 = vsel %vm289_vm9, %v744_v20, %v319_v3 }
  0x92   :  { %v432_v47 = vmul.f32 %v341_v40, %v341_v40  ;;  %v372_v51 = vsel %vm371_vm6, %v341_v40, 0.0  ;;  %v440_v40 = vmul.f32 %v349_v17, %v349_v17 }
  0x94   :  { %v462_v59 = vsel %vm371_vm6, %v432_v47, 0.0 }
  0x95   :  { %v748_v23 = vpop.f32.mrf.mxu2  ;;  %v762_v39 = vpop.f32.mrf.mxu3 }
  0x96   :  { %v208_v21 = vpop.f32.mrf.mxu0  ;;  %v746_v22 = vpop.f32.mrf.mxu1  ;;  %vm297_vm2 = vcmp.gt.f32.partialorder %v748_v23, 0.0 }
  0x97   :  { %v312_v32 = vmul.f32 0.2, %v208_v21  ;;  %vm282_vm1 = vcmp.gt.f32.partialorder %v208_v21, 0.0  ;;  %v320_v10 = vmul.f32 0.2, %v746_v22  ;;  %vm290_vm10 = vcmp.gt.f32.partialorder %v746_v22, 0.0 }
  0x99   :  { %v342_v37 = vsel %vm282_vm1, %v208_v21, %v312_v32  ;;  %v350_v33 = vsel %vm290_vm10, %v746_v22, %v320_v10 }
  0x9a   :  { %v433_v43 = vmul.f32 %v342_v37, %v342_v37  ;;  %v373_v48 = vsel %vm371_vm6, %v342_v37, 0.0 }
  0x9b   :  { %v374_v56 = vadd.f32 %v373_v48, %v372_v51  ;;  %v387_v48 = vsel %vm371_vm6, %v349_v17, 0.0 }
  0x9c   :  { %v463_v52 = vsel %vm371_vm6, %v433_v43, 0.0 }
  0x9d   :  { %v752_v26 = vpop.f32.mrf.mxu2  ;;  %v464_v0 = vadd.f32 %v463_v52, %v462_v59  ;;  %v778_v7 = vpop.f32.mrf.mxu3 }
  0x9e   :  { %v211_v24 = vpop.f32.mrf.mxu0  ;;  %v750_v25 = vpop.f32.mrf.mxu1  ;;  %v328_v17 = vmul.f32 0.2, %v752_v26 }
  0x9f   :  { %v313_v34 = vmul.f32 0.2, %v211_v24  ;;  %vm283_vm3 = vcmp.gt.f32.partialorder %v211_v24, 0.0  ;;  %v321_v18 = vmul.f32 0.2, %v750_v25  ;;  %vm291_vm12 = vcmp.gt.f32.partialorder %v750_v25, 0.0 }
  0xa1   :  { %v343_v41 = vsel %vm283_vm3, %v211_v24, %v313_v34  ;;  %vm298_vm3 = vcmp.gt.f32.partialorder %v752_v26, 0.0 }
  0xa2   :  { %v434_v49 = vmul.f32 %v343_v41, %v343_v41  ;;  %v375_v53 = vsel %vm371_vm6, %v343_v41, 0.0 }
  0xa3   :  { %v376_v1 = vadd.f32 %v375_v53, %v374_v56  ;;  %v389_v56 = vsel %vm371_vm6, %v350_v33, 0.0 }
  0xa4   :  { %v465_v60 = vsel %vm371_vm6, %v434_v49, 0.0  ;;  %v441_v49 = vmul.f32 %v350_v33, %v350_v33 }
  0xa5   :  { %v756_v29 = vpop.f32.mrf.mxu2  ;;  %v466_v8 = vadd.f32 %v465_v60, %v464_v0  ;;  %v802_v51 = vpop.f32.mrf.mxu3 }
  0xa6   :  { %v213_v27 = vpop.f32.mrf.mxu0  ;;  %v754_v28 = vpop.f32.mrf.mxu1  ;;  %v479_v0 = vsel %vm371_vm6, %v441_v49, 0.0  ;;  %v329_v33 = vmul.f32 0.2, %v756_v29 }
  0xa7   :  { %v314_v38 = vmul.f32 0.2, %v213_v27  ;;  %vm284_vm4 = vcmp.gt.f32.partialorder %v213_v27, 0.0  ;;  %vm292_vm13 = vcmp.gt.f32.partialorder %v754_v28, 0.0 }
  0xa9   :  { %v344_v45 = vsel %vm284_vm4, %v213_v27, %v314_v38  ;;  %vm299_vm4 = vcmp.gt.f32.partialorder %v756_v29, 0.0 }
  0xaa   :  { %v435_v54 = vmul.f32 %v344_v45, %v344_v45  ;;  %v377_v61 = vsel %vm371_vm6, %v344_v45, 0.0  ;;  %v351_v45 = vsel %vm291_vm12, %v750_v25, %v321_v18  ;;  %v477_v25 = vsel %vm371_vm6, %v440_v40, 0.0 }
  0xab   :  { %v378_v9 = vadd.f32 %v377_v61, %v376_v1  ;;  %v358_v40 = vsel %vm298_vm3, %v752_v26, %v328_v17  ;;  %vm306_vm12 = vcmp.gt.f32.partialorder %v778_v7, 0.0 }
  0xac   :  { %v467_v4 = vsel %vm371_vm6, %v435_v54, 0.0  ;;  %v449_v26 = vmul.f32 %v358_v40, %v358_v40 }
  0xad   :  { %v760_v36 = vpop.f32.mrf.mxu2  ;;  %v468_v15 = vadd.f32 %v467_v4, %v466_v8 }
  0xae   :  { %v216_v30 = vpop.f32.mrf.mxu0  ;;  %v758_v31 = vpop.f32.mrf.mxu1 }
  0xaf   :  { %v315_v42 = vmul.f32 0.2, %v216_v30  ;;  %vm285_vm5 = vcmp.gt.f32.partialorder %v216_v30, 0.0  ;;  %v323_v22 = vmul.f32 0.2, %v758_v31  ;;  %vm293_vm14 = vcmp.gt.f32.partialorder %v758_v31, 0.0 }
  0xb1   :  { %v345_v50 = vsel %vm285_vm5, %v216_v30, %v315_v42  ;;  %v353_v59 = vsel %vm293_vm14, %v758_v31, %v323_v22  ;;  %v327_v31 = vmul.f32 0.2, %v748_v23  ;;  %vm300_vm5 = vcmp.gt.f32.partialorder %v760_v36, 0.0 }
  0xb2   :  { %v436_v62 = vmul.f32 %v345_v50, %v345_v50  ;;  %v379_v5 = vsel %vm371_vm6, %v345_v50, 0.0 }
  0xb3   :  { %v380_v16 = vadd.f32 %v379_v5, %v378_v9  ;;  %v444_v9 = vmul.f32 %v353_v59, %v353_v59 }
  0xb4   :  { %v469_v11 = vsel %vm371_vm6, %v436_v62, 0.0 }
  0xb5   :  { %v773_v63 = vpop.f32.mrf.mxu2  ;;  %v470_v27 = vadd.f32 %v469_v11, %v468_v15 }
  0xb6   :  { %v218_v35 = vpop.f32.mrf.mxu0  ;;  %v764_v44 = vpop.f32.mrf.mxu1 }
  0xb7   :  { %v316_v46 = vmul.f32 0.2, %v218_v35  ;;  %vm286_vm7 = vcmp.gt.f32.partialorder %v218_v35, 0.0  ;;  %v324_v53 = vmul.f32 0.2, %v764_v44  ;;  %vm294_vm15 = vcmp.gt.f32.partialorder %v764_v44, 0.0 }
  0xb9   :  { %v346_v57 = vsel %vm286_vm7, %v218_v35, %v316_v46  ;;  %v322_v35 = vmul.f32 0.2, %v754_v28  ;;  %vm301_vm7 = vcmp.gt.f32.partialorder %v773_v63, 0.0 }
  0xba   :  { %v437_v6 = vmul.f32 %v346_v57, %v346_v57  ;;  %v381_v12 = vsel %vm371_vm6, %v346_v57, 0.0  ;;  %v442_v57 = vmul.f32 %v351_v45, %v351_v45 }
  0xbb   :  { %v382_v30 = vadd.f32 %v381_v12, %v380_v16  ;;  %v352_v52 = vsel %vm292_vm13, %v754_v28, %v322_v35  ;;  %v391_v28 = vsel %vm371_vm6, %v351_v45, 0.0  ;;  %vm307_vm13 = vcmp.gt.f32.partialorder %v802_v51, 0.0 }
  0xbc   :  { %v471_v19 = vsel %vm371_vm6, %v437_v6, 0.0  ;;  %v443_v1 = vmul.f32 %v352_v52, %v352_v52  ;;  %v481_v6 = vsel %vm371_vm6, %v442_v57, 0.0  ;;  %v393_v8 = vsel %vm371_vm6, %v352_v52, 0.0 }
  0xbd   :  { %v472_v20 = vadd.f32 %v471_v19, %v470_v27  ;;  %v795_v43 = vpop.f32.mrf.mxu2 }
  0xbe   :  { %v221_v55 = vpop.f32.mrf.mxu0  ;;  %v241_v14 = vpop.f32.mrf.mxu1 }
  0xbf   :  { %vm287_vm8 = vcmp.gt.f32.partialorder %v221_v55, 0.0  ;;  %v317_v58 = vmul.f32 0.2, %v221_v55  ;;  %v325_v60 = vmul.f32 0.2, %v241_v14  ;;  %vm295_vm0 = vcmp.gt.f32.partialorder %v241_v14, 0.0 }
  0xc1   :  { %v347_v2 = vsel %vm287_vm8, %v221_v55, %v317_v58  ;;  %v355_v10 = vsel %vm295_vm0, %v241_v14, %v325_v60  ;;  %v485_v14 = vsel %vm371_vm6, %v444_v9, 0.0  ;;  %vm302_vm8 = vcmp.gt.f32.partialorder %v795_v43, 0.0 }
  0xc2   :  { %v438_v13 = vmul.f32 %v347_v2, %v347_v2  ;;  %v383_v21 = vsel %vm371_vm6, %v347_v2, 0.0  ;;  %v354_v2 = vsel %vm294_vm15, %v764_v44, %v324_v53  ;;  %v395_v44 = vsel %vm371_vm6, %v353_v59, 0.0 }
  0xc3   :  { %v384_v37 = vadd.f32 %v383_v21, %v382_v30  ;;  %v445_v15 = vmul.f32 %v354_v2, %v354_v2  ;;  %v446_v27 = vmul.f32 %v355_v10, %v355_v10  ;;  %v825_v30 = vpop.f32.mrf.mxu3 }
  0xc4   :  { %v473_v34 = vsel %vm371_vm6, %v438_v13, 0.0  ;;  %v483_v13 = vsel %vm371_vm6, %v443_v1, 0.0  ;;  %vm308_vm14 = vcmp.gt.f32.partialorder %v825_v30, 0.0 }
  0xc5   :  { %v474_v46 = vadd.f32 %v473_v34, %v472_v20  ;;  %v819_v16 = vpop.f32.mrf.mxu2  ;;  %v487_v20 = vsel %vm371_vm6, %v445_v15, 0.0  ;;  %v336_v15 = vmul.f32 0.2, %v778_v7 }
  0xc6   :  { %v223_v24 = vpop.f32.mrf.mxu0  ;;  %v243_v58 = vpop.f32.mrf.mxu1  ;;  %vm303_vm9 = vcmp.gt.f32.partialorder %v819_v16, 0.0 }
  0xc7   :  { %vm288_vm11 = vcmp.gt.f32.partialorder %v223_v24, 0.0  ;;  %v318_v32 = vmul.f32 0.2, %v223_v24  ;;  %v326_v5 = vmul.f32 0.2, %v243_v58  ;;  %vm296_vm1 = vcmp.gt.f32.partialorder %v243_v58, 0.0 }
  0xc9   :  { %v348_v38 = vsel %vm288_vm11, %v223_v24, %v318_v32  ;;  %v356_v18 = vsel %vm296_vm1, %v243_v58, %v326_v5  ;;  %v397_v24 = vsel %vm371_vm6, %v354_v2, 0.0  ;;  %v357_v32 = vsel %vm297_vm2, %v748_v23, %v327_v31 }
  0xca   :  { %v385_v41 = vsel %vm371_vm6, %v348_v38, 0.0  ;;  %v439_v42 = vmul.f32 %v348_v38, %v348_v38  ;;  %v447_v38 = vmul.f32 %v356_v18, %v356_v18  ;;  %v448_v22 = vmul.f32 %v357_v32, %v357_v32 }
  0xcb   :  { %v386_v47 = vadd.f32 %v385_v41, %v384_v37  ;;  %v399_v37 = vsel %vm371_vm6, %v355_v10, 0.0  ;;  %v330_v41 = vmul.f32 0.2, %v760_v36  ;;  %v489_v23 = vsel %vm371_vm6, %v446_v27, 0.0  ;;  %v276_v2 = vpop.f32.mrf.mxu3 }
  0xcc   :  { %v475_v50 = vsel %vm371_vm6, %v439_v42, 0.0  ;;  %v403_v52 = vsel %vm371_vm6, %v357_v32, 0.0  ;;  %v491_v53 = vsel %vm371_vm6, %v447_v38, 0.0  ;;  %v493_v57 = vsel %vm371_vm6, %v448_v22, 0.0 }
  0xcd   :  { %v388_v54 = vadd.f32 %v387_v48, %v386_v47  ;;  %v476_v55 = vadd.f32 %v475_v50, %v474_v46  ;;  %v401_v46 = vsel %vm371_vm6, %v356_v18, 0.0  ;;  %v359_v47 = vsel %vm299_vm4, %v756_v29, %v329_v33  ;;  %v263_v59 = vpop.f32.mrf.mxu2 }
  0xce   :  { %v331_v48 = vmul.f32 0.2, %v773_v63  ;;  %v405_v29 = vsel %vm371_vm6, %v358_v40, 0.0  ;;  %v450_v58 = vmul.f32 %v359_v47, %v359_v47  ;;  %vm304_vm10 = vcmp.gt.f32.partialorder %v263_v59, 0.0 }
  0xcf   :  { %v390_v61 = vadd.f32 %v389_v56, %v388_v54  ;;  %v478_v62 = vadd.f32 %v477_v25, %v476_v55  ;;  %v360_v54 = vsel %vm300_vm5, %v760_v36, %v330_v41  ;;  %v332_v56 = vmul.f32 0.2, %v795_v43 }
  0xd0   :  { %v361_v60 = vsel %vm301_vm7, %v773_v63, %v331_v48  ;;  %v495_v36 = vsel %vm371_vm6, %v449_v26, 0.0  ;;  %v451_v1 = vmul.f32 %v360_v54, %v360_v54  ;;  %v409_v63 = vsel %vm371_vm6, %v360_v54, 0.0 }
  0xd1   :  { %v392_v3 = vadd.f32 %v391_v28, %v390_v61  ;;  %v480_v4 = vadd.f32 %v479_v0, %v478_v62  ;;  %v333_v0 = vmul.f32 0.2, %v819_v16  ;;  %v407_v28 = vsel %vm371_vm6, %v359_v47, 0.0 }
  0xd2   :  { %v362_v5 = vsel %vm302_vm8, %v795_v43, %v332_v56  ;;  %v452_v9 = vmul.f32 %v361_v60, %v361_v60  ;;  %v335_v31 = vmul.f32 0.2, %v762_v39  ;;  %vm305_vm11 = vcmp.gt.f32.partialorder %v762_v39, 0.0 }
  0xd3   :  { %v482_v11 = vadd.f32 %v481_v6, %v480_v4  ;;  %v394_v12 = vadd.f32 %v393_v8, %v392_v3  ;;  %v334_v6 = vmul.f32 0.2, %v263_v59  ;;  %v497_v8 = vsel %vm371_vm6, %v450_v58, 0.0  ;;  %v278_v22 = vpop.f32.mrf.mxu3 }
  0xd4   :  { %v453_v43 = vmul.f32 %v362_v5, %v362_v5  ;;  %v337_v33 = vmul.f32 0.2, %v802_v51  ;;  %v338_v41 = vmul.f32 0.2, %v825_v30  ;;  %v339_v48 = vmul.f32 0.2, %v276_v2 }
  0xd5   :  { %v396_v19 = vadd.f32 %v395_v44, %v394_v12  ;;  %v484_v21 = vadd.f32 %v483_v13, %v482_v11  ;;  %v363_v12 = vsel %vm303_vm9, %v819_v16, %v333_v0  ;;  %v499_v13 = vsel %vm371_vm6, %v451_v1, 0.0 }
  0xd6   :  { %v411_v44 = vsel %vm371_vm6, %v361_v60, 0.0  ;;  %v365_v16 = vsel %vm305_vm11, %v762_v39, %v335_v31  ;;  %vm309_vm15 = vcmp.gt.f32.partialorder %v276_v2, 0.0  ;;  %v340_v54 = vmul.f32 0.2, %v278_v22 }
  0xd7   :  { %v398_v34 = vadd.f32 %v397_v24, %v396_v19  ;;  %v486_v35 = vadd.f32 %v485_v14, %v484_v21  ;;  %v364_v19 = vsel %vm304_vm10, %v263_v59, %v334_v6  ;;  %v501_v21 = vsel %vm371_vm6, %v452_v9, 0.0 }
  0xd8   :  { %v413_v14 = vsel %vm371_vm6, %v362_v5, 0.0  ;;  %v454_v24 = vmul.f32 %v363_v12, %v363_v12  ;;  %vm310_vm0 = vcmp.gt.f32.partialorder %v278_v22, 0.0 }
  0xd9   :  { %v400_v42 = vadd.f32 %v399_v37, %v398_v34  ;;  %v488_v45 = vadd.f32 %v487_v20, %v486_v35  ;;  %v503_v34 = vsel %vm371_vm6, %v453_v43, 0.0  ;;  %v415_v35 = vsel %vm371_vm6, %v363_v12, 0.0 }
  0xda   :  { %v455_v20 = vmul.f32 %v364_v19, %v364_v19  ;;  %v366_v37 = vsel %vm306_vm12, %v778_v7, %v336_v15  ;;  %v505_v39 = vsel %vm371_vm6, %v454_v24, 0.0 }
  0xdb   :  { %v402_v49 = vadd.f32 %v401_v46, %v400_v42  ;;  %v490_v50 = vadd.f32 %v489_v23, %v488_v45  ;;  %v456_v42 = vmul.f32 %v365_v16, %v365_v16  ;;  %v417_v45 = vsel %vm371_vm6, %v364_v19, 0.0 }
  0xdc   :  { %v367_v23 = vsel %vm307_vm13, %v802_v51, %v337_v33  ;;  %v457_v7 = vmul.f32 %v366_v37, %v366_v37 }
  0xdd   :  { %v404_v55 = vadd.f32 %v403_v52, %v402_v49  ;;  %v492_v25 = vadd.f32 %v491_v53, %v490_v50  ;;  %v419_v49 = vsel %vm371_vm6, %v365_v16, 0.0  ;;  %v507_v50 = vsel %vm371_vm6, %v455_v20, 0.0 }
  0xde   :  { %v368_v52 = vsel %vm308_vm14, %v825_v30, %v338_v41  ;;  %v458_v56 = vmul.f32 %v367_v23, %v367_v23  ;;  %v511_v58 = vsel %vm371_vm6, %v457_v7, 0.0  ;;  %v423_v59 = vsel %vm371_vm6, %v367_v23, 0.0 }
  0xdf   :  { %v406_v61 = vadd.f32 %v405_v29, %v404_v55  ;;  %v494_v62 = vadd.f32 %v493_v57, %v492_v25  ;;  %v509_v55 = vsel %vm371_vm6, %v456_v42, 0.0  ;;  %v421_v25 = vsel %vm371_vm6, %v366_v37, 0.0 }
  0xe0   :  { %v369_v29 = vsel %vm309_vm15, %v276_v2, %v339_v48  ;;  %v459_v60 = vmul.f32 %v368_v52, %v368_v52  ;;  %v370_v30 = vsel %vm310_vm0, %v278_v22, %v340_v54  ;;  %v513_v0 = vsel %vm371_vm6, %v458_v56, 0.0 }
  0xe1   :  { %v408_v3 = vadd.f32 %v407_v28, %v406_v61  ;;  %v496_v4 = vadd.f32 %v495_v36, %v494_v62  ;;  %v425_v36 = vsel %vm371_vm6, %v368_v52, 0.0  ;;  %v460_v28 = vmul.f32 %v369_v29, %v369_v29 }
  0xe2   :  { %v427_v5 = vsel %vm371_vm6, %v369_v29, 0.0  ;;  %v461_v2 = vmul.f32 %v370_v30, %v370_v30  ;;  %v429_v9 = vsel %vm371_vm6, %v370_v30, 0.0 }
  0xe3   :  { %v498_v10 = vadd.f32 %v497_v8, %v496_v4  ;;  %v410_v11 = vadd.f32 %v409_v63, %v408_v3  ;;  %v515_v4 = vsel %vm371_vm6, %v459_v60, 0.0  ;;  %v517_v63 = vsel %vm371_vm6, %v460_v28, 0.0 }
  0xe5   :  { %v412_v17 = vadd.f32 %v411_v44, %v410_v11  ;;  %v500_v18 = vadd.f32 %v499_v13, %v498_v10  ;;  %v519_v11 = vsel %vm371_vm6, %v461_v2, 0.0 }
  0xe7   :  { %v414_v27 = vadd.f32 %v413_v14, %v412_v17  ;;  %v502_v32 = vadd.f32 %v501_v21, %v500_v18 }
  0xe9   :  { %v504_v38 = vadd.f32 %v503_v34, %v502_v32  ;;  %v416_v40 = vadd.f32 %v415_v35, %v414_v27 }
  0xeb   :  { %v506_v46 = vadd.f32 %v505_v39, %v504_v38  ;;  %v418_v47 = vadd.f32 %v417_v45, %v416_v40 }
  0xed   :  { %v420_v26 = vadd.f32 %v419_v49, %v418_v47  ;;  %v508_v53 = vadd.f32 %v507_v50, %v506_v46 }
  0xef   :  { %v422_v51 = vadd.f32 %v421_v25, %v420_v26  ;;  %v510_v57 = vadd.f32 %v509_v55, %v508_v53 }
  0xf1   :  { %v512_v61 = vadd.f32 %v511_v58, %v510_v57  ;;  %v424_v62 = vadd.f32 %v423_v59, %v422_v51 }
  0xf3   :  { %v426_v1 = vadd.f32 %v425_v36, %v424_v62  ;;  %v514_v3 = vadd.f32 %v513_v0, %v512_v61 }
  0xf5   :  { %v428_v6 = vadd.f32 %v427_v5, %v426_v1  ;;  %v516_v8 = vadd.f32 %v515_v4, %v514_v3 }
  0xf7   :  { %v518_v31 = vadd.f32 %v517_v63, %v516_v8  ;;  %v430_v10 = vadd.f32 %v429_v9, %v428_v6 }
  0xf9   :  { %431 = vst.msk [vmem:[%s899_s2] sm:$0xff] %vm371_vm6, %v430_v10  ;;  %v520_v12 = vadd.f32 %v519_v11, %v518_v31 }
  0xfb   :  { %521 = vst.msk [vmem:[%s900_s3] sm:$0xff] %vm371_vm6, %v520_v12 }

// kernel: patch_discriminator_forward.8
= control target key start
LH: loop header
LB: loop body
LE: loop exit
PB: predicated region body
PF: predicated region fallthrough
CT: control target
= control target key end

     0   :  { %vm155_vm0 = vcmask 523264   ;;  %vm473_vm3 = vcmask 125952   ;;  %s919_s1 = inlined_call_operand.vmem [shape: bf16[64,16], index: 1, kind: input, shape index: {}]   ;;  %s920_s2 = inlined_call_operand.vmem [shape: f32[1,16], index: 2, kind: input, shape index: {}]   ;;  %s921_s3 = inlined_call_operand.vmem [shape: f32[1,16], index: 3, kind: input, shape index: {}]   ;;  %s922_s0 = inlined_call_operand.vmem [shape: bf16[240,64], index: 0, kind: input, shape index: {}]   ;;  %s923_s4 = inlined_call_operand.vmem [shape: bf16[240,16], index: 4, kind: output, shape index: {}]  }
   0x1   :  { %v617_v0 = vld [vmem:[%s919_s1 + $0x18] sm:$0xff]  ;;  %v616_v1 = vld [vmem:[%s919_s1 + $0x10] sm:$0xff]  ;;  %v615_v2 = vld [vmem:[%s919_s1 + $0x8] sm:$0xff] }
   0x2   :  { %205 = vmatpush.bf16.msra.mxu0 %v617_v0  ;;  %618 = vmatpush.bf16.msra.mxu1 %v617_v0  ;;  %v614_v3 = vld [vmem:[%s919_s1] sm:$0xff]  ;;  %v600_v8 = vld [vmem:[%s922_s0 + $0x8] sm:$0xff]  ;;  %v601_v12 = vld [vmem:[%s922_s0 + $0x10] sm:$0xff] }
   0x3   :  { %619 = vmatpush.bf16.msra.mxu2 %v617_v0  ;;  %620 = vmatpush.bf16.msra.mxu3 %v617_v0  ;;  %v599_v4 = vld [vmem:[%s922_s0] sm:$0xff]  ;;  %v604_v9 = vld [vmem:[%s922_s0 + $0x28] sm:$0xff]  ;;  %v605_v13 = vld [vmem:[%s922_s0 + $0x30] sm:$0xff] }
   0x4   :  { %v603_v5 = vld [vmem:[%s922_s0 + $0x20] sm:$0xff]  ;;  %v608_v10 = vld [vmem:[%s922_s0 + $0x48] sm:$0xff]  ;;  %v609_v14 = vld [vmem:[%s922_s0 + $0x50] sm:$0xff] }
   0x5   :  { %v607_v6 = vld [vmem:[%s922_s0 + $0x40] sm:$0xff]  ;;  %v612_v11 = vld [vmem:[%s922_s0 + $0x68] sm:$0xff]  ;;  %v613_v15 = vld [vmem:[%s922_s0 + $0x70] sm:$0xff] }
   0x6   :  { %206 = vmatpush.bf16.msra.mxu0 %v616_v1  ;;  %621 = vmatpush.bf16.msra.mxu1 %v616_v1  ;;  %v611_v7 = vld [vmem:[%s922_s0 + $0x60] sm:$0xff]  ;;  %v602_v16 = vld [vmem:[%s922_s0 + $0x18] sm:$0xff] }
   0x7   :  { %622 = vmatpush.bf16.msra.mxu2 %v616_v1  ;;  %623 = vmatpush.bf16.msra.mxu3 %v616_v1  ;;  %v606_v17 = vld [vmem:[%s922_s0 + $0x38] sm:$0xff]  ;;  %v732_v20 = vld [vmem:[%s920_s2] ss:$0 sm:$0xff] }
   0x8   :  { %v610_v18 = vld [vmem:[%s922_s0 + $0x58] sm:$0xff]  ;;  %v737_v24 = vld [vmem:[%s921_s3] ss:$0 sm:$0xff] }
   0xa   :  { %207 = vmatpush.bf16.msra.mxu0 %v615_v2  ;;  %624 = vmatpush.bf16.msra.mxu1 %v615_v2 }
   0xb   :  { %625 = vmatpush.bf16.msra.mxu2 %v615_v2  ;;  %626 = vmatpush.bf16.msra.mxu3 %v615_v2 }
   0xe   :  { %208 = vmatpush.bf16.msra.mxu0 %v614_v3  ;;  %627 = vmatpush.bf16.msra.mxu1 %v614_v3 }
   0xf   :  { %628 = vmatpush.bf16.msra.mxu2 %v614_v3  ;;  %629 = vmatpush.bf16.msra.mxu3 %v614_v3 }
  0x11   :  { %584 = vmatmul.msk.bf16.vlgmr.msra.gmra.mxu0 %vm155_vm0, %v599_v4  ;;  %588 = vmatmul.msk.bf16.vlgmr.msra.gmra.mxu1 %vm155_vm0, %v603_v5 }
  0x12   :  { %592 = vmatmul.msk.bf16.vlgmr.msra.gmra.mxu2 %vm155_vm0, %v607_v6  ;;  %596 = vmatmul.msk.bf16.vlgmr.msra.gmra.mxu3 %vm155_vm0, %v611_v7 }
  0x21   :  { %585 = vmatmul.msk.bf16.gmra.mxu0 %vm155_vm0, %v600_v8  ;;  %589 = vmatmul.msk.bf16.gmra.mxu1 %vm155_vm0, %v604_v9 }
  0x22   :  { %593 = vmatmul.msk.bf16.gmra.mxu2 %vm155_vm0, %v608_v10  ;;  %597 = vmatmul.msk.bf16.gmra.mxu3 %vm155_vm0, %v612_v11 }
  0x31   :  { %586 = vmatmul.msk.bf16.gmra.mxu0 %vm155_vm0, %v601_v12  ;;  %590 = vmatmul.msk.bf16.gmra.mxu1 %vm155_vm0, %v605_v13 }
  0x32   :  { %594 = vmatmul.msk.bf16.gmra.mxu2 %vm155_vm0, %v609_v14  ;;  %598 = vmatmul.msk.bf16.gmra.mxu3 %vm155_vm0, %v613_v15 }
  0x41   :  { %587 = vmatmul.msk.bf16.gmra.mxu0 %vm155_vm0, %v602_v16  ;;  %591 = vmatmul.msk.bf16.gmra.mxu1 %vm155_vm0, %v606_v17 }
  0x42   :  { %595 = vmatmul.msk.bf16.gmra.mxu2 %vm155_vm0, %v610_v18 }
  0x8e   :  { %v210_v19 = vpop.f32.mrf.mxu0  ;;  %v230_v21 = vpop.f32.mrf.mxu1 }
  0x8f   :  { %vm285_vm1 = vcmp.gt.f32.partialorder %v210_v19, 0.0  ;;  %v315_v22 = vmul.f32 0.2, %v210_v19  ;;  %vm293_vm2 = vcmp.gt.f32.partialorder %v230_v21, 0.0  ;;  %v323_v23 = vmul.f32 0.2, %v230_v21 }
  0x91   :  { %v345_v25 = vsel %vm285_vm1, %v210_v19, %v315_v22  ;;  %v353_v26 = vsel %vm293_vm2, %v230_v21, %v323_v23 }
  0x92   :  { %v379_v27 = vmul.f32 %v732_v20, %v345_v25  ;;  %v387_v28 = vmul.f32 %v732_v20, %v353_v26 }
  0x94   :  { %v413_v29 = vadd.f32 %v737_v24, %v379_v27  ;;  %v421_v30 = vadd.f32 %v737_v24, %v387_v28 }
  0x95   :  { %v250_v31 = vpop.f32.mrf.mxu2  ;;  %v270_v32 = vpop.f32.mrf.mxu3 }
  0x96   :  { %v443_v33 = vpack.c.bf16 %v413_v29, %v413_v29  ;;  %v451_v34 = vpack.c.bf16 %v421_v30, %v421_v30  ;;  %vm301_vm4 = vcmp.gt.f32.partialorder %v250_v31, 0.0  ;;  %v331_v35 = vmul.f32 0.2, %v250_v31  ;;  %v212_v36 = vpop.f32.mrf.mxu0  ;;  %v232_v37 = vpop.f32.mrf.mxu1 }
  0x97   :  { %vm286_vm5 = vcmp.gt.f32.partialorder %v212_v36, 0.0  ;;  %v316_v38 = vmul.f32 0.2, %v212_v36  ;;  %vm294_vm6 = vcmp.gt.f32.partialorder %v232_v37, 0.0  ;;  %v324_v39 = vmul.f32 0.2, %v232_v37 }
  0x98   :  { %474 = vst.msk [vmem:[%s923_s4] sm:$0xf] %vm473_vm3, %v443_v33  ;;  %v361_v40 = vsel %vm301_vm4, %v250_v31, %v331_v35  ;;  %vm309_vm7 = vcmp.gt.f32.partialorder %v270_v32, 0.0  ;;  %v339_v41 = vmul.f32 0.2, %v270_v32 }
  0x99   :  { %482 = vst.msk [vmem:[%s923_s4 + $0x20] sm:$0xf] %vm473_vm3, %v451_v34  ;;  %v395_v42 = vmul.f32 %v732_v20, %v361_v40  ;;  %v346_v43 = vsel %vm286_vm5, %v212_v36, %v316_v38  ;;  %v354_v44 = vsel %vm294_vm6, %v232_v37, %v324_v39 }
  0x9a   :  { %v380_v45 = vmul.f32 %v732_v20, %v346_v43  ;;  %v388_v46 = vmul.f32 %v732_v20, %v354_v44  ;;  %v369_v47 = vsel %vm309_vm7, %v270_v32, %v339_v41 }
  0x9b   :  { %v429_v48 = vadd.f32 %v737_v24, %v395_v42  ;;  %v403_v49 = vmul.f32 %v732_v20, %v369_v47 }
  0x9c   :  { %v414_v50 = vadd.f32 %v737_v24, %v380_v45  ;;  %v422_v51 = vadd.f32 %v737_v24, %v388_v46 }
  0x9d   :  { %v459_v52 = vpack.c.bf16 %v429_v48, %v429_v48  ;;  %v437_v53 = vadd.f32 %v737_v24, %v403_v49  ;;  %v252_v54 = vpop.f32.mrf.mxu2  ;;  %v272_v55 = vpop.f32.mrf.mxu3 }
  0x9e   :  { %v444_v56 = vpack.c.bf16 %v414_v50, %v414_v50  ;;  %v452_v57 = vpack.c.bf16 %v422_v51, %v422_v51  ;;  %vm302_vm8 = vcmp.gt.f32.partialorder %v252_v54, 0.0  ;;  %v332_v58 = vmul.f32 0.2, %v252_v54  ;;  %v215_v59 = vpop.f32.mrf.mxu0  ;;  %v235_v60 = vpop.f32.mrf.mxu1 }
  0x9f   :  { %490 = vst.msk [vmem:[%s923_s4 + $0x40] sm:$0xf] %vm473_vm3, %v459_v52  ;;  %v467_v61 = vpack.c.bf16 %v437_v53, %v437_v53  ;;  %vm287_vm9 = vcmp.gt.f32.partialorder %v215_v59, 0.0  ;;  %v317_v62 = vmul.f32 0.2, %v215_v59  ;;  %vm295_vm10 = vcmp.gt.f32.partialorder %v235_v60, 0.0 }
  0xa0   :  { %475 = vst.msk [vmem:[%s923_s4 + $0x4] sm:$0xf] %vm473_vm3, %v444_v56  ;;  %v362_v63 = vsel %vm302_vm8, %v252_v54, %v332_v58  ;;  %v325_v0 = vmul.f32 0.2, %v235_v60  ;;  %vm310_vm11 = vcmp.gt.f32.partialorder %v272_v55, 0.0 }
  0xa1   :  { %483 = vst.msk [vmem:[%s923_s4 + $0x24] sm:$0xf] %vm473_vm3, %v452_v57  ;;  %v396_v1 = vmul.f32 %v732_v20, %v362_v63  ;;  %v347_v2 = vsel %vm287_vm9, %v215_v59, %v317_v62  ;;  %v340_v3 = vmul.f32 0.2, %v272_v55 }
  0xa2   :  { %498 = vst.msk [vmem:[%s923_s4 + $0x60] sm:$0xf] %vm473_vm3, %v467_v61  ;;  %v381_v4 = vmul.f32 %v732_v20, %v347_v2  ;;  %v355_v5 = vsel %vm295_vm10, %v235_v60, %v325_v0 }
  0xa3   :  { %v430_v6 = vadd.f32 %v737_v24, %v396_v1  ;;  %v389_v7 = vmul.f32 %v732_v20, %v355_v5  ;;  %v370_v8 = vsel %vm310_vm11, %v272_v55, %v340_v3 }
  0xa4   :  { %v415_v9 = vadd.f32 %v737_v24, %v381_v4  ;;  %v404_v10 = vmul.f32 %v732_v20, %v370_v8 }
  0xa5   :  { %v460_v11 = vpack.c.bf16 %v430_v6, %v430_v6  ;;  %v423_v12 = vadd.f32 %v737_v24, %v389_v7  ;;  %v255_v13 = vpop.f32.mrf.mxu2  ;;  %v275_v14 = vpop.f32.mrf.mxu3 }
  0xa6   :  { %v445_v15 = vpack.c.bf16 %v415_v9, %v415_v9  ;;  %v438_v16 = vadd.f32 %v737_v24, %v404_v10  ;;  %vm303_vm12 = vcmp.gt.f32.partialorder %v255_v13, 0.0  ;;  %v333_v17 = vmul.f32 0.2, %v255_v13  ;;  %v217_v18 = vpop.f32.mrf.mxu0  ;;  %v237_v19 = vpop.f32.mrf.mxu1 }
  0xa7   :  { %491 = vst.msk [vmem:[%s923_s4 + $0x44] sm:$0xf] %vm473_vm3, %v460_v11  ;;  %v453_v21 = vpack.c.bf16 %v423_v12, %v423_v12  ;;  %vm288_vm13 = vcmp.gt.f32.partialorder %v217_v18, 0.0  ;;  %v318_v22 = vmul.f32 0.2, %v217_v18  ;;  %vm296_vm14 = vcmp.gt.f32.partialorder %v237_v19, 0.0 }
  0xa8   :  { %476 = vst.msk [vmem:[%s923_s4 + $0x8] sm:$0xf] %vm473_vm3, %v445_v15  ;;  %v468_v23 = vpack.c.bf16 %v438_v16, %v438_v16  ;;  %v363_v25 = vsel %vm303_vm12, %v255_v13, %v333_v17  ;;  %v326_v26 = vmul.f32 0.2, %v237_v19  ;;  %vm311_vm15 = vcmp.gt.f32.partialorder %v275_v14, 0.0 }
  0xa9   :  { %484 = vst.msk [vmem:[%s923_s4 + $0x28] sm:$0xf] %vm473_vm3, %v453_v21  ;;  %v397_v27 = vmul.f32 %v732_v20, %v363_v25  ;;  %v348_v28 = vsel %vm288_vm13, %v217_v18, %v318_v22  ;;  %v341_v29 = vmul.f32 0.2, %v275_v14 }
  0xaa   :  { %499 = vst.msk [vmem:[%s923_s4 + $0x64] sm:$0xf] %vm473_vm3, %v468_v23  ;;  %v382_v30 = vmul.f32 %v732_v20, %v348_v28  ;;  %v356_v31 = vsel %vm296_vm14, %v237_v19, %v326_v26 }
  0xab   :  { %v431_v32 = vadd.f32 %v737_v24, %v397_v27  ;;  %v390_v33 = vmul.f32 %v732_v20, %v356_v31  ;;  %v371_v34 = vsel %vm311_vm15, %v275_v14, %v341_v29 }
  0xac   :  { %v416_v35 = vadd.f32 %v737_v24, %v382_v30  ;;  %v405_v36 = vmul.f32 %v732_v20, %v371_v34 }
  0xad   :  { %v461_v37 = vpack.c.bf16 %v431_v32, %v431_v32  ;;  %v424_v38 = vadd.f32 %v737_v24, %v390_v33  ;;  %v257_v39 = vpop.f32.mrf.mxu2  ;;  %v277_v40 = vpop.f32.mrf.mxu3 }
  0xae   :  { %v446_v41 = vpack.c.bf16 %v416_v35, %v416_v35  ;;  %v439_v42 = vadd.f32 %v737_v24, %v405_v36  ;;  %vm304_vm0 = vcmp.gt.f32.partialorder %v257_v39, 0.0  ;;  %v334_v43 = vmul.f32 0.2, %v257_v39  ;;  %v220_v44 = vpop.f32.mrf.mxu0  ;;  %v240_v45 = vpop.f32.mrf.mxu1 }
  0xaf   :  { %492 = vst.msk [vmem:[%s923_s4 + $0x48] sm:$0xf] %vm473_vm3, %v461_v37  ;;  %v454_v46 = vpack.c.bf16 %v424_v38, %v424_v38  ;;  %vm289_vm1 = vcmp.gt.f32.partialorder %v220_v44, 0.0  ;;  %v319_v47 = vmul.f32 0.2, %v220_v44  ;;  %vm297_vm2 = vcmp.gt.f32.partialorder %v240_v45, 0.0 }
  0xb0   :  { %477 = vst.msk [vmem:[%s923_s4 + $0xc] sm:$0xf] %vm473_vm3, %v446_v41  ;;  %v469_v48 = vpack.c.bf16 %v439_v42, %v439_v42  ;;  %v364_v49 = vsel %vm304_vm0, %v257_v39, %v334_v43  ;;  %v327_v50 = vmul.f32 0.2, %v240_v45  ;;  %vm312_vm4 = vcmp.gt.f32.partialorder %v277_v40, 0.0 }
  0xb1   :  { %485 = vst.msk [vmem:[%s923_s4 + $0x2c] sm:$0xf] %vm473_vm3, %v454_v46  ;;  %v398_v51 = vmul.f32 %v732_v20, %v364_v49  ;;  %v349_v52 = vsel %vm289_vm1, %v220_v44, %v319_v47  ;;  %v342_v53 = vmul.f32 0.2, %v277_v40 }
  0xb2   :  { %500 = vst.msk [vmem:[%s923_s4 + $0x68] sm:$0xf] %vm473_vm3, %v469_v48  ;;  %v383_v54 = vmul.f32 %v732_v20, %v349_v52  ;;  %v357_v55 = vsel %vm297_vm2, %v240_v45, %v327_v50 }
  0xb3   :  { %v432_v56 = vadd.f32 %v737_v24, %v398_v51  ;;  %v391_v57 = vmul.f32 %v732_v20, %v357_v55  ;;  %v372_v58 = vsel %vm312_vm4, %v277_v40, %v342_v53 }
  0xb4   :  { %v417_v59 = vadd.f32 %v737_v24, %v383_v54  ;;  %v406_v60 = vmul.f32 %v732_v20, %v372_v58 }
  0xb5   :  { %v462_v61 = vpack.c.bf16 %v432_v56, %v432_v56  ;;  %v425_v62 = vadd.f32 %v737_v24, %v391_v57  ;;  %v260_v63 = vpop.f32.mrf.mxu2  ;;  %v280_v0 = vpop.f32.mrf.mxu3 }
  0xb6   :  { %v447_v1 = vpack.c.bf16 %v417_v59, %v417_v59  ;;  %v440_v2 = vadd.f32 %v737_v24, %v406_v60  ;;  %vm305_vm5 = vcmp.gt.f32.partialorder %v260_v63, 0.0  ;;  %v335_v3 = vmul.f32 0.2, %v260_v63  ;;  %v222_v4 = vpop.f32.mrf.mxu0  ;;  %v242_v5 = vpop.f32.mrf.mxu1 }
  0xb7   :  { %493 = vst.msk [vmem:[%s923_s4 + $0x4c] sm:$0xf] %vm473_vm3, %v462_v61  ;;  %v455_v6 = vpack.c.bf16 %v425_v62, %v425_v62  ;;  %vm290_vm6 = vcmp.gt.f32.partialorder %v222_v4, 0.0  ;;  %v320_v7 = vmul.f32 0.2, %v222_v4  ;;  %vm298_vm7 = vcmp.gt.f32.partialorder %v242_v5, 0.0 }
  0xb8   :  { %478 = vst.msk [vmem:[%s923_s4 + $0x10] sm:$0xf] %vm473_vm3, %v447_v1  ;;  %v470_v8 = vpack.c.bf16 %v440_v2, %v440_v2  ;;  %v365_v9 = vsel %vm305_vm5, %v260_v63, %v335_v3  ;;  %v328_v10 = vmul.f32 0.2, %v242_v5  ;;  %vm313_vm8 = vcmp.gt.f32.partialorder %v280_v0, 0.0 }
  0xb9   :  { %486 = vst.msk [vmem:[%s923_s4 + $0x30] sm:$0xf] %vm473_vm3, %v455_v6  ;;  %v399_v11 = vmul.f32 %v732_v20, %v365_v9  ;;  %v350_v12 = vsel %vm290_vm6, %v222_v4, %v320_v7  ;;  %v343_v13 = vmul.f32 0.2, %v280_v0 }
  0xba   :  { %501 = vst.msk [vmem:[%s923_s4 + $0x6c] sm:$0xf] %vm473_vm3, %v470_v8  ;;  %v384_v14 = vmul.f32 %v732_v20, %v350_v12  ;;  %v358_v15 = vsel %vm298_vm7, %v242_v5, %v328_v10 }
  0xbb   :  { %v433_v16 = vadd.f32 %v737_v24, %v399_v11  ;;  %v392_v17 = vmul.f32 %v732_v20, %v358_v15  ;;  %v373_v18 = vsel %vm313_vm8, %v280_v0, %v343_v13 }
  0xbc   :  { %v418_v19 = vadd.f32 %v737_v24, %v384_v14  ;;  %v407_v21 = vmul.f32 %v732_v20, %v373_v18 }
  0xbd   :  { %v463_v22 = vpack.c.bf16 %v433_v16, %v433_v16  ;;  %v426_v23 = vadd.f32 %v737_v24, %v392_v17  ;;  %v262_v25 = vpop.f32.mrf.mxu2  ;;  %v282_v26 = vpop.f32.mrf.mxu3 }
  0xbe   :  { %v448_v27 = vpack.c.bf16 %v418_v19, %v418_v19  ;;  %v441_v28 = vadd.f32 %v737_v24, %v407_v21  ;;  %vm306_vm9 = vcmp.gt.f32.partialorder %v262_v25, 0.0  ;;  %v336_v29 = vmul.f32 0.2, %v262_v25  ;;  %v225_v30 = vpop.f32.mrf.mxu0  ;;  %v245_v31 = vpop.f32.mrf.mxu1 }
  0xbf   :  { %494 = vst.msk [vmem:[%s923_s4 + $0x50] sm:$0xf] %vm473_vm3, %v463_v22  ;;  %v456_v32 = vpack.c.bf16 %v426_v23, %v426_v23  ;;  %vm291_vm10 = vcmp.gt.f32.partialorder %v225_v30, 0.0  ;;  %v321_v33 = vmul.f32 0.2, %v225_v30  ;;  %vm299_vm11 = vcmp.gt.f32.partialorder %v245_v31, 0.0 }
  0xc0   :  { %479 = vst.msk [vmem:[%s923_s4 + $0x14] sm:$0xf] %vm473_vm3, %v448_v27  ;;  %v471_v34 = vpack.c.bf16 %v441_v28, %v441_v28  ;;  %v366_v35 = vsel %vm306_vm9, %v262_v25, %v336_v29  ;;  %v329_v36 = vmul.f32 0.2, %v245_v31  ;;  %vm314_vm12 = vcmp.gt.f32.partialorder %v282_v26, 0.0 }
  0xc1   :  { %487 = vst.msk [vmem:[%s923_s4 + $0x34] sm:$0xf] %vm473_vm3, %v456_v32  ;;  %v400_v37 = vmul.f32 %v732_v20, %v366_v35  ;;  %v351_v38 = vsel %vm291_vm10, %v225_v30, %v321_v33  ;;  %v344_v39 = vmul.f32 0.2, %v282_v26 }
  0xc2   :  { %502 = vst.msk [vmem:[%s923_s4 + $0x70] sm:$0xf] %vm473_vm3, %v471_v34  ;;  %v385_v40 = vmul.f32 %v732_v20, %v351_v38  ;;  %v359_v41 = vsel %vm299_vm11, %v245_v31, %v329_v36 }
  0xc3   :  { %v434_v42 = vadd.f32 %v737_v24, %v400_v37  ;;  %v393_v43 = vmul.f32 %v732_v20, %v359_v41  ;;  %v374_v44 = vsel %vm314_vm12, %v282_v26, %v344_v39 }
  0xc4   :  { %v419_v45 = vadd.f32 %v737_v24, %v385_v40  ;;  %v408_v46 = vmul.f32 %v732_v20, %v374_v44 }
  0xc5   :  { %v464_v47 = vpack.c.bf16 %v434_v42, %v434_v42  ;;  %v427_v48 = vadd.f32 %v737_v24, %v393_v43  ;;  %v265_v49 = vpop.f32.mrf.mxu2 }
  0xc6   :  { %v449_v50 = vpack.c.bf16 %v419_v45, %v419_v45  ;;  %v442_v51 = vadd.f32 %v737_v24, %v408_v46  ;;  %vm307_vm13 = vcmp.gt.f32.partialorder %v265_v49, 0.0  ;;  %v337_v52 = vmul.f32 0.2, %v265_v49  ;;  %v227_v53 = vpop.f32.mrf.mxu0  ;;  %v247_v54 = vpop.f32.mrf.mxu1 }
  0xc7   :  { %495 = vst.msk [vmem:[%s923_s4 + $0x54] sm:$0xf] %vm473_vm3, %v464_v47  ;;  %v457_v55 = vpack.c.bf16 %v427_v48, %v427_v48  ;;  %vm292_vm14 = vcmp.gt.f32.partialorder %v227_v53, 0.0  ;;  %v322_v56 = vmul.f32 0.2, %v227_v53  ;;  %vm300_vm15 = vcmp.gt.f32.partialorder %v247_v54, 0.0 }
  0xc8   :  { %480 = vst.msk [vmem:[%s923_s4 + $0x18] sm:$0xf] %vm473_vm3, %v449_v50  ;;  %v472_v57 = vpack.c.bf16 %v442_v51, %v442_v51  ;;  %v367_v58 = vsel %vm307_vm13, %v265_v49, %v337_v52  ;;  %v330_v59 = vmul.f32 0.2, %v247_v54 }
  0xc9   :  { %488 = vst.msk [vmem:[%s923_s4 + $0x38] sm:$0xf] %vm473_vm3, %v457_v55  ;;  %v401_v60 = vmul.f32 %v732_v20, %v367_v58  ;;  %v352_v61 = vsel %vm292_vm14, %v227_v53, %v322_v56 }
  0xca   :  { %503 = vst.msk [vmem:[%s923_s4 + $0x74] sm:$0xf] %vm473_vm3, %v472_v57  ;;  %v386_v62 = vmul.f32 %v732_v20, %v352_v61  ;;  %v360_v63 = vsel %vm300_vm15, %v247_v54, %v330_v59 }
  0xcb   :  { %v435_v0 = vadd.f32 %v737_v24, %v401_v60  ;;  %v394_v1 = vmul.f32 %v732_v20, %v360_v63 }
  0xcc   :  { %v420_v2 = vadd.f32 %v737_v24, %v386_v62 }
  0xcd   :  { %v465_v3 = vpack.c.bf16 %v435_v0, %v435_v0  ;;  %v428_v4 = vadd.f32 %v737_v24, %v394_v1  ;;  %v267_v5 = vpop.f32.mrf.mxu2 }
  0xce   :  { %v450_v6 = vpack.c.bf16 %v420_v2, %v420_v2  ;;  %vm308_vm0 = vcmp.gt.f32.partialorder %v267_v5, 0.0  ;;  %v338_v7 = vmul.f32 0.2, %v267_v5 }
  0xcf   :  { %496 = vst.msk [vmem:[%s923_s4 + $0x58] sm:$0xf] %vm473_vm3, %v465_v3  ;;  %v458_v8 = vpack.c.bf16 %v428_v4, %v428_v4 }
  0xd0   :  { %481 = vst.msk [vmem:[%s923_s4 + $0x1c] sm:$0xf] %vm473_vm3, %v450_v6  ;;  %v368_v9 = vsel %vm308_vm0, %v267_v5, %v338_v7 }
  0xd1   :  { %489 = vst.msk [vmem:[%s923_s4 + $0x3c] sm:$0xf] %vm473_vm3, %v458_v8  ;;  %v402_v10 = vmul.f32 %v732_v20, %v368_v9 }
  0xd3   :  { %v436_v11 = vadd.f32 %v737_v24, %v402_v10 }
  0xd5   :  { %v466_v12 = vpack.c.bf16 %v436_v11, %v436_v11 }
  0xd7   :  { %497 = vst.msk [vmem:[%s923_s4 + $0x5c] sm:$0xf] %vm473_vm3, %v466_v12 }

// kernel: patch_discriminator_forward.9
= control target key start
LH: loop header
LB: loop body
LE: loop exit
PB: predicated region body
PF: predicated region fallthrough
CT: control target
= control target key end

     0   :  { %vm355_vm4 = vcmask 261120   ;;  %s791_s1 = inlined_call_operand.vmem [shape: bf16[256,32], index: 1, kind: input, shape index: {}]   ;;  %s792_s0 = inlined_call_operand.vmem [shape: bf16[112,256], index: 0, kind: input, shape index: {}]   ;;  %s793_s2 = inlined_call_operand.vmem [shape: f32[8,32], index: 2, kind: output, shape index: {0}]   ;;  %s794_s3 = inlined_call_operand.vmem [shape: f32[8,32], index: 3, kind: output, shape index: {1}]  }
   0x1   :  { %v575_v0 = vld [vmem:[%s791_s1 + $0x38] sm:$0xff]  ;;  %v574_v2 = vld [vmem:[%s791_s1 + $0x30] sm:$0xff]  ;;  %v573_v4 = vld [vmem:[%s791_s1 + $0x28] sm:$0xff] }
   0x2   :  { %v583_v1 = vld [vmem:[%s791_s1 + $0x78] sm:$0xff]  ;;  %225 = vmatpush.bf16.msra.mxu0 %v575_v0  ;;  %584 = vmatpush.bf16.msra.mxu2 %v575_v0  ;;  %v582_v3 = vld [vmem:[%s791_s1 + $0x70] sm:$0xff]  ;;  %v581_v5 = vld [vmem:[%s791_s1 + $0x68] sm:$0xff] }
   0x3   :  { %269 = vmatpush.bf16.msra.mxu1 %v583_v1  ;;  %592 = vmatpush.bf16.msra.mxu3 %v583_v1  ;;  %v572_v6 = vld [vmem:[%s791_s1 + $0x20] sm:$0xff]  ;;  %v571_v8 = vld [vmem:[%s791_s1 + $0x18] sm:$0xff]  ;;  %v570_v10 = vld [vmem:[%s791_s1 + $0x10] sm:$0xff] }
   0x4   :  { %v580_v7 = vld [vmem:[%s791_s1 + $0x60] sm:$0xff]  ;;  %v579_v9 = vld [vmem:[%s791_s1 + $0x58] sm:$0xff]  ;;  %v578_v11 = vld [vmem:[%s791_s1 + $0x50] sm:$0xff] }
   0x5   :  { %v569_v12 = vld [vmem:[%s791_s1 + $0x8] sm:$0xff]  ;;  %v568_v14 = vld [vmem:[%s791_s1] sm:$0xff]  ;;  %v460_v18 = vld [vmem:[%s792_s0 + $0x30] sm:$0xf] }
   0x6   :  { %226 = vmatpush.bf16.msra.mxu0 %v574_v2  ;;  %585 = vmatpush.bf16.msra.mxu2 %v574_v2  ;;  %v577_v13 = vld [vmem:[%s791_s1 + $0x48] sm:$0xff]  ;;  %v576_v15 = vld [vmem:[%s791_s1 + $0x40] sm:$0xff]  ;;  %v561_v19 = vld [vmem:[%s792_s0 + $0x34] sm:$0xf0] }
   0x7   :  { %270 = vmatpush.bf16.msra.mxu1 %v582_v3  ;;  %593 = vmatpush.bf16.msra.mxu3 %v582_v3  ;;  %v436_v16 = vld [vmem:[%s792_s0] sm:$0xf]  ;;  %v555_v17 = vld [vmem:[%s792_s0 + $0x4] sm:$0xf0]  ;;  %v554_v20 = vld [vmem:[%s792_s0 + $0x4] sm:$0xf]  ;;  %v461_v25 = vor.u32 %v561_v19, %v460_v18 }
   0x8   :  { %v438_v21 = vld [vmem:[%s792_s0 + $0x8] sm:$0xf0]  ;;  %v562_v22 = vld [vmem:[%s792_s0 + $0x44] sm:$0xf]  ;;  %v437_v24 = vor.u32 %v555_v17, %v436_v16  ;;  %v444_v28 = vld [vmem:[%s792_s0 + $0x10] sm:$0xf] }
   0x9   :  { %v470_v23 = vld [vmem:[%s792_s0 + $0x48] sm:$0xf0]  ;;  %v441_v26 = vor.u32 %v554_v20, %v438_v21  ;;  %v557_v29 = vld [vmem:[%s792_s0 + $0x14] sm:$0xf0]  ;;  %v468_v30 = vld [vmem:[%s792_s0 + $0x40] sm:$0xf] }
   0xa   :  { %227 = vmatpush.bf16.msra.mxu0 %v573_v4  ;;  %586 = vmatpush.bf16.msra.mxu2 %v573_v4  ;;  %v473_v27 = vor.u32 %v562_v22, %v470_v23  ;;  %v563_v31 = vld [vmem:[%s792_s0 + $0x44] sm:$0xf0]  ;;  %v556_v32 = vld [vmem:[%s792_s0 + $0x14] sm:$0xf]  ;;  %v446_v33 = vld [vmem:[%s792_s0 + $0x18] sm:$0xf0]  ;;  %v445_v36 = vor.u32 %v557_v29, %v444_v28 }
   0xb   :  { %271 = vmatpush.bf16.msra.mxu1 %v581_v5  ;;  %594 = vmatpush.bf16.msra.mxu3 %v581_v5  ;;  %v564_v34 = vld [vmem:[%s792_s0 + $0x54] sm:$0xf]  ;;  %v478_v35 = vld [vmem:[%s792_s0 + $0x58] sm:$0xf0]  ;;  %v469_v37 = vor.u32 %v563_v31, %v468_v30  ;;  %v449_v38 = vor.u32 %v556_v32, %v446_v33  ;;  %v452_v40 = vld [vmem:[%s792_s0 + $0x20] sm:$0xf] }
   0xc   :  { %v481_v39 = vor.u32 %v564_v34, %v478_v35  ;;  %v559_v41 = vld [vmem:[%s792_s0 + $0x24] sm:$0xf0]  ;;  %v476_v42 = vld [vmem:[%s792_s0 + $0x50] sm:$0xf]  ;;  %v565_v43 = vld [vmem:[%s792_s0 + $0x54] sm:$0xf0] }
   0xd   :  { %v558_v44 = vld [vmem:[%s792_s0 + $0x24] sm:$0xf]  ;;  %v454_v45 = vld [vmem:[%s792_s0 + $0x28] sm:$0xf0]  ;;  %v453_v48 = vor.u32 %v559_v41, %v452_v40  ;;  %v477_v49 = vor.u32 %v565_v43, %v476_v42  ;;  %v484_v52 = vld [vmem:[%s792_s0 + $0x60] sm:$0xf] }
   0xe   :  { %228 = vmatpush.bf16.msra.mxu0 %v572_v6  ;;  %587 = vmatpush.bf16.msra.mxu2 %v572_v6  ;;  %v566_v46 = vld [vmem:[%s792_s0 + $0x64] sm:$0xf]  ;;  %v486_v47 = vld [vmem:[%s792_s0 + $0x68] sm:$0xf0]  ;;  %v457_v50 = vor.u32 %v558_v44, %v454_v45  ;;  %v567_v53 = vld [vmem:[%s792_s0 + $0x64] sm:$0xf0] }
   0xf   :  { %272 = vmatpush.bf16.msra.mxu1 %v580_v7  ;;  %595 = vmatpush.bf16.msra.mxu3 %v580_v7  ;;  %v489_v51 = vor.u32 %v566_v46, %v486_v47  ;;  %v560_v54 = vld [vmem:[%s792_s0 + $0x34] sm:$0xf]  ;;  %v462_v55 = vld [vmem:[%s792_s0 + $0x38] sm:$0xf0]  ;;  %v485_v56 = vor.u32 %v567_v53, %v484_v52 }
  0x10   :  { %v465_v57 = vor.u32 %v560_v54, %v462_v55 }
  0x12   :  { %229 = vmatpush.bf16.msra.mxu0 %v571_v8  ;;  %588 = vmatpush.bf16.msra.mxu2 %v571_v8 }
  0x13   :  { %273 = vmatpush.bf16.msra.mxu1 %v579_v9  ;;  %596 = vmatpush.bf16.msra.mxu3 %v579_v9 }
  0x16   :  { %230 = vmatpush.bf16.msra.mxu0 %v570_v10  ;;  %589 = vmatpush.bf16.msra.mxu2 %v570_v10 }
  0x17   :  { %274 = vmatpush.bf16.msra.mxu1 %v578_v11  ;;  %597 = vmatpush.bf16.msra.mxu3 %v578_v11 }
  0x1a   :  { %231 = vmatpush.bf16.msra.mxu0 %v569_v12  ;;  %590 = vmatpush.bf16.msra.mxu2 %v569_v12 }
  0x1b   :  { %275 = vmatpush.bf16.msra.mxu1 %v577_v13  ;;  %598 = vmatpush.bf16.msra.mxu3 %v577_v13 }
  0x1e   :  { %232 = vmatpush.bf16.msra.mxu0 %v568_v14  ;;  %591 = vmatpush.bf16.msra.mxu2 %v568_v14 }
  0x1f   :  { %276 = vmatpush.bf16.msra.mxu1 %v576_v15  ;;  %599 = vmatpush.bf16.msra.mxu3 %v576_v15 }
  0x21   :  { %233 = vmatmul.bf16.vlgmr.msra.gmra.mxu0 %v437_v24  ;;  %248 = vmatmul.bf16.vlgmr.msra.gmra.mxu2 %v461_v25 }
  0x22   :  { %277 = vmatmul.bf16.vlgmr.msra.gmra.mxu1 %v441_v26  ;;  %297 = vmatmul.bf16.vlgmr.msra.gmra.mxu3 %v473_v27 }
  0x31   :  { %238 = vmatmul.bf16.gmra.mxu0 %v445_v36  ;;  %253 = vmatmul.bf16.gmra.mxu2 %v469_v37 }
  0x32   :  { %282 = vmatmul.bf16.gmra.mxu1 %v449_v38  ;;  %302 = vmatmul.bf16.gmra.mxu3 %v481_v39 }
  0x41   :  { %243 = vmatmul.bf16.gmra.mxu0 %v453_v48  ;;  %258 = vmatmul.bf16.gmra.mxu2 %v477_v49 }
  0x42   :  { %287 = vmatmul.bf16.gmra.mxu1 %v457_v50  ;;  %307 = vmatmul.bf16.gmra.mxu3 %v489_v51 }
  0x51   :  { %263 = vmatmul.bf16.gmra.mxu2 %v485_v56 }
  0x52   :  { %292 = vmatmul.bf16.gmra.mxu1 %v465_v57 }
  0x9e   :  { %v234_v58 = vpop.f32.mrf.mxu0 }
  0x9f   :  { %v278_v59 = vpop.f32.mrf.mxu1 }
  0xa0   :  { %v279_v11 = vadd.f32 %v278_v59, %v234_v58 }
  0xa2   :  { %v327_v15 = vmul.f32 0.2, %v279_v11  ;;  %vm313_vm0 = vcmp.gt.f32.partialorder %v279_v11, 0.0 }
  0xa4   :  { %v249_v60 = vpop.f32.mrf.mxu2  ;;  %v341_v23 = vsel %vm313_vm0, %v279_v11, %v327_v15 }
  0xa5   :  { %v298_v63 = vpop.f32.mrf.mxu3  ;;  %v384_v29 = vmul.f32 %v341_v23, %v341_v23  ;;  %v356_v37 = vsel %vm355_vm4, %v341_v23, 0.0 }
  0xa6   :  { %v236_v61 = vpop.f32.mrf.mxu0 }
  0xa7   :  { %v280_v62 = vpop.f32.mrf.mxu1  ;;  %v398_v40 = vsel %vm355_vm4, %v384_v29, 0.0 }
  0xa8   :  { %v281_v12 = vadd.f32 %v280_v62, %v236_v61 }
  0xaa   :  { %v328_v16 = vmul.f32 0.2, %v281_v12  ;;  %vm314_vm1 = vcmp.gt.f32.partialorder %v281_v12, 0.0 }
  0xac   :  { %v752_v0 = vpop.f32.mrf.mxu2  ;;  %v342_v24 = vsel %vm314_vm1, %v281_v12, %v328_v16 }
  0xad   :  { %v300_v4 = vpop.f32.mrf.mxu3  ;;  %v385_v30 = vmul.f32 %v342_v24, %v342_v24  ;;  %v357_v35 = vsel %vm355_vm4, %v342_v24, 0.0 }
  0xae   :  { %v239_v1 = vpop.f32.mrf.mxu0  ;;  %v358_v44 = vadd.f32 %v357_v35, %v356_v37 }
  0xaf   :  { %v283_v2 = vpop.f32.mrf.mxu1  ;;  %v399_v41 = vsel %vm355_vm4, %v385_v30, 0.0 }
  0xb0   :  { %v284_v13 = vadd.f32 %v283_v2, %v239_v1  ;;  %v400_v52 = vadd.f32 %v399_v41, %v398_v40 }
  0xb2   :  { %v329_v18 = vmul.f32 0.2, %v284_v13  ;;  %vm315_vm2 = vcmp.gt.f32.partialorder %v284_v13, 0.0 }
  0xb4   :  { %v254_v3 = vpop.f32.mrf.mxu2  ;;  %v343_v26 = vsel %vm315_vm2, %v284_v13, %v329_v18 }
  0xb5   :  { %v303_v9 = vpop.f32.mrf.mxu3  ;;  %v386_v32 = vmul.f32 %v343_v26, %v343_v26  ;;  %v299_v33 = vadd.f32 %v298_v63, %v254_v3  ;;  %v359_v45 = vsel %vm355_vm4, %v343_v26, 0.0 }
  0xb6   :  { %v241_v5 = vpop.f32.mrf.mxu0  ;;  %v360_v55 = vadd.f32 %v359_v45, %v358_v44 }
  0xb7   :  { %v285_v6 = vpop.f32.mrf.mxu1  ;;  %v401_v46 = vsel %vm355_vm4, %v386_v32, 0.0  ;;  %v335_v47 = vmul.f32 0.2, %v299_v33  ;;  %vm321_vm8 = vcmp.gt.f32.partialorder %v299_v33, 0.0 }
  0xb8   :  { %v286_v17 = vadd.f32 %v285_v6, %v241_v5  ;;  %v402_v59 = vadd.f32 %v401_v46, %v400_v52 }
  0xb9   :  { %v349_v63 = vsel %vm321_vm8, %v299_v33, %v335_v47 }
  0xba   :  { %v330_v25 = vmul.f32 0.2, %v286_v17  ;;  %vm316_vm3 = vcmp.gt.f32.partialorder %v286_v17, 0.0  ;;  %v392_v18 = vmul.f32 %v349_v63, %v349_v63  ;;  %v371_v33 = vsel %vm355_vm4, %v349_v63, 0.0 }
  0xbc   :  { %v256_v7 = vpop.f32.mrf.mxu2  ;;  %v344_v34 = vsel %vm316_vm3, %v286_v17, %v330_v25  ;;  %v413_v40 = vsel %vm355_vm4, %v392_v18, 0.0 }
  0xbd   :  { %v305_v22 = vpop.f32.mrf.mxu3  ;;  %v387_v42 = vmul.f32 %v344_v34, %v344_v34  ;;  %v361_v53 = vsel %vm355_vm4, %v344_v34, 0.0  ;;  %v301_v54 = vadd.f32 %v300_v4, %v256_v7 }
  0xbe   :  { %v244_v8 = vpop.f32.mrf.mxu0  ;;  %v362_v1 = vadd.f32 %v361_v53, %v360_v55 }
  0xbf   :  { %v288_v10 = vpop.f32.mrf.mxu1  ;;  %v403_v56 = vsel %vm355_vm4, %v387_v42, 0.0  ;;  %v336_v5 = vmul.f32 0.2, %v301_v54  ;;  %vm322_vm9 = vcmp.gt.f32.partialorder %v301_v54, 0.0 }
  0xc0   :  { %v289_v19 = vadd.f32 %v288_v10, %v244_v8  ;;  %v404_v3 = vadd.f32 %v403_v56, %v402_v59 }
  0xc2   :  { %v331_v28 = vmul.f32 0.2, %v289_v19  ;;  %vm317_vm5 = vcmp.gt.f32.partialorder %v289_v19, 0.0 }
  0xc4   :  { %v259_v14 = vpop.f32.mrf.mxu2  ;;  %v345_v38 = vsel %vm317_vm5, %v289_v19, %v331_v28  ;;  %v350_v19 = vsel %vm322_vm9, %v301_v54, %v336_v5 }
  0xc5   :  { %v388_v48 = vmul.f32 %v345_v38, %v345_v38  ;;  %v308_v51 = vpop.f32.mrf.mxu3  ;;  %v304_v61 = vadd.f32 %v303_v9, %v259_v14  ;;  %v393_v34 = vmul.f32 %v350_v19, %v350_v19  ;;  %v373_v41 = vsel %vm355_vm4, %v350_v19, 0.0 }
  0xc6   :  { %v246_v20 = vpop.f32.mrf.mxu0 }
  0xc7   :  { %v290_v21 = vpop.f32.mrf.mxu1  ;;  %v405_v2 = vsel %vm355_vm4, %v388_v48, 0.0  ;;  %v337_v13 = vmul.f32 0.2, %v304_v61  ;;  %vm323_vm11 = vcmp.gt.f32.partialorder %v304_v61, 0.0  ;;  %v415_v46 = vsel %vm355_vm4, %v393_v34, 0.0 }
  0xc8   :  { %v291_v27 = vadd.f32 %v290_v21, %v246_v20  ;;  %v406_v12 = vadd.f32 %v405_v2, %v404_v3 }
  0xc9   :  { %v351_v29 = vsel %vm323_vm11, %v304_v61, %v337_v13 }
  0xca   :  { %v332_v36 = vmul.f32 0.2, %v291_v27  ;;  %vm318_vm6 = vcmp.gt.f32.partialorder %v291_v27, 0.0  ;;  %v394_v42 = vmul.f32 %v351_v29, %v351_v29  ;;  %v375_v47 = vsel %vm355_vm4, %v351_v29, 0.0 }
  0xcc   :  { %v261_v31 = vpop.f32.mrf.mxu2  ;;  %v346_v49 = vsel %vm318_vm6, %v291_v27, %v332_v36  ;;  %v417_v52 = vsel %vm355_vm4, %v394_v42, 0.0 }
  0xcd   :  { %v389_v62 = vmul.f32 %v346_v49, %v346_v49  ;;  %v365_v6 = vsel %vm355_vm4, %v346_v49, 0.0  ;;  %v306_v10 = vadd.f32 %v305_v22, %v261_v31 }
  0xcf   :  { %v293_v39 = vpop.f32.mrf.mxu1  ;;  %v407_v9 = vsel %vm355_vm4, %v389_v62, 0.0  ;;  %v338_v23 = vmul.f32 0.2, %v306_v10  ;;  %vm324_vm12 = vcmp.gt.f32.partialorder %v306_v10, 0.0 }
  0xd0   :  { %v294_v43 = vadd.f32 %v293_v39, %v249_v60  ;;  %v363_v60 = vsel %vm355_vm4, %v345_v38, 0.0  ;;  %v408_v21 = vadd.f32 %v407_v9, %v406_v12 }
  0xd1   :  { %v364_v7 = vadd.f32 %v363_v60, %v362_v1  ;;  %v352_v36 = vsel %vm324_vm12, %v306_v10, %v338_v23 }
  0xd2   :  { %vm319_vm7 = vcmp.gt.f32.partialorder %v294_v43, 0.0  ;;  %v333_v50 = vmul.f32 0.2, %v294_v43  ;;  %v395_v48 = vmul.f32 %v352_v36, %v352_v36  ;;  %v377_v53 = vsel %vm355_vm4, %v352_v36, 0.0 }
  0xd3   :  { %v366_v15 = vadd.f32 %v365_v6, %v364_v7 }
  0xd4   :  { %v347_v57 = vsel %vm319_vm7, %v294_v43, %v333_v50  ;;  %v264_v58 = vpop.f32.mrf.mxu2 }
  0xd5   :  { %v390_v8 = vmul.f32 %v347_v57, %v347_v57  ;;  %v367_v14 = vsel %vm355_vm4, %v347_v57, 0.0  ;;  %v309_v16 = vadd.f32 %v308_v51, %v264_v58  ;;  %v419_v57 = vsel %vm355_vm4, %v395_v48, 0.0 }
  0xd6   :  { %v368_v22 = vadd.f32 %v367_v14, %v366_v15 }
  0xd7   :  { %v295_v4 = vpop.f32.mrf.mxu1  ;;  %v409_v20 = vsel %vm355_vm4, %v390_v8, 0.0  ;;  %v339_v31 = vmul.f32 0.2, %v309_v16  ;;  %vm325_vm13 = vcmp.gt.f32.partialorder %v309_v16, 0.0 }
  0xd8   :  { %v296_v11 = vadd.f32 %v295_v4, %v752_v0  ;;  %v310_v0 = vpop.f32.mrf.mxu3  ;;  %v410_v30 = vadd.f32 %v409_v20, %v408_v21 }
  0xd9   :  { %v353_v43 = vsel %vm325_vm13, %v309_v16, %v339_v31 }
  0xda   :  { %vm320_vm10 = vcmp.gt.f32.partialorder %v296_v11, 0.0  ;;  %v334_v17 = vmul.f32 0.2, %v296_v11  ;;  %v396_v54 = vmul.f32 %v353_v43, %v353_v43  ;;  %v379_v58 = vsel %vm355_vm4, %v353_v43, 0.0 }
  0xdc   :  { %v348_v24 = vsel %vm320_vm10, %v296_v11, %v334_v17  ;;  %v266_v25 = vpop.f32.mrf.mxu2  ;;  %v421_v62 = vsel %vm355_vm4, %v396_v54, 0.0 }
  0xdd   :  { %v369_v26 = vsel %vm355_vm4, %v348_v24, 0.0  ;;  %v391_v27 = vmul.f32 %v348_v24, %v348_v24  ;;  %v311_v28 = vadd.f32 %v310_v0, %v266_v25 }
  0xde   :  { %v370_v32 = vadd.f32 %v369_v26, %v368_v22 }
  0xdf   :  { %v411_v35 = vsel %vm355_vm4, %v391_v27, 0.0  ;;  %v340_v39 = vmul.f32 0.2, %v311_v28  ;;  %vm326_vm14 = vcmp.gt.f32.partialorder %v311_v28, 0.0 }
  0xe0   :  { %v372_v37 = vadd.f32 %v371_v33, %v370_v32  ;;  %v412_v38 = vadd.f32 %v411_v35, %v410_v30 }
  0xe1   :  { %v354_v50 = vsel %vm326_vm14, %v311_v28, %v340_v39 }
  0xe2   :  { %v374_v44 = vadd.f32 %v373_v41, %v372_v37  ;;  %v414_v45 = vadd.f32 %v413_v40, %v412_v38  ;;  %v397_v59 = vmul.f32 %v354_v50, %v354_v50  ;;  %v381_v63 = vsel %vm355_vm4, %v354_v50, 0.0 }
  0xe4   :  { %v416_v49 = vadd.f32 %v415_v46, %v414_v45  ;;  %v376_v51 = vadd.f32 %v375_v47, %v374_v44  ;;  %v423_v3 = vsel %vm355_vm4, %v397_v59, 0.0 }
  0xe6   :  { %v378_v55 = vadd.f32 %v377_v53, %v376_v51  ;;  %v418_v56 = vadd.f32 %v417_v52, %v416_v49 }
  0xe8   :  { %v380_v60 = vadd.f32 %v379_v58, %v378_v55  ;;  %v420_v61 = vadd.f32 %v419_v57, %v418_v56 }
  0xea   :  { %v382_v1 = vadd.f32 %v381_v63, %v380_v60  ;;  %v422_v2 = vadd.f32 %v421_v62, %v420_v61 }
  0xec   :  { %383 = vst.msk [vmem:[%s793_s2] sm:$0xff] %vm355_vm4, %v382_v1  ;;  %v424_v5 = vadd.f32 %v423_v3, %v422_v2 }
  0xee   :  { %425 = vst.msk [vmem:[%s794_s3] sm:$0xff] %vm355_vm4, %v424_v5 }

// kernel: patch_discriminator_forward.10
= control target key start
LH: loop header
LB: loop body
LE: loop exit
PB: predicated region body
PF: predicated region fallthrough
CT: control target
= control target key end

     0   :  { %vm409_vm1 = vcmask 257024   ;;  %s853_s1 = inlined_call_operand.vmem [shape: bf16[256,32], index: 1, kind: input, shape index: {}]   ;;  %s854_s0 = inlined_call_operand.vmem [shape: bf16[112,256], index: 0, kind: input, shape index: {}]   ;;  %s855_s2 = inlined_call_operand.vmem [shape: f32[1,32], index: 2, kind: input, shape index: {}]   ;;  %s856_s3 = inlined_call_operand.vmem [shape: f32[1,32], index: 3, kind: input, shape index: {}]   ;;  %s857_s4 = inlined_call_operand.vmem [shape: bf16[112,32], index: 4, kind: output, shape index: {}]  }
   0x1   :  { %v569_v0 = vld [vmem:[%s853_s1 + $0x38] sm:$0xff]  ;;  %v568_v2 = vld [vmem:[%s853_s1 + $0x30] sm:$0xff]  ;;  %v567_v4 = vld [vmem:[%s853_s1 + $0x28] sm:$0xff] }
   0x2   :  { %v577_v1 = vld [vmem:[%s853_s1 + $0x78] sm:$0xff]  ;;  %229 = vmatpush.bf16.msra.mxu0 %v569_v0  ;;  %578 = vmatpush.bf16.msra.mxu2 %v569_v0  ;;  %v576_v3 = vld [vmem:[%s853_s1 + $0x70] sm:$0xff]  ;;  %v575_v5 = vld [vmem:[%s853_s1 + $0x68] sm:$0xff] }
   0x3   :  { %273 = vmatpush.bf16.msra.mxu1 %v577_v1  ;;  %586 = vmatpush.bf16.msra.mxu3 %v577_v1  ;;  %v566_v6 = vld [vmem:[%s853_s1 + $0x20] sm:$0xff]  ;;  %v565_v8 = vld [vmem:[%s853_s1 + $0x18] sm:$0xff]  ;;  %v564_v10 = vld [vmem:[%s853_s1 + $0x10] sm:$0xff] }
   0x4   :  { %v574_v7 = vld [vmem:[%s853_s1 + $0x60] sm:$0xff]  ;;  %v573_v9 = vld [vmem:[%s853_s1 + $0x58] sm:$0xff]  ;;  %v572_v11 = vld [vmem:[%s853_s1 + $0x50] sm:$0xff] }
   0x5   :  { %v563_v12 = vld [vmem:[%s853_s1 + $0x8] sm:$0xff]  ;;  %v562_v14 = vld [vmem:[%s853_s1] sm:$0xff]  ;;  %v454_v18 = vld [vmem:[%s854_s0 + $0x30] sm:$0xf] }
   0x6   :  { %230 = vmatpush.bf16.msra.mxu0 %v568_v2  ;;  %579 = vmatpush.bf16.msra.mxu2 %v568_v2  ;;  %v571_v13 = vld [vmem:[%s853_s1 + $0x48] sm:$0xff]  ;;  %v570_v15 = vld [vmem:[%s853_s1 + $0x40] sm:$0xff]  ;;  %v555_v19 = vld [vmem:[%s854_s0 + $0x34] sm:$0xf0] }
   0x7   :  { %274 = vmatpush.bf16.msra.mxu1 %v576_v3  ;;  %587 = vmatpush.bf16.msra.mxu3 %v576_v3  ;;  %v430_v16 = vld [vmem:[%s854_s0] sm:$0xf]  ;;  %v549_v17 = vld [vmem:[%s854_s0 + $0x4] sm:$0xf0]  ;;  %v548_v20 = vld [vmem:[%s854_s0 + $0x4] sm:$0xf]  ;;  %v455_v25 = vor.u32 %v555_v19, %v454_v18 }
   0x8   :  { %v432_v21 = vld [vmem:[%s854_s0 + $0x8] sm:$0xf0]  ;;  %v556_v22 = vld [vmem:[%s854_s0 + $0x44] sm:$0xf]  ;;  %v431_v24 = vor.u32 %v549_v17, %v430_v16  ;;  %v438_v28 = vld [vmem:[%s854_s0 + $0x10] sm:$0xf] }
   0x9   :  { %v464_v23 = vld [vmem:[%s854_s0 + $0x48] sm:$0xf0]  ;;  %v435_v26 = vor.u32 %v548_v20, %v432_v21  ;;  %v551_v29 = vld [vmem:[%s854_s0 + $0x14] sm:$0xf0]  ;;  %v462_v30 = vld [vmem:[%s854_s0 + $0x40] sm:$0xf] }
   0xa   :  { %231 = vmatpush.bf16.msra.mxu0 %v567_v4  ;;  %580 = vmatpush.bf16.msra.mxu2 %v567_v4  ;;  %v467_v27 = vor.u32 %v556_v22, %v464_v23  ;;  %v557_v31 = vld [vmem:[%s854_s0 + $0x44] sm:$0xf0]  ;;  %v550_v32 = vld [vmem:[%s854_s0 + $0x14] sm:$0xf]  ;;  %v440_v33 = vld [vmem:[%s854_s0 + $0x18] sm:$0xf0]  ;;  %v439_v36 = vor.u32 %v551_v29, %v438_v28 }
   0xb   :  { %275 = vmatpush.bf16.msra.mxu1 %v575_v5  ;;  %588 = vmatpush.bf16.msra.mxu3 %v575_v5  ;;  %v558_v34 = vld [vmem:[%s854_s0 + $0x54] sm:$0xf]  ;;  %v472_v35 = vld [vmem:[%s854_s0 + $0x58] sm:$0xf0]  ;;  %v463_v37 = vor.u32 %v557_v31, %v462_v30  ;;  %v443_v38 = vor.u32 %v550_v32, %v440_v33  ;;  %v446_v40 = vld [vmem:[%s854_s0 + $0x20] sm:$0xf] }
   0xc   :  { %v475_v39 = vor.u32 %v558_v34, %v472_v35  ;;  %v553_v41 = vld [vmem:[%s854_s0 + $0x24] sm:$0xf0]  ;;  %v470_v42 = vld [vmem:[%s854_s0 + $0x50] sm:$0xf]  ;;  %v559_v43 = vld [vmem:[%s854_s0 + $0x54] sm:$0xf0] }
   0xd   :  { %v552_v44 = vld [vmem:[%s854_s0 + $0x24] sm:$0xf]  ;;  %v448_v45 = vld [vmem:[%s854_s0 + $0x28] sm:$0xf0]  ;;  %v447_v48 = vor.u32 %v553_v41, %v446_v40  ;;  %v471_v49 = vor.u32 %v559_v43, %v470_v42  ;;  %v478_v52 = vld [vmem:[%s854_s0 + $0x60] sm:$0xf] }
   0xe   :  { %232 = vmatpush.bf16.msra.mxu0 %v566_v6  ;;  %581 = vmatpush.bf16.msra.mxu2 %v566_v6  ;;  %v560_v46 = vld [vmem:[%s854_s0 + $0x64] sm:$0xf]  ;;  %v480_v47 = vld [vmem:[%s854_s0 + $0x68] sm:$0xf0]  ;;  %v451_v50 = vor.u32 %v552_v44, %v448_v45  ;;  %v561_v53 = vld [vmem:[%s854_s0 + $0x64] sm:$0xf0] }
   0xf   :  { %276 = vmatpush.bf16.msra.mxu1 %v574_v7  ;;  %589 = vmatpush.bf16.msra.mxu3 %v574_v7  ;;  %v483_v51 = vor.u32 %v560_v46, %v480_v47  ;;  %v554_v54 = vld [vmem:[%s854_s0 + $0x34] sm:$0xf]  ;;  %v456_v55 = vld [vmem:[%s854_s0 + $0x38] sm:$0xf0]  ;;  %v479_v56 = vor.u32 %v561_v53, %v478_v52  ;;  %v756_v61 = vld [vmem:[%s855_s2] ss:$0 sm:$0xff] }
  0x10   :  { %v459_v57 = vor.u32 %v554_v54, %v456_v55  ;;  %v761_v63 = vld [vmem:[%s856_s3] ss:$0 sm:$0xff] }
  0x12   :  { %233 = vmatpush.bf16.msra.mxu0 %v565_v8  ;;  %582 = vmatpush.bf16.msra.mxu2 %v565_v8 }
  0x13   :  { %277 = vmatpush.bf16.msra.mxu1 %v573_v9  ;;  %590 = vmatpush.bf16.msra.mxu3 %v573_v9 }
  0x16   :  { %234 = vmatpush.bf16.msra.mxu0 %v564_v10  ;;  %583 = vmatpush.bf16.msra.mxu2 %v564_v10 }
  0x17   :  { %278 = vmatpush.bf16.msra.mxu1 %v572_v11  ;;  %591 = vmatpush.bf16.msra.mxu3 %v572_v11 }
  0x1a   :  { %235 = vmatpush.bf16.msra.mxu0 %v563_v12  ;;  %584 = vmatpush.bf16.msra.mxu2 %v563_v12 }
  0x1b   :  { %279 = vmatpush.bf16.msra.mxu1 %v571_v13  ;;  %592 = vmatpush.bf16.msra.mxu3 %v571_v13 }
  0x1e   :  { %236 = vmatpush.bf16.msra.mxu0 %v562_v14  ;;  %585 = vmatpush.bf16.msra.mxu2 %v562_v14 }
  0x1f   :  { %280 = vmatpush.bf16.msra.mxu1 %v570_v15  ;;  %593 = vmatpush.bf16.msra.mxu3 %v570_v15 }
  0x21   :  { %237 = vmatmul.bf16.vlgmr.msra.gmra.mxu0 %v431_v24  ;;  %252 = vmatmul.bf16.vlgmr.msra.gmra.mxu2 %v455_v25 }
  0x22   :  { %281 = vmatmul.bf16.vlgmr.msra.gmra.mxu1 %v435_v26  ;;  %301 = vmatmul.bf16.vlgmr.msra.gmra.mxu3 %v467_v27 }
  0x31   :  { %242 = vmatmul.bf16.gmra.mxu0 %v439_v36  ;;  %257 = vmatmul.bf16.gmra.mxu2 %v463_v37 }
  0x32   :  { %286 = vmatmul.bf16.gmra.mxu1 %v443_v38  ;;  %306 = vmatmul.bf16.gmra.mxu3 %v475_v39 }
  0x41   :  { %247 = vmatmul.bf16.gmra.mxu0 %v447_v48  ;;  %262 = vmatmul.bf16.gmra.mxu2 %v471_v49 }
  0x42   :  { %291 = vmatmul.bf16.gmra.mxu1 %v451_v50  ;;  %311 = vmatmul.bf16.gmra.mxu3 %v483_v51 }
  0x51   :  { %267 = vmatmul.bf16.gmra.mxu2 %v479_v56 }
  0x52   :  { %296 = vmatmul.bf16.gmra.mxu1 %v459_v57 }
  0x9e   :  { %v238_v58 = vpop.f32.mrf.mxu0 }
  0x9f   :  { %v282_v59 = vpop.f32.mrf.mxu1 }
  0xa0   :  { %v283_v60 = vadd.f32 %v282_v59, %v238_v58 }
  0xa2   :  { %vm317_vm0 = vcmp.gt.f32.partialorder %v283_v60, 0.0  ;;  %v331_v62 = vmul.f32 0.2, %v283_v60 }
  0xa4   :  { %v345_v0 = vsel %vm317_vm0, %v283_v60, %v331_v62  ;;  %v763_v1 = vpop.f32.mrf.mxu2 }
  0xa5   :  { %v363_v2 = vmul.f32 %v756_v61, %v345_v0  ;;  %v302_v9 = vpop.f32.mrf.mxu3 }
  0xa6   :  { %v240_v3 = vpop.f32.mrf.mxu0 }
  0xa7   :  { %v381_v4 = vadd.f32 %v761_v63, %v363_v2  ;;  %v284_v5 = vpop.f32.mrf.mxu1 }
  0xa8   :  { %v285_v6 = vadd.f32 %v284_v5, %v240_v3 }
  0xa9   :  { %v395_v7 = vpack.c.bf16 %v381_v4, %v381_v4 }
  0xaa   :  { %vm318_vm2 = vcmp.gt.f32.partialorder %v285_v6, 0.0  ;;  %v332_v8 = vmul.f32 0.2, %v285_v6 }
  0xab   :  { %410 = vst.msk [vmem:[%s857_s4] sm:$0xf] %vm409_vm1, %v395_v7 }
  0xac   :  { %v346_v10 = vsel %vm318_vm2, %v285_v6, %v332_v8  ;;  %v771_v11 = vpop.f32.mrf.mxu2 }
  0xad   :  { %v364_v12 = vmul.f32 %v756_v61, %v346_v10  ;;  %v304_v21 = vpop.f32.mrf.mxu3 }
  0xae   :  { %v243_v13 = vpop.f32.mrf.mxu0 }
  0xaf   :  { %v382_v14 = vadd.f32 %v761_v63, %v364_v12  ;;  %v287_v15 = vpop.f32.mrf.mxu1 }
  0xb0   :  { %v288_v16 = vadd.f32 %v287_v15, %v243_v13 }
  0xb1   :  { %v396_v17 = vpack.c.bf16 %v382_v14, %v382_v14 }
  0xb2   :  { %vm319_vm3 = vcmp.gt.f32.partialorder %v288_v16, 0.0  ;;  %v333_v18 = vmul.f32 0.2, %v288_v16 }
  0xb3   :  { %411 = vst.msk [vmem:[%s857_s4 + $0x4] sm:$0xf] %vm409_vm1, %v396_v17 }
  0xb4   :  { %v347_v19 = vsel %vm319_vm3, %v288_v16, %v333_v18  ;;  %v258_v20 = vpop.f32.mrf.mxu2 }
  0xb5   :  { %v365_v22 = vmul.f32 %v756_v61, %v347_v19  ;;  %v303_v23 = vadd.f32 %v302_v9, %v258_v20  ;;  %v307_v39 = vpop.f32.mrf.mxu3 }
  0xb6   :  { %v245_v24 = vpop.f32.mrf.mxu0 }
  0xb7   :  { %v383_v25 = vadd.f32 %v761_v63, %v365_v22  ;;  %vm325_vm4 = vcmp.gt.f32.partialorder %v303_v23, 0.0  ;;  %v339_v26 = vmul.f32 0.2, %v303_v23  ;;  %v289_v27 = vpop.f32.mrf.mxu1 }
  0xb8   :  { %v290_v28 = vadd.f32 %v289_v27, %v245_v24 }
  0xb9   :  { %v397_v29 = vpack.c.bf16 %v383_v25, %v383_v25  ;;  %v353_v30 = vsel %vm325_vm4, %v303_v23, %v339_v26 }
  0xba   :  { %v371_v31 = vmul.f32 %v756_v61, %v353_v30  ;;  %vm320_vm5 = vcmp.gt.f32.partialorder %v290_v28, 0.0  ;;  %v334_v32 = vmul.f32 0.2, %v290_v28 }
  0xbb   :  { %412 = vst.msk [vmem:[%s857_s4 + $0x8] sm:$0xf] %vm409_vm1, %v397_v29 }
  0xbc   :  { %v389_v33 = vadd.f32 %v761_v63, %v371_v31  ;;  %v348_v34 = vsel %vm320_vm5, %v290_v28, %v334_v32  ;;  %v260_v35 = vpop.f32.mrf.mxu2 }
  0xbd   :  { %v366_v36 = vmul.f32 %v756_v61, %v348_v34  ;;  %v305_v37 = vadd.f32 %v304_v21, %v260_v35  ;;  %v309_v59 = vpop.f32.mrf.mxu3 }
  0xbe   :  { %v403_v38 = vpack.c.bf16 %v389_v33, %v389_v33  ;;  %v248_v40 = vpop.f32.mrf.mxu0 }
  0xbf   :  { %v384_v41 = vadd.f32 %v761_v63, %v366_v36  ;;  %vm326_vm6 = vcmp.gt.f32.partialorder %v305_v37, 0.0  ;;  %v340_v42 = vmul.f32 0.2, %v305_v37  ;;  %v292_v43 = vpop.f32.mrf.mxu1 }
  0xc0   :  { %418 = vst.msk [vmem:[%s857_s4 + $0x20] sm:$0xf] %vm409_vm1, %v403_v38  ;;  %v293_v44 = vadd.f32 %v292_v43, %v248_v40 }
  0xc1   :  { %v398_v45 = vpack.c.bf16 %v384_v41, %v384_v41  ;;  %v354_v46 = vsel %vm326_vm6, %v305_v37, %v340_v42 }
  0xc2   :  { %v372_v47 = vmul.f32 %v756_v61, %v354_v46  ;;  %vm321_vm7 = vcmp.gt.f32.partialorder %v293_v44, 0.0  ;;  %v335_v48 = vmul.f32 0.2, %v293_v44 }
  0xc3   :  { %413 = vst.msk [vmem:[%s857_s4 + $0xc] sm:$0xf] %vm409_vm1, %v398_v45 }
  0xc4   :  { %v390_v49 = vadd.f32 %v761_v63, %v372_v47  ;;  %v349_v50 = vsel %vm321_vm7, %v293_v44, %v335_v48  ;;  %v263_v51 = vpop.f32.mrf.mxu2 }
  0xc5   :  { %v367_v52 = vmul.f32 %v756_v61, %v349_v50  ;;  %v308_v53 = vadd.f32 %v307_v39, %v263_v51  ;;  %v312_v18 = vpop.f32.mrf.mxu3 }
  0xc6   :  { %v404_v54 = vpack.c.bf16 %v390_v49, %v390_v49  ;;  %v250_v55 = vpop.f32.mrf.mxu0 }
  0xc7   :  { %v385_v56 = vadd.f32 %v761_v63, %v367_v52  ;;  %vm327_vm8 = vcmp.gt.f32.partialorder %v308_v53, 0.0  ;;  %v341_v57 = vmul.f32 0.2, %v308_v53  ;;  %v294_v58 = vpop.f32.mrf.mxu1 }
  0xc8   :  { %419 = vst.msk [vmem:[%s857_s4 + $0x24] sm:$0xf] %vm409_vm1, %v404_v54  ;;  %v295_v60 = vadd.f32 %v294_v58, %v250_v55 }
  0xc9   :  { %v399_v62 = vpack.c.bf16 %v385_v56, %v385_v56  ;;  %v355_v0 = vsel %vm327_vm8, %v308_v53, %v341_v57 }
  0xca   :  { %v373_v2 = vmul.f32 %v756_v61, %v355_v0  ;;  %vm322_vm9 = vcmp.gt.f32.partialorder %v295_v60, 0.0  ;;  %v336_v3 = vmul.f32 0.2, %v295_v60 }
  0xcb   :  { %414 = vst.msk [vmem:[%s857_s4 + $0x10] sm:$0xf] %vm409_vm1, %v399_v62 }
  0xcc   :  { %v391_v4 = vadd.f32 %v761_v63, %v373_v2  ;;  %v350_v5 = vsel %vm322_vm9, %v295_v60, %v336_v3  ;;  %v265_v6 = vpop.f32.mrf.mxu2 }
  0xcd   :  { %v368_v7 = vmul.f32 %v756_v61, %v350_v5  ;;  %v310_v8 = vadd.f32 %v309_v59, %v265_v6  ;;  %v314_v34 = vpop.f32.mrf.mxu3 }
  0xce   :  { %v405_v9 = vpack.c.bf16 %v391_v4, %v391_v4 }
  0xcf   :  { %v386_v10 = vadd.f32 %v761_v63, %v368_v7  ;;  %vm328_vm10 = vcmp.gt.f32.partialorder %v310_v8, 0.0  ;;  %v342_v12 = vmul.f32 0.2, %v310_v8  ;;  %v297_v13 = vpop.f32.mrf.mxu1 }
  0xd0   :  { %420 = vst.msk [vmem:[%s857_s4 + $0x28] sm:$0xf] %vm409_vm1, %v405_v9  ;;  %v298_v14 = vadd.f32 %v297_v13, %v763_v1 }
  0xd1   :  { %v400_v15 = vpack.c.bf16 %v386_v10, %v386_v10  ;;  %v356_v16 = vsel %vm328_vm10, %v310_v8, %v342_v12 }
  0xd2   :  { %v374_v17 = vmul.f32 %v756_v61, %v356_v16  ;;  %vm323_vm11 = vcmp.gt.f32.partialorder %v298_v14, 0.0  ;;  %v337_v19 = vmul.f32 0.2, %v298_v14 }
  0xd3   :  { %415 = vst.msk [vmem:[%s857_s4 + $0x14] sm:$0xf] %vm409_vm1, %v400_v15 }
  0xd4   :  { %v392_v20 = vadd.f32 %v761_v63, %v374_v17  ;;  %v351_v21 = vsel %vm323_vm11, %v298_v14, %v337_v19  ;;  %v268_v22 = vpop.f32.mrf.mxu2 }
  0xd5   :  { %v369_v23 = vmul.f32 %v756_v61, %v351_v21  ;;  %v313_v24 = vadd.f32 %v312_v18, %v268_v22 }
  0xd6   :  { %v406_v1 = vpack.c.bf16 %v392_v20, %v392_v20 }
  0xd7   :  { %v387_v25 = vadd.f32 %v761_v63, %v369_v23  ;;  %vm329_vm12 = vcmp.gt.f32.partialorder %v313_v24, 0.0  ;;  %v343_v26 = vmul.f32 0.2, %v313_v24  ;;  %v299_v27 = vpop.f32.mrf.mxu1 }
  0xd8   :  { %421 = vst.msk [vmem:[%s857_s4 + $0x2c] sm:$0xf] %vm409_vm1, %v406_v1  ;;  %v300_v28 = vadd.f32 %v299_v27, %v771_v11 }
  0xd9   :  { %v401_v29 = vpack.c.bf16 %v387_v25, %v387_v25  ;;  %v357_v30 = vsel %vm329_vm12, %v313_v24, %v343_v26 }
  0xda   :  { %v375_v31 = vmul.f32 %v756_v61, %v357_v30  ;;  %vm324_vm13 = vcmp.gt.f32.partialorder %v300_v28, 0.0  ;;  %v338_v32 = vmul.f32 0.2, %v300_v28 }
  0xdb   :  { %416 = vst.msk [vmem:[%s857_s4 + $0x18] sm:$0xf] %vm409_vm1, %v401_v29 }
  0xdc   :  { %v393_v33 = vadd.f32 %v761_v63, %v375_v31  ;;  %v352_v35 = vsel %vm324_vm13, %v300_v28, %v338_v32  ;;  %v270_v36 = vpop.f32.mrf.mxu2 }
  0xdd   :  { %v370_v37 = vmul.f32 %v756_v61, %v352_v35  ;;  %v315_v38 = vadd.f32 %v314_v34, %v270_v36 }
  0xde   :  { %v407_v11 = vpack.c.bf16 %v393_v33, %v393_v33 }
  0xdf   :  { %v388_v39 = vadd.f32 %v761_v63, %v370_v37  ;;  %vm330_vm14 = vcmp.gt.f32.partialorder %v315_v38, 0.0  ;;  %v344_v40 = vmul.f32 0.2, %v315_v38 }
  0xe0   :  { %422 = vst.msk [vmem:[%s857_s4 + $0x30] sm:$0xf] %vm409_vm1, %v407_v11 }
  0xe1   :  { %v402_v41 = vpack.c.bf16 %v388_v39, %v388_v39  ;;  %v358_v42 = vsel %vm330_vm14, %v315_v38, %v344_v40 }
  0xe2   :  { %v376_v43 = vmul.f32 %v756_v61, %v358_v42 }
  0xe3   :  { %417 = vst.msk [vmem:[%s857_s4 + $0x1c] sm:$0xf] %vm409_vm1, %v402_v41 }
  0xe4   :  { %v394_v44 = vadd.f32 %v761_v63, %v376_v43 }
  0xe6   :  { %v408_v45 = vpack.c.bf16 %v394_v44, %v394_v44 }
  0xe8   :  { %423 = vst.msk [vmem:[%s857_s4 + $0x34] sm:$0xf] %vm409_vm1, %v408_v45 }

// kernel: patch_discriminator_forward.11
= control target key start
LH: loop header
LB: loop body
LE: loop exit
PB: predicated region body
PF: predicated region fallthrough
CT: control target
= control target key end

     0   :  { %vm490_vm5 = vcmask 523264   ;;  %s970_s1 = inlined_call_operand.vmem [shape: bf16[512,64], index: 1, kind: input, shape index: {}]   ;;  %s971_s0 = inlined_call_operand.vmem [shape: bf16[56,512], index: 0, kind: input, shape index: {}]   ;;  %s972_s2 = inlined_call_operand.vmem [shape: f32[8,64], index: 2, kind: output, shape index: {0}]   ;;  %s973_s3 = inlined_call_operand.vmem [shape: f32[8,64], index: 3, kind: output, shape index: {1}]  }
   0x1   :  { %v729_v0 = vld [vmem:[%s970_s1 + $0x38] sm:$0xff]  ;;  %v728_v4 = vld [vmem:[%s970_s1 + $0x30] sm:$0xff]  ;;  %v727_v8 = vld [vmem:[%s970_s1 + $0x28] sm:$0xff] }
   0x2   :  { %v737_v1 = vld [vmem:[%s970_s1 + $0x78] sm:$0xff]  ;;  %357 = vmatpush.bf16.msra.mxu0 %v729_v0  ;;  %v736_v5 = vld [vmem:[%s970_s1 + $0x70] sm:$0xff]  ;;  %v735_v9 = vld [vmem:[%s970_s1 + $0x68] sm:$0xff] }
   0x3   :  { %v745_v2 = vld [vmem:[%s970_s1 + $0xb8] sm:$0xff]  ;;  %385 = vmatpush.bf16.msra.mxu1 %v737_v1  ;;  %v744_v6 = vld [vmem:[%s970_s1 + $0xb0] sm:$0xff]  ;;  %v743_v10 = vld [vmem:[%s970_s1 + $0xa8] sm:$0xff] }
   0x4   :  { %v753_v3 = vld [vmem:[%s970_s1 + $0xf8] sm:$0xff]  ;;  %413 = vmatpush.bf16.msra.mxu2 %v745_v2  ;;  %v752_v7 = vld [vmem:[%s970_s1 + $0xf0] sm:$0xff]  ;;  %v751_v11 = vld [vmem:[%s970_s1 + $0xe8] sm:$0xff] }
   0x5   :  { %441 = vmatpush.bf16.msra.mxu3 %v753_v3  ;;  %v726_v12 = vld [vmem:[%s970_s1 + $0x20] sm:$0xff]  ;;  %v725_v16 = vld [vmem:[%s970_s1 + $0x18] sm:$0xff]  ;;  %v724_v20 = vld [vmem:[%s970_s1 + $0x10] sm:$0xff] }
   0x6   :  { %358 = vmatpush.bf16.msra.mxu0 %v728_v4  ;;  %v734_v13 = vld [vmem:[%s970_s1 + $0x60] sm:$0xff]  ;;  %v733_v17 = vld [vmem:[%s970_s1 + $0x58] sm:$0xff]  ;;  %v732_v21 = vld [vmem:[%s970_s1 + $0x50] sm:$0xff] }
   0x7   :  { %386 = vmatpush.bf16.msra.mxu1 %v736_v5  ;;  %v742_v14 = vld [vmem:[%s970_s1 + $0xa0] sm:$0xff]  ;;  %v741_v18 = vld [vmem:[%s970_s1 + $0x98] sm:$0xff]  ;;  %v740_v22 = vld [vmem:[%s970_s1 + $0x90] sm:$0xff] }
   0x8   :  { %414 = vmatpush.bf16.msra.mxu2 %v744_v6  ;;  %v750_v15 = vld [vmem:[%s970_s1 + $0xe0] sm:$0xff]  ;;  %v749_v19 = vld [vmem:[%s970_s1 + $0xd8] sm:$0xff]  ;;  %v748_v23 = vld [vmem:[%s970_s1 + $0xd0] sm:$0xff] }
   0x9   :  { %442 = vmatpush.bf16.msra.mxu3 %v752_v7  ;;  %v723_v24 = vld [vmem:[%s970_s1 + $0x8] sm:$0xff]  ;;  %v722_v28 = vld [vmem:[%s970_s1] sm:$0xff]  ;;  %v712_v33 = vld [vmem:[%s971_s0 + $0xc] sm:$0xf0] }
   0xa   :  { %359 = vmatpush.bf16.msra.mxu0 %v727_v8  ;;  %v731_v25 = vld [vmem:[%s970_s1 + $0x48] sm:$0xff]  ;;  %v730_v29 = vld [vmem:[%s970_s1 + $0x40] sm:$0xff]  ;;  %v538_v35 = vld [vmem:[%s971_s0 + $0x10] sm:$0xf0] }
   0xb   :  { %387 = vmatpush.bf16.msra.mxu1 %v735_v9  ;;  %v739_v26 = vld [vmem:[%s970_s1 + $0x88] sm:$0xff]  ;;  %v738_v30 = vld [vmem:[%s970_s1 + $0x80] sm:$0xff]  ;;  %v713_v37 = vld [vmem:[%s971_s0 + $0x14] sm:$0xf0] }
   0xc   :  { %415 = vmatpush.bf16.msra.mxu2 %v743_v10  ;;  %v747_v27 = vld [vmem:[%s970_s1 + $0xc8] sm:$0xff]  ;;  %v746_v31 = vld [vmem:[%s970_s1 + $0xc0] sm:$0xff]  ;;  %v546_v39 = vld [vmem:[%s971_s0 + $0x18] sm:$0xf0] }
   0xd   :  { %443 = vmatpush.bf16.msra.mxu3 %v751_v11  ;;  %v536_v32 = vld [vmem:[%s971_s0] sm:$0xf]  ;;  %v710_v34 = vld [vmem:[%s971_s0 + $0x4] sm:$0xf]  ;;  %v544_v36 = vld [vmem:[%s971_s0 + $0x8] sm:$0xf] }
   0xe   :  { %360 = vmatpush.bf16.msra.mxu0 %v726_v12  ;;  %v711_v38 = vld [vmem:[%s971_s0 + $0xc] sm:$0xf]  ;;  %v537_v40 = vor.u32 %v712_v33, %v536_v32  ;;  %v541_v41 = vor.u32 %v710_v34, %v538_v35  ;;  %v545_v42 = vor.u32 %v713_v37, %v544_v36  ;;  %v552_v44 = vld [vmem:[%s971_s0 + $0x20] sm:$0xf]  ;;  %v716_v45 = vld [vmem:[%s971_s0 + $0x2c] sm:$0xf0] }
   0xf   :  { %388 = vmatpush.bf16.msra.mxu1 %v734_v13  ;;  %v549_v43 = vor.u32 %v711_v38, %v546_v39  ;;  %v714_v46 = vld [vmem:[%s971_s0 + $0x24] sm:$0xf]  ;;  %v554_v47 = vld [vmem:[%s971_s0 + $0x30] sm:$0xf0]  ;;  %v560_v48 = vld [vmem:[%s971_s0 + $0x28] sm:$0xf]  ;;  %v553_v52 = vor.u32 %v716_v45, %v552_v44 }
  0x10   :  { %416 = vmatpush.bf16.msra.mxu2 %v742_v14  ;;  %v717_v49 = vld [vmem:[%s971_s0 + $0x34] sm:$0xf0]  ;;  %v715_v50 = vld [vmem:[%s971_s0 + $0x2c] sm:$0xf]  ;;  %v562_v51 = vld [vmem:[%s971_s0 + $0x38] sm:$0xf0]  ;;  %v557_v53 = vor.u32 %v714_v46, %v554_v47 }
  0x11   :  { %444 = vmatpush.bf16.msra.mxu3 %v750_v15  ;;  %v561_v54 = vor.u32 %v717_v49, %v560_v48  ;;  %v565_v55 = vor.u32 %v715_v50, %v562_v51  ;;  %v568_v56 = vld [vmem:[%s971_s0 + $0x40] sm:$0xf]  ;;  %v720_v57 = vld [vmem:[%s971_s0 + $0x4c] sm:$0xf0]  ;;  %v718_v58 = vld [vmem:[%s971_s0 + $0x44] sm:$0xf] }
  0x12   :  { %361 = vmatpush.bf16.msra.mxu0 %v725_v16  ;;  %v570_v59 = vld [vmem:[%s971_s0 + $0x50] sm:$0xf0]  ;;  %v576_v60 = vld [vmem:[%s971_s0 + $0x48] sm:$0xf]  ;;  %v721_v61 = vld [vmem:[%s971_s0 + $0x54] sm:$0xf0]  ;;  %v569_v0 = vor.u32 %v720_v57, %v568_v56 }
  0x13   :  { %389 = vmatpush.bf16.msra.mxu1 %v733_v17  ;;  %v719_v62 = vld [vmem:[%s971_s0 + $0x4c] sm:$0xf]  ;;  %v578_v63 = vld [vmem:[%s971_s0 + $0x58] sm:$0xf0]  ;;  %v573_v1 = vor.u32 %v718_v58, %v570_v59  ;;  %v577_v2 = vor.u32 %v721_v61, %v576_v60  ;;  %v25_v4 = vld [vmem:[%s971_s0 + $0x60] sm:$0xff] }
  0x14   :  { %417 = vmatpush.bf16.msra.mxu2 %v741_v18  ;;  %v581_v3 = vor.u32 %v719_v62, %v578_v63  ;;  %v26_v5 = vld [vmem:[%s971_s0 + $0x68] sm:$0xff]  ;;  %v129_v6 = vunpack.c.l.b16 %v25_v4  ;;  %v130_v7 = vunpack.c.h.b16 %v25_v4 }
  0x15   :  { %445 = vmatpush.bf16.msra.mxu3 %v749_v19  ;;  %v131_v8 = vunpack.c.l.b16 %v26_v5  ;;  %v132_v9 = vunpack.c.h.b16 %v26_v5 }
  0x16   :  { %362 = vmatpush.bf16.msra.mxu0 %v724_v20  ;;  %v145_v10 = vpack.c.b16 %v129_v6, %v129_v6  ;;  %v146_v11 = vpack.c.b16 %v130_v7, %v130_v7 }
  0x17   :  { %390 = vmatpush.bf16.msra.mxu1 %v732_v21  ;;  %v147_v12 = vpack.c.b16 %v131_v8, %v131_v8  ;;  %v148_v13 = vpack.c.b16 %v132_v9, %v132_v9 }
  0x18   :  { %418 = vmatpush.bf16.msra.mxu2 %v740_v22 }
  0x19   :  { %446 = vmatpush.bf16.msra.mxu3 %v748_v23 }
  0x1a   :  { %363 = vmatpush.bf16.msra.mxu0 %v723_v24 }
  0x1b   :  { %391 = vmatpush.bf16.msra.mxu1 %v731_v25 }
  0x1c   :  { %419 = vmatpush.bf16.msra.mxu2 %v739_v26 }
  0x1d   :  { %447 = vmatpush.bf16.msra.mxu3 %v747_v27 }
  0x1e   :  { %364 = vmatpush.bf16.msra.mxu0 %v722_v28 }
  0x1f   :  { %392 = vmatpush.bf16.msra.mxu1 %v730_v29 }
  0x20   :  { %420 = vmatpush.bf16.msra.mxu2 %v738_v30 }
  0x21   :  { %448 = vmatpush.bf16.msra.mxu3 %v746_v31  ;;  %365 = vmatmul.bf16.vlgmr.msra.gmra.mxu0 %v537_v40 }
  0x22   :  { %393 = vmatmul.bf16.vlgmr.msra.gmra.mxu1 %v541_v41 }
  0x23   :  { %421 = vmatmul.bf16.vlgmr.msra.gmra.mxu2 %v545_v42 }
  0x24   :  { %449 = vmatmul.bf16.vlgmr.msra.gmra.mxu3 %v549_v43 }
  0x31   :  { %370 = vmatmul.bf16.gmra.mxu0 %v553_v52 }
  0x32   :  { %398 = vmatmul.bf16.gmra.mxu1 %v557_v53 }
  0x33   :  { %426 = vmatmul.bf16.gmra.mxu2 %v561_v54 }
  0x34   :  { %454 = vmatmul.bf16.gmra.mxu3 %v565_v55 }
  0x41   :  { %375 = vmatmul.bf16.gmra.mxu0 %v569_v0 }
  0x42   :  { %403 = vmatmul.bf16.gmra.mxu1 %v573_v1 }
  0x43   :  { %431 = vmatmul.bf16.gmra.mxu2 %v577_v2 }
  0x44   :  { %459 = vmatmul.bf16.gmra.mxu3 %v581_v3 }
  0x51   :  { %380 = vmatmul.bf16.gmra.mxu0 %v145_v10 }
  0x52   :  { %408 = vmatmul.bf16.gmra.mxu1 %v146_v11 }
  0x53   :  { %436 = vmatmul.bf16.gmra.mxu2 %v147_v12 }
  0x54   :  { %464 = vmatmul.bf16.gmra.mxu3 %v148_v13 }
  0x9e   :  { %v366_v14 = vpop.f32.mrf.mxu0 }
  0x9f   :  { %v394_v15 = vpop.f32.mrf.mxu1 }
  0xa0   :  { %v395_v30 = vadd.f32 %v394_v15, %v366_v14 }
  0xa6   :  { %v422_v16 = vpop.f32.mrf.mxu2  ;;  %v368_v18 = vpop.f32.mrf.mxu0 }
  0xa7   :  { %v450_v17 = vpop.f32.mrf.mxu3  ;;  %v396_v19 = vpop.f32.mrf.mxu1  ;;  %v423_v36 = vadd.f32 %v422_v16, %v395_v30 }
  0xa8   :  { %v397_v31 = vadd.f32 %v396_v19, %v368_v18 }
  0xa9   :  { %v451_v44 = vadd.f32 %v450_v17, %v423_v36 }
  0xab   :  { %v476_v51 = vmul.f32 0.2, %v451_v44  ;;  %vm469_vm1 = vcmp.gt.f32.partialorder %v451_v44, 0.0 }
  0xad   :  { %v483_v59 = vsel %vm469_vm1, %v451_v44, %v476_v51 }
  0xae   :  { %v424_v20 = vpop.f32.mrf.mxu2  ;;  %v371_v22 = vpop.f32.mrf.mxu0  ;;  %v505_v4 = vmul.f32 %v483_v59, %v483_v59  ;;  %v491_v10 = vsel %vm490_vm5, %v483_v59, 0.0 }
  0xaf   :  { %v452_v21 = vpop.f32.mrf.mxu3  ;;  %v399_v23 = vpop.f32.mrf.mxu1  ;;  %v425_v35 = vadd.f32 %v424_v20, %v397_v31 }
  0xb0   :  { %v400_v32 = vadd.f32 %v399_v23, %v371_v22  ;;  %v512_v16 = vsel %vm490_vm5, %v505_v4, 0.0 }
  0xb1   :  { %v453_v40 = vadd.f32 %v452_v21, %v425_v35 }
  0xb3   :  { %v477_v49 = vmul.f32 0.2, %v453_v40  ;;  %vm470_vm0 = vcmp.gt.f32.partialorder %v453_v40, 0.0 }
  0xb5   :  { %v484_v54 = vsel %vm470_vm0, %v453_v40, %v477_v49 }
  0xb6   :  { %v427_v24 = vpop.f32.mrf.mxu2  ;;  %v373_v26 = vpop.f32.mrf.mxu0  ;;  %v506_v1 = vmul.f32 %v484_v54, %v484_v54  ;;  %v492_v5 = vsel %vm490_vm5, %v484_v54, 0.0 }
  0xb7   :  { %v455_v25 = vpop.f32.mrf.mxu3  ;;  %v401_v27 = vpop.f32.mrf.mxu1  ;;  %v428_v37 = vadd.f32 %v427_v24, %v400_v32  ;;  %v493_v14 = vadd.f32 %v492_v5, %v491_v10 }
  0xb8   :  { %v402_v38 = vadd.f32 %v401_v27, %v373_v26  ;;  %v513_v11 = vsel %vm490_vm5, %v506_v1, 0.0 }
  0xb9   :  { %v456_v45 = vadd.f32 %v455_v25, %v428_v37  ;;  %v514_v22 = vadd.f32 %v513_v11, %v512_v16 }
  0xbb   :  { %v478_v52 = vmul.f32 0.2, %v456_v45  ;;  %vm471_vm2 = vcmp.gt.f32.partialorder %v456_v45, 0.0 }
  0xbd   :  { %v485_v60 = vsel %vm471_vm2, %v456_v45, %v478_v52 }
  0xbe   :  { %v429_v28 = vpop.f32.mrf.mxu2  ;;  %v376_v33 = vpop.f32.mrf.mxu0  ;;  %v507_v6 = vmul.f32 %v485_v60, %v485_v60  ;;  %v494_v12 = vsel %vm490_vm5, %v485_v60, 0.0 }
  0xbf   :  { %v457_v29 = vpop.f32.mrf.mxu3  ;;  %v404_v34 = vpop.f32.mrf.mxu1  ;;  %v430_v41 = vadd.f32 %v429_v28, %v402_v38  ;;  %v495_v23 = vadd.f32 %v494_v12, %v493_v14 }
  0xc0   :  { %v405_v39 = vadd.f32 %v404_v34, %v376_v33  ;;  %v515_v17 = vsel %vm490_vm5, %v507_v6, 0.0 }
  0xc1   :  { %v458_v50 = vadd.f32 %v457_v29, %v430_v41  ;;  %v516_v30 = vadd.f32 %v515_v17, %v514_v22 }
  0xc3   :  { %v479_v55 = vmul.f32 0.2, %v458_v50  ;;  %vm472_vm3 = vcmp.gt.f32.partialorder %v458_v50, 0.0 }
  0xc5   :  { %v486_v2 = vsel %vm472_vm3, %v458_v50, %v479_v55 }
  0xc6   :  { %v432_v42 = vpop.f32.mrf.mxu2  ;;  %v378_v47 = vpop.f32.mrf.mxu0  ;;  %v508_v13 = vmul.f32 %v486_v2, %v486_v2  ;;  %v496_v18 = vsel %vm490_vm5, %v486_v2, 0.0 }
  0xc7   :  { %v460_v43 = vpop.f32.mrf.mxu3  ;;  %v433_v46 = vadd.f32 %v432_v42, %v405_v39  ;;  %v406_v48 = vpop.f32.mrf.mxu1  ;;  %v497_v31 = vadd.f32 %v496_v18, %v495_v23 }
  0xc8   :  { %v407_v56 = vadd.f32 %v406_v48, %v378_v47  ;;  %v517_v27 = vsel %vm490_vm5, %v508_v13, 0.0 }
  0xc9   :  { %v461_v53 = vadd.f32 %v460_v43, %v433_v46  ;;  %v518_v35 = vadd.f32 %v517_v27, %v516_v30 }
  0xcb   :  { %v480_v61 = vmul.f32 0.2, %v461_v53  ;;  %vm473_vm4 = vcmp.gt.f32.partialorder %v461_v53, 0.0 }
  0xcd   :  { %v487_v7 = vsel %vm473_vm4, %v461_v53, %v480_v61 }
  0xce   :  { %v434_v57 = vpop.f32.mrf.mxu2  ;;  %v381_v63 = vpop.f32.mrf.mxu0  ;;  %v509_v19 = vmul.f32 %v487_v7, %v487_v7  ;;  %v498_v28 = vsel %vm490_vm5, %v487_v7, 0.0 }
  0xcf   :  { %v462_v58 = vpop.f32.mrf.mxu3  ;;  %v435_v62 = vadd.f32 %v434_v57, %v407_v56  ;;  %v409_v0 = vpop.f32.mrf.mxu1  ;;  %v499_v36 = vadd.f32 %v498_v28, %v497_v31 }
  0xd0   :  { %v410_v9 = vadd.f32 %v409_v0, %v381_v63  ;;  %v519_v33 = vsel %vm490_vm5, %v509_v19, 0.0 }
  0xd1   :  { %v463_v3 = vadd.f32 %v462_v58, %v435_v62  ;;  %v520_v39 = vadd.f32 %v519_v33, %v518_v35 }
  0xd3   :  { %vm474_vm6 = vcmp.gt.f32.partialorder %v463_v3, 0.0  ;;  %v481_v8 = vmul.f32 0.2, %v463_v3 }
  0xd5   :  { %v488_v15 = vsel %vm474_vm6, %v463_v3, %v481_v8 }
  0xd6   :  { %v437_v20 = vpop.f32.mrf.mxu2  ;;  %v383_v25 = vpop.f32.mrf.mxu0  ;;  %v510_v29 = vmul.f32 %v488_v15, %v488_v15  ;;  %v500_v34 = vsel %vm490_vm5, %v488_v15, 0.0 }
  0xd7   :  { %v465_v21 = vpop.f32.mrf.mxu3  ;;  %v438_v24 = vadd.f32 %v437_v20, %v410_v9  ;;  %v411_v26 = vpop.f32.mrf.mxu1  ;;  %v501_v40 = vadd.f32 %v500_v34, %v499_v36 }
  0xd8   :  { %v521_v38 = vsel %vm490_vm5, %v510_v29, 0.0 }
  0xd9   :  { %v466_v32 = vadd.f32 %v465_v21, %v438_v24  ;;  %v522_v46 = vadd.f32 %v521_v38, %v520_v39 }
  0xdb   :  { %vm475_vm7 = vcmp.gt.f32.partialorder %v466_v32, 0.0  ;;  %v482_v37 = vmul.f32 0.2, %v466_v32 }
  0xdd   :  { %v489_v41 = vsel %vm475_vm7, %v466_v32, %v482_v37 }
  0xde   :  { %v502_v42 = vsel %vm490_vm5, %v489_v41, 0.0  ;;  %v511_v43 = vmul.f32 %v489_v41, %v489_v41  ;;  %v439_v44 = vpop.f32.mrf.mxu2 }
  0xdf   :  { %v467_v45 = vpop.f32.mrf.mxu3  ;;  %v503_v47 = vadd.f32 %v502_v42, %v501_v40 }
  0xe0   :  { %v523_v48 = vsel %vm490_vm5, %v511_v43, 0.0 }
  0xe1   :  { %504 = vst.msk [vmem:[%s972_s2] sm:$0xff] %vm490_vm5, %v503_v47  ;;  %v524_v49 = vadd.f32 %v523_v48, %v522_v46 }
  0xe3   :  { %525 = vst.msk [vmem:[%s973_s3] sm:$0xff] %vm490_vm5, %v524_v49 }

// kernel: patch_discriminator_forward.12
= control target key start
LH: loop header
LB: loop body
LE: loop exit
PB: predicated region body
PF: predicated region fallthrough
CT: control target
= control target key end

     0   :  { %vm523_vm1 = vcmask 519168   ;;  %s1008_s1 = inlined_call_operand.vmem [shape: bf16[512,64], index: 1, kind: input, shape index: {}]   ;;  %s1009_s0 = inlined_call_operand.vmem [shape: bf16[56,512], index: 0, kind: input, shape index: {}]   ;;  %s1010_s2 = inlined_call_operand.vmem [shape: f32[1,64], index: 2, kind: input, shape index: {}]   ;;  %s1011_s3 = inlined_call_operand.vmem [shape: f32[1,64], index: 3, kind: input, shape index: {}]   ;;  %s1012_s4 = inlined_call_operand.vmem [shape: bf16[56,64], index: 4, kind: output, shape index: {}]  }
   0x1   :  { %v730_v0 = vld [vmem:[%s1008_s1 + $0x38] sm:$0xff]  ;;  %v729_v4 = vld [vmem:[%s1008_s1 + $0x30] sm:$0xff]  ;;  %v728_v8 = vld [vmem:[%s1008_s1 + $0x28] sm:$0xff] }
   0x2   :  { %v738_v1 = vld [vmem:[%s1008_s1 + $0x78] sm:$0xff]  ;;  %361 = vmatpush.bf16.msra.mxu0 %v730_v0  ;;  %v737_v5 = vld [vmem:[%s1008_s1 + $0x70] sm:$0xff]  ;;  %v736_v9 = vld [vmem:[%s1008_s1 + $0x68] sm:$0xff] }
   0x3   :  { %v746_v2 = vld [vmem:[%s1008_s1 + $0xb8] sm:$0xff]  ;;  %389 = vmatpush.bf16.msra.mxu1 %v738_v1  ;;  %v745_v6 = vld [vmem:[%s1008_s1 + $0xb0] sm:$0xff]  ;;  %v744_v10 = vld [vmem:[%s1008_s1 + $0xa8] sm:$0xff] }
   0x4   :  { %v754_v3 = vld [vmem:[%s1008_s1 + $0xf8] sm:$0xff]  ;;  %417 = vmatpush.bf16.msra.mxu2 %v746_v2  ;;  %v753_v7 = vld [vmem:[%s1008_s1 + $0xf0] sm:$0xff]  ;;  %v752_v11 = vld [vmem:[%s1008_s1 + $0xe8] sm:$0xff] }
   0x5   :  { %445 = vmatpush.bf16.msra.mxu3 %v754_v3  ;;  %v727_v12 = vld [vmem:[%s1008_s1 + $0x20] sm:$0xff]  ;;  %v726_v16 = vld [vmem:[%s1008_s1 + $0x18] sm:$0xff]  ;;  %v725_v20 = vld [vmem:[%s1008_s1 + $0x10] sm:$0xff] }
   0x6   :  { %362 = vmatpush.bf16.msra.mxu0 %v729_v4  ;;  %v735_v13 = vld [vmem:[%s1008_s1 + $0x60] sm:$0xff]  ;;  %v734_v17 = vld [vmem:[%s1008_s1 + $0x58] sm:$0xff]  ;;  %v733_v21 = vld [vmem:[%s1008_s1 + $0x50] sm:$0xff] }
   0x7   :  { %390 = vmatpush.bf16.msra.mxu1 %v737_v5  ;;  %v743_v14 = vld [vmem:[%s1008_s1 + $0xa0] sm:$0xff]  ;;  %v742_v18 = vld [vmem:[%s1008_s1 + $0x98] sm:$0xff]  ;;  %v741_v22 = vld [vmem:[%s1008_s1 + $0x90] sm:$0xff] }
   0x8   :  { %418 = vmatpush.bf16.msra.mxu2 %v745_v6  ;;  %v751_v15 = vld [vmem:[%s1008_s1 + $0xe0] sm:$0xff]  ;;  %v750_v19 = vld [vmem:[%s1008_s1 + $0xd8] sm:$0xff]  ;;  %v749_v23 = vld [vmem:[%s1008_s1 + $0xd0] sm:$0xff] }
   0x9   :  { %446 = vmatpush.bf16.msra.mxu3 %v753_v7  ;;  %v724_v24 = vld [vmem:[%s1008_s1 + $0x8] sm:$0xff]  ;;  %v723_v28 = vld [vmem:[%s1008_s1] sm:$0xff]  ;;  %v713_v33 = vld [vmem:[%s1009_s0 + $0xc] sm:$0xf0] }
   0xa   :  { %363 = vmatpush.bf16.msra.mxu0 %v728_v8  ;;  %v732_v25 = vld [vmem:[%s1008_s1 + $0x48] sm:$0xff]  ;;  %v731_v29 = vld [vmem:[%s1008_s1 + $0x40] sm:$0xff]  ;;  %v539_v35 = vld [vmem:[%s1009_s0 + $0x10] sm:$0xf0] }
   0xb   :  { %391 = vmatpush.bf16.msra.mxu1 %v736_v9  ;;  %v740_v26 = vld [vmem:[%s1008_s1 + $0x88] sm:$0xff]  ;;  %v739_v30 = vld [vmem:[%s1008_s1 + $0x80] sm:$0xff]  ;;  %v714_v37 = vld [vmem:[%s1009_s0 + $0x14] sm:$0xf0] }
   0xc   :  { %419 = vmatpush.bf16.msra.mxu2 %v744_v10  ;;  %v748_v27 = vld [vmem:[%s1008_s1 + $0xc8] sm:$0xff]  ;;  %v747_v31 = vld [vmem:[%s1008_s1 + $0xc0] sm:$0xff]  ;;  %v547_v39 = vld [vmem:[%s1009_s0 + $0x18] sm:$0xf0] }
   0xd   :  { %447 = vmatpush.bf16.msra.mxu3 %v752_v11  ;;  %v537_v32 = vld [vmem:[%s1009_s0] sm:$0xf]  ;;  %v711_v34 = vld [vmem:[%s1009_s0 + $0x4] sm:$0xf]  ;;  %v545_v36 = vld [vmem:[%s1009_s0 + $0x8] sm:$0xf] }
   0xe   :  { %364 = vmatpush.bf16.msra.mxu0 %v727_v12  ;;  %v712_v38 = vld [vmem:[%s1009_s0 + $0xc] sm:$0xf]  ;;  %v538_v40 = vor.u32 %v713_v33, %v537_v32  ;;  %v542_v41 = vor.u32 %v711_v34, %v539_v35  ;;  %v546_v42 = vor.u32 %v714_v37, %v545_v36  ;;  %v553_v44 = vld [vmem:[%s1009_s0 + $0x20] sm:$0xf]  ;;  %v717_v45 = vld [vmem:[%s1009_s0 + $0x2c] sm:$0xf0] }
   0xf   :  { %392 = vmatpush.bf16.msra.mxu1 %v735_v13  ;;  %v550_v43 = vor.u32 %v712_v38, %v547_v39  ;;  %v715_v46 = vld [vmem:[%s1009_s0 + $0x24] sm:$0xf]  ;;  %v555_v47 = vld [vmem:[%s1009_s0 + $0x30] sm:$0xf0]  ;;  %v561_v48 = vld [vmem:[%s1009_s0 + $0x28] sm:$0xf]  ;;  %v554_v52 = vor.u32 %v717_v45, %v553_v44 }
  0x10   :  { %420 = vmatpush.bf16.msra.mxu2 %v743_v14  ;;  %v718_v49 = vld [vmem:[%s1009_s0 + $0x34] sm:$0xf0]  ;;  %v716_v50 = vld [vmem:[%s1009_s0 + $0x2c] sm:$0xf]  ;;  %v563_v51 = vld [vmem:[%s1009_s0 + $0x38] sm:$0xf0]  ;;  %v558_v53 = vor.u32 %v715_v46, %v555_v47 }
  0x11   :  { %448 = vmatpush.bf16.msra.mxu3 %v751_v15  ;;  %v562_v54 = vor.u32 %v718_v49, %v561_v48  ;;  %v566_v55 = vor.u32 %v716_v50, %v563_v51  ;;  %v569_v56 = vld [vmem:[%s1009_s0 + $0x40] sm:$0xf]  ;;  %v721_v57 = vld [vmem:[%s1009_s0 + $0x4c] sm:$0xf0]  ;;  %v719_v58 = vld [vmem:[%s1009_s0 + $0x44] sm:$0xf] }
  0x12   :  { %365 = vmatpush.bf16.msra.mxu0 %v726_v16  ;;  %v571_v59 = vld [vmem:[%s1009_s0 + $0x50] sm:$0xf0]  ;;  %v577_v60 = vld [vmem:[%s1009_s0 + $0x48] sm:$0xf]  ;;  %v722_v61 = vld [vmem:[%s1009_s0 + $0x54] sm:$0xf0]  ;;  %v570_v0 = vor.u32 %v721_v57, %v569_v56 }
  0x13   :  { %393 = vmatpush.bf16.msra.mxu1 %v734_v17  ;;  %v720_v62 = vld [vmem:[%s1009_s0 + $0x4c] sm:$0xf]  ;;  %v579_v63 = vld [vmem:[%s1009_s0 + $0x58] sm:$0xf0]  ;;  %v574_v1 = vor.u32 %v719_v58, %v571_v59  ;;  %v578_v2 = vor.u32 %v722_v61, %v577_v60  ;;  %v29_v4 = vld [vmem:[%s1009_s0 + $0x60] sm:$0xff] }
  0x14   :  { %421 = vmatpush.bf16.msra.mxu2 %v742_v18  ;;  %v582_v3 = vor.u32 %v720_v62, %v579_v63  ;;  %v30_v5 = vld [vmem:[%s1009_s0 + $0x68] sm:$0xff]  ;;  %v133_v6 = vunpack.c.l.b16 %v29_v4  ;;  %v134_v7 = vunpack.c.h.b16 %v29_v4 }
  0x15   :  { %449 = vmatpush.bf16.msra.mxu3 %v750_v19  ;;  %v135_v8 = vunpack.c.l.b16 %v30_v5  ;;  %v136_v9 = vunpack.c.h.b16 %v30_v5 }
  0x16   :  { %366 = vmatpush.bf16.msra.mxu0 %v725_v20  ;;  %v149_v10 = vpack.c.b16 %v133_v6, %v133_v6  ;;  %v150_v11 = vpack.c.b16 %v134_v7, %v134_v7 }
  0x17   :  { %394 = vmatpush.bf16.msra.mxu1 %v733_v21  ;;  %v151_v12 = vpack.c.b16 %v135_v8, %v135_v8  ;;  %v152_v13 = vpack.c.b16 %v136_v9, %v136_v9 }
  0x18   :  { %422 = vmatpush.bf16.msra.mxu2 %v741_v22 }
  0x19   :  { %450 = vmatpush.bf16.msra.mxu3 %v749_v23  ;;  %v959_v23 = vld [vmem:[%s1010_s2] ss:$0 sm:$0xff] }
  0x1a   :  { %367 = vmatpush.bf16.msra.mxu0 %v724_v24 }
  0x1b   :  { %395 = vmatpush.bf16.msra.mxu1 %v732_v25  ;;  %v964_v25 = vld [vmem:[%s1011_s3] ss:$0 sm:$0xff] }
  0x1c   :  { %423 = vmatpush.bf16.msra.mxu2 %v740_v26 }
  0x1d   :  { %451 = vmatpush.bf16.msra.mxu3 %v748_v27 }
  0x1e   :  { %368 = vmatpush.bf16.msra.mxu0 %v723_v28 }
  0x1f   :  { %396 = vmatpush.bf16.msra.mxu1 %v731_v29 }
  0x20   :  { %424 = vmatpush.bf16.msra.mxu2 %v739_v30 }
  0x21   :  { %452 = vmatpush.bf16.msra.mxu3 %v747_v31  ;;  %369 = vmatmul.bf16.vlgmr.msra.gmra.mxu0 %v538_v40 }
  0x22   :  { %397 = vmatmul.bf16.vlgmr.msra.gmra.mxu1 %v542_v41 }
  0x23   :  { %425 = vmatmul.bf16.vlgmr.msra.gmra.mxu2 %v546_v42 }
  0x24   :  { %453 = vmatmul.bf16.vlgmr.msra.gmra.mxu3 %v550_v43 }
  0x31   :  { %374 = vmatmul.bf16.gmra.mxu0 %v554_v52 }
  0x32   :  { %402 = vmatmul.bf16.gmra.mxu1 %v558_v53 }
  0x33   :  { %430 = vmatmul.bf16.gmra.mxu2 %v562_v54 }
  0x34   :  { %458 = vmatmul.bf16.gmra.mxu3 %v566_v55 }
  0x41   :  { %379 = vmatmul.bf16.gmra.mxu0 %v570_v0 }
  0x42   :  { %407 = vmatmul.bf16.gmra.mxu1 %v574_v1 }
  0x43   :  { %435 = vmatmul.bf16.gmra.mxu2 %v578_v2 }
  0x44   :  { %463 = vmatmul.bf16.gmra.mxu3 %v582_v3 }
  0x51   :  { %384 = vmatmul.bf16.gmra.mxu0 %v149_v10 }
  0x52   :  { %412 = vmatmul.bf16.gmra.mxu1 %v150_v11 }
  0x53   :  { %440 = vmatmul.bf16.gmra.mxu2 %v151_v12 }
  0x54   :  { %468 = vmatmul.bf16.gmra.mxu3 %v152_v13 }
  0x9e   :  { %v370_v14 = vpop.f32.mrf.mxu0 }
  0x9f   :  { %v398_v15 = vpop.f32.mrf.mxu1 }
  0xa0   :  { %v399_v16 = vadd.f32 %v398_v15, %v370_v14 }
  0xa6   :  { %v426_v17 = vpop.f32.mrf.mxu2  ;;  %v372_v20 = vpop.f32.mrf.mxu0 }
  0xa7   :  { %v454_v18 = vpop.f32.mrf.mxu3  ;;  %v427_v19 = vadd.f32 %v426_v17, %v399_v16  ;;  %v400_v21 = vpop.f32.mrf.mxu1 }
  0xa8   :  { %v401_v27 = vadd.f32 %v400_v21, %v372_v20 }
  0xa9   :  { %v455_v22 = vadd.f32 %v454_v18, %v427_v19 }
  0xab   :  { %vm473_vm0 = vcmp.gt.f32.partialorder %v455_v22, 0.0  ;;  %v480_v24 = vmul.f32 0.2, %v455_v22 }
  0xad   :  { %v487_v26 = vsel %vm473_vm0, %v455_v22, %v480_v24 }
  0xae   :  { %v498_v28 = vmul.f32 %v959_v23, %v487_v26  ;;  %v428_v29 = vpop.f32.mrf.mxu2  ;;  %v375_v32 = vpop.f32.mrf.mxu0 }
  0xaf   :  { %v456_v30 = vpop.f32.mrf.mxu3  ;;  %v429_v31 = vadd.f32 %v428_v29, %v401_v27  ;;  %v403_v33 = vpop.f32.mrf.mxu1 }
  0xb0   :  { %v509_v34 = vadd.f32 %v964_v25, %v498_v28  ;;  %v404_v38 = vadd.f32 %v403_v33, %v375_v32 }
  0xb1   :  { %v457_v35 = vadd.f32 %v456_v30, %v429_v31 }
  0xb2   :  { %v516_v36 = vpack.c.bf16 %v509_v34, %v509_v34 }
  0xb3   :  { %vm474_vm2 = vcmp.gt.f32.partialorder %v457_v35, 0.0  ;;  %v481_v37 = vmul.f32 0.2, %v457_v35 }
  0xb4   :  { %524 = vst.msk [vmem:[%s1012_s4] sm:$0xf] %vm523_vm1, %v516_v36 }
  0xb5   :  { %v488_v39 = vsel %vm474_vm2, %v457_v35, %v481_v37 }
  0xb6   :  { %v499_v40 = vmul.f32 %v959_v23, %v488_v39  ;;  %v431_v41 = vpop.f32.mrf.mxu2  ;;  %v377_v44 = vpop.f32.mrf.mxu0 }
  0xb7   :  { %v459_v42 = vpop.f32.mrf.mxu3  ;;  %v432_v43 = vadd.f32 %v431_v41, %v404_v38  ;;  %v405_v45 = vpop.f32.mrf.mxu1 }
  0xb8   :  { %v510_v46 = vadd.f32 %v964_v25, %v499_v40  ;;  %v406_v51 = vadd.f32 %v405_v45, %v377_v44 }
  0xb9   :  { %v460_v47 = vadd.f32 %v459_v42, %v432_v43 }
  0xba   :  { %v517_v48 = vpack.c.bf16 %v510_v46, %v510_v46 }
  0xbb   :  { %vm475_vm3 = vcmp.gt.f32.partialorder %v460_v47, 0.0  ;;  %v482_v49 = vmul.f32 0.2, %v460_v47 }
  0xbc   :  { %525 = vst.msk [vmem:[%s1012_s4 + $0x4] sm:$0xf] %vm523_vm1, %v517_v48 }
  0xbd   :  { %v489_v50 = vsel %vm475_vm3, %v460_v47, %v482_v49 }
  0xbe   :  { %v500_v52 = vmul.f32 %v959_v23, %v489_v50  ;;  %v433_v53 = vpop.f32.mrf.mxu2  ;;  %v380_v56 = vpop.f32.mrf.mxu0 }
  0xbf   :  { %v461_v54 = vpop.f32.mrf.mxu3  ;;  %v434_v55 = vadd.f32 %v433_v53, %v406_v51  ;;  %v408_v57 = vpop.f32.mrf.mxu1 }
  0xc0   :  { %v511_v58 = vadd.f32 %v964_v25, %v500_v52  ;;  %v409_v62 = vadd.f32 %v408_v57, %v380_v56 }
  0xc1   :  { %v462_v59 = vadd.f32 %v461_v54, %v434_v55 }
  0xc2   :  { %v518_v60 = vpack.c.bf16 %v511_v58, %v511_v58 }
  0xc3   :  { %vm476_vm4 = vcmp.gt.f32.partialorder %v462_v59, 0.0  ;;  %v483_v61 = vmul.f32 0.2, %v462_v59 }
  0xc4   :  { %526 = vst.msk [vmem:[%s1012_s4 + $0x8] sm:$0xf] %vm523_vm1, %v518_v60 }
  0xc5   :  { %v490_v63 = vsel %vm476_vm4, %v462_v59, %v483_v61 }
  0xc6   :  { %v501_v0 = vmul.f32 %v959_v23, %v490_v63  ;;  %v436_v1 = vpop.f32.mrf.mxu2  ;;  %v382_v4 = vpop.f32.mrf.mxu0 }
  0xc7   :  { %v464_v2 = vpop.f32.mrf.mxu3  ;;  %v437_v3 = vadd.f32 %v436_v1, %v409_v62  ;;  %v410_v5 = vpop.f32.mrf.mxu1 }
  0xc8   :  { %v512_v6 = vadd.f32 %v964_v25, %v501_v0  ;;  %v411_v11 = vadd.f32 %v410_v5, %v382_v4 }
  0xc9   :  { %v465_v7 = vadd.f32 %v464_v2, %v437_v3 }
  0xca   :  { %v519_v8 = vpack.c.bf16 %v512_v6, %v512_v6 }
  0xcb   :  { %vm477_vm5 = vcmp.gt.f32.partialorder %v465_v7, 0.0  ;;  %v484_v9 = vmul.f32 0.2, %v465_v7 }
  0xcc   :  { %527 = vst.msk [vmem:[%s1012_s4 + $0xc] sm:$0xf] %vm523_vm1, %v519_v8 }
  0xcd   :  { %v491_v10 = vsel %vm477_vm5, %v465_v7, %v484_v9 }
  0xce   :  { %v502_v12 = vmul.f32 %v959_v23, %v491_v10  ;;  %v438_v13 = vpop.f32.mrf.mxu2  ;;  %v385_v16 = vpop.f32.mrf.mxu0 }
  0xcf   :  { %v466_v14 = vpop.f32.mrf.mxu3  ;;  %v439_v15 = vadd.f32 %v438_v13, %v411_v11  ;;  %v413_v17 = vpop.f32.mrf.mxu1 }
  0xd0   :  { %v513_v18 = vadd.f32 %v964_v25, %v502_v12  ;;  %v414_v22 = vadd.f32 %v413_v17, %v385_v16 }
  0xd1   :  { %v467_v19 = vadd.f32 %v466_v14, %v439_v15 }
  0xd2   :  { %v520_v20 = vpack.c.bf16 %v513_v18, %v513_v18 }
  0xd3   :  { %vm478_vm6 = vcmp.gt.f32.partialorder %v467_v19, 0.0  ;;  %v485_v21 = vmul.f32 0.2, %v467_v19 }
  0xd4   :  { %528 = vst.msk [vmem:[%s1012_s4 + $0x10] sm:$0xf] %vm523_vm1, %v520_v20 }
  0xd5   :  { %v492_v24 = vsel %vm478_vm6, %v467_v19, %v485_v21 }
  0xd6   :  { %v503_v26 = vmul.f32 %v959_v23, %v492_v24  ;;  %v441_v27 = vpop.f32.mrf.mxu2  ;;  %v387_v30 = vpop.f32.mrf.mxu0 }
  0xd7   :  { %v469_v28 = vpop.f32.mrf.mxu3  ;;  %v442_v29 = vadd.f32 %v441_v27, %v414_v22  ;;  %v415_v31 = vpop.f32.mrf.mxu1 }
  0xd8   :  { %v514_v32 = vadd.f32 %v964_v25, %v503_v26 }
  0xd9   :  { %v470_v33 = vadd.f32 %v469_v28, %v442_v29 }
  0xda   :  { %v521_v34 = vpack.c.bf16 %v514_v32, %v514_v32 }
  0xdb   :  { %vm479_vm7 = vcmp.gt.f32.partialorder %v470_v33, 0.0  ;;  %v486_v35 = vmul.f32 0.2, %v470_v33 }
  0xdc   :  { %529 = vst.msk [vmem:[%s1012_s4 + $0x14] sm:$0xf] %vm523_vm1, %v521_v34 }
  0xdd   :  { %v493_v36 = vsel %vm479_vm7, %v470_v33, %v486_v35 }
  0xde   :  { %v504_v37 = vmul.f32 %v959_v23, %v493_v36  ;;  %v443_v38 = vpop.f32.mrf.mxu2 }
  0xdf   :  { %v471_v39 = vpop.f32.mrf.mxu3 }
  0xe0   :  { %v515_v40 = vadd.f32 %v964_v25, %v504_v37 }
  0xe2   :  { %v522_v41 = vpack.c.bf16 %v515_v40, %v515_v40 }
  0xe4   :  { %530 = vst.msk [vmem:[%s1012_s4 + $0x18] sm:$0xf] %vm523_vm1, %v522_v41 }

// kernel: patch_discriminator_forward.13
= control target key start
LH: loop header
LB: loop body
LE: loop exit
PB: predicated region body
PF: predicated region fallthrough
CT: control target
= control target key end

     0   :  { %s1406_s1 = inlined_call_operand.vmem [shape: bf16[1024,128], index: 1, kind: input, shape index: {}]   ;;  %s1407_s2 = inlined_call_operand.vmem [shape: f32[1,128], index: 2, kind: input, shape index: {}]   ;;  %s1408_s0 = inlined_call_operand.vmem [shape: bf16[24,1024], index: 0, kind: input, shape index: {}]   ;;  %s1409_s3 = inlined_call_operand.vmem [shape: f32[24,128], index: 3, kind: output, shape index: {}]  }
   0x1   :  { %v1064_v0 = vld [vmem:[%s1406_s1 + $0x38] sm:$0xff]  ;;  %v1063_v4 = vld [vmem:[%s1406_s1 + $0x30] sm:$0xff]  ;;  %v1062_v8 = vld [vmem:[%s1406_s1 + $0x28] sm:$0xff] }
   0x2   :  { %v1072_v1 = vld [vmem:[%s1406_s1 + $0x78] sm:$0xff]  ;;  %610 = vmatpush.bf16.msra.mxu0 %v1064_v0  ;;  %v1071_v5 = vld [vmem:[%s1406_s1 + $0x70] sm:$0xff]  ;;  %v1070_v9 = vld [vmem:[%s1406_s1 + $0x68] sm:$0xff] }
   0x3   :  { %v1080_v2 = vld [vmem:[%s1406_s1 + $0xb8] sm:$0xff]  ;;  %628 = vmatpush.bf16.msra.mxu1 %v1072_v1  ;;  %v1079_v6 = vld [vmem:[%s1406_s1 + $0xb0] sm:$0xff]  ;;  %v1078_v10 = vld [vmem:[%s1406_s1 + $0xa8] sm:$0xff] }
   0x4   :  { %v1088_v3 = vld [vmem:[%s1406_s1 + $0xf8] sm:$0xff]  ;;  %646 = vmatpush.bf16.msra.mxu2 %v1080_v2  ;;  %v1087_v7 = vld [vmem:[%s1406_s1 + $0xf0] sm:$0xff]  ;;  %v1086_v11 = vld [vmem:[%s1406_s1 + $0xe8] sm:$0xff] }
   0x5   :  { %664 = vmatpush.bf16.msra.mxu3 %v1088_v3  ;;  %v1061_v12 = vld [vmem:[%s1406_s1 + $0x20] sm:$0xff]  ;;  %v1060_v16 = vld [vmem:[%s1406_s1 + $0x18] sm:$0xff]  ;;  %v1059_v20 = vld [vmem:[%s1406_s1 + $0x10] sm:$0xff] }
   0x6   :  { %611 = vmatpush.bf16.msra.mxu0 %v1063_v4  ;;  %v1069_v13 = vld [vmem:[%s1406_s1 + $0x60] sm:$0xff]  ;;  %v1068_v17 = vld [vmem:[%s1406_s1 + $0x58] sm:$0xff]  ;;  %v1067_v21 = vld [vmem:[%s1406_s1 + $0x50] sm:$0xff] }
   0x7   :  { %629 = vmatpush.bf16.msra.mxu1 %v1071_v5  ;;  %v1077_v14 = vld [vmem:[%s1406_s1 + $0xa0] sm:$0xff]  ;;  %v1076_v18 = vld [vmem:[%s1406_s1 + $0x98] sm:$0xff]  ;;  %v1075_v22 = vld [vmem:[%s1406_s1 + $0x90] sm:$0xff] }
   0x8   :  { %647 = vmatpush.bf16.msra.mxu2 %v1079_v6  ;;  %v1085_v15 = vld [vmem:[%s1406_s1 + $0xe0] sm:$0xff]  ;;  %v1084_v19 = vld [vmem:[%s1406_s1 + $0xd8] sm:$0xff]  ;;  %v1083_v23 = vld [vmem:[%s1406_s1 + $0xd0] sm:$0xff] }
   0x9   :  { %665 = vmatpush.bf16.msra.mxu3 %v1087_v7  ;;  %v1058_v24 = vld [vmem:[%s1406_s1 + $0x8] sm:$0xff]  ;;  %v1057_v28 = vld [vmem:[%s1406_s1] sm:$0xff]  ;;  %v1112_v40 = vld [vmem:[%s1406_s1 + $0x1b8] sm:$0xff] }
   0xa   :  { %612 = vmatpush.bf16.msra.mxu0 %v1062_v8  ;;  %v1066_v25 = vld [vmem:[%s1406_s1 + $0x48] sm:$0xff]  ;;  %v1065_v29 = vld [vmem:[%s1406_s1 + $0x40] sm:$0xff]  ;;  %v1120_v41 = vld [vmem:[%s1406_s1 + $0x1f8] sm:$0xff] }
   0xb   :  { %630 = vmatpush.bf16.msra.mxu1 %v1070_v9  ;;  %v1074_v26 = vld [vmem:[%s1406_s1 + $0x88] sm:$0xff]  ;;  %v1073_v30 = vld [vmem:[%s1406_s1 + $0x80] sm:$0xff]  ;;  %v1096_v46 = vld [vmem:[%s1406_s1 + $0x138] sm:$0xff] }
   0xc   :  { %648 = vmatpush.bf16.msra.mxu2 %v1078_v10  ;;  %v1082_v27 = vld [vmem:[%s1406_s1 + $0xc8] sm:$0xff]  ;;  %v1081_v31 = vld [vmem:[%s1406_s1 + $0xc0] sm:$0xff]  ;;  %v1104_v47 = vld [vmem:[%s1406_s1 + $0x178] sm:$0xff] }
   0xd   :  { %666 = vmatpush.bf16.msra.mxu3 %v1086_v11  ;;  %v763_v32 = vld [vmem:[%s1408_s0] sm:$0xf]  ;;  %v1049_v34 = vld [vmem:[%s1408_s0 + $0x4] sm:$0xf]  ;;  %v771_v36 = vld [vmem:[%s1408_s0 + $0x8] sm:$0xf] }
   0xe   :  { %613 = vmatpush.bf16.msra.mxu0 %v1061_v12  ;;  %v1053_v33 = vld [vmem:[%s1408_s0 + $0x1c] sm:$0xf0]  ;;  %v765_v35 = vld [vmem:[%s1408_s0 + $0x20] sm:$0xf0]  ;;  %v1054_v37 = vld [vmem:[%s1408_s0 + $0x24] sm:$0xf0] }
   0xf   :  { %631 = vmatpush.bf16.msra.mxu1 %v1069_v13  ;;  %v1050_v38 = vld [vmem:[%s1408_s0 + $0xc] sm:$0xf]  ;;  %v764_v42 = vor.u32 %v1053_v33, %v763_v32  ;;  %v768_v43 = vor.u32 %v1049_v34, %v765_v35  ;;  %v772_v44 = vor.u32 %v1054_v37, %v771_v36  ;;  %v1111_v48 = vld [vmem:[%s1406_s1 + $0x1b0] sm:$0xff]  ;;  %v22_v54 = vld [vmem:[%s1408_s0 + $0x40] sm:$0xff] }
  0x10   :  { %649 = vmatpush.bf16.msra.mxu2 %v1077_v14  ;;  %v773_v39 = vld [vmem:[%s1408_s0 + $0x28] sm:$0xf0]  ;;  %v1119_v49 = vld [vmem:[%s1406_s1 + $0x1f0] sm:$0xff]  ;;  %v1109_v58 = vld [vmem:[%s1406_s1 + $0x1a0] sm:$0xff]  ;;  %v186_v60 = vunpack.c.l.b16 %v22_v54  ;;  %v187_v61 = vunpack.c.h.b16 %v22_v54 }
  0x11   :  { %667 = vmatpush.bf16.msra.mxu3 %v1085_v15  ;;  %v776_v45 = vor.u32 %v1050_v38, %v773_v39  ;;  %v1095_v50 = vld [vmem:[%s1406_s1 + $0x130] sm:$0xff]  ;;  %v1110_v52 = vld [vmem:[%s1406_s1 + $0x1a8] sm:$0xff]  ;;  %v1117_v59 = vld [vmem:[%s1406_s1 + $0x1e0] sm:$0xff] }
  0x12   :  { %614 = vmatpush.bf16.msra.mxu0 %v1060_v16  ;;  %v1103_v51 = vld [vmem:[%s1406_s1 + $0x170] sm:$0xff]  ;;  %v1118_v53 = vld [vmem:[%s1406_s1 + $0x1e8] sm:$0xff]  ;;  %v1093_v0 = vld [vmem:[%s1406_s1 + $0x120] sm:$0xff]  ;;  %v202_v4 = vpack.c.b16 %v186_v60, %v186_v60  ;;  %v203_v5 = vpack.c.b16 %v187_v61, %v187_v61 }
  0x13   :  { %632 = vmatpush.bf16.msra.mxu1 %v1068_v17  ;;  %v1094_v55 = vld [vmem:[%s1406_s1 + $0x128] sm:$0xff]  ;;  %v1101_v1 = vld [vmem:[%s1406_s1 + $0x160] sm:$0xff]  ;;  %v1108_v2 = vld [vmem:[%s1406_s1 + $0x198] sm:$0xff] }
  0x14   :  { %650 = vmatpush.bf16.msra.mxu2 %v1076_v18  ;;  %v1102_v56 = vld [vmem:[%s1406_s1 + $0x168] sm:$0xff]  ;;  %v1116_v3 = vld [vmem:[%s1406_s1 + $0x1d8] sm:$0xff]  ;;  %v1107_v10 = vld [vmem:[%s1406_s1 + $0x190] sm:$0xff] }
  0x15   :  { %668 = vmatpush.bf16.msra.mxu3 %v1084_v19  ;;  %v23_v57 = vld [vmem:[%s1408_s0 + $0x48] sm:$0xff]  ;;  %v1092_v8 = vld [vmem:[%s1406_s1 + $0x118] sm:$0xff]  ;;  %v1115_v11 = vld [vmem:[%s1406_s1 + $0x1d0] sm:$0xff] }
  0x16   :  { %615 = vmatpush.bf16.msra.mxu0 %v1059_v20  ;;  %v188_v62 = vunpack.c.l.b16 %v23_v57  ;;  %v189_v63 = vunpack.c.h.b16 %v23_v57  ;;  %v1100_v9 = vld [vmem:[%s1406_s1 + $0x158] sm:$0xff]  ;;  %v1091_v12 = vld [vmem:[%s1406_s1 + $0x110] sm:$0xff]  ;;  %v1106_v14 = vld [vmem:[%s1406_s1 + $0x188] sm:$0xff] }
  0x17   :  { %633 = vmatpush.bf16.msra.mxu1 %v1067_v21  ;;  %v1099_v13 = vld [vmem:[%s1406_s1 + $0x150] sm:$0xff]  ;;  %v1114_v15 = vld [vmem:[%s1406_s1 + $0x1c8] sm:$0xff]  ;;  %v1105_v18 = vld [vmem:[%s1406_s1 + $0x180] sm:$0xff] }
  0x18   :  { %651 = vmatpush.bf16.msra.mxu2 %v1075_v22  ;;  %v204_v6 = vpack.c.b16 %v188_v62, %v188_v62  ;;  %v205_v7 = vpack.c.b16 %v189_v63, %v189_v63  ;;  %v1090_v16 = vld [vmem:[%s1406_s1 + $0x108] sm:$0xff]  ;;  %v1113_v19 = vld [vmem:[%s1406_s1 + $0x1c0] sm:$0xff]  ;;  %v779_v22 = vld [vmem:[%s1408_s0 + $0x10] sm:$0xf] }
  0x19   :  { %669 = vmatpush.bf16.msra.mxu3 %v1083_v23  ;;  %v1098_v17 = vld [vmem:[%s1406_s1 + $0x148] sm:$0xff]  ;;  %v1089_v20 = vld [vmem:[%s1406_s1 + $0x100] sm:$0xff]  ;;  %v1055_v23 = vld [vmem:[%s1408_s0 + $0x2c] sm:$0xf0] }
  0x1a   :  { %616 = vmatpush.bf16.msra.mxu0 %v1058_v24  ;;  %v1097_v21 = vld [vmem:[%s1406_s1 + $0x140] sm:$0xff]  ;;  %v1051_v24 = vld [vmem:[%s1408_s0 + $0x14] sm:$0xf]  ;;  %v25_v35 = vld [vmem:[%s1408_s0 + $0x58] sm:$0xff] }
  0x1b   :  { %634 = vmatpush.bf16.msra.mxu1 %v1066_v25  ;;  %v781_v25 = vld [vmem:[%s1408_s0 + $0x30] sm:$0xf0]  ;;  %v192_v38 = vunpack.c.l.b16 %v25_v35  ;;  %v193_v39 = vunpack.c.h.b16 %v25_v35  ;;  %v1121_v54 = vld [vmem:[%s1407_s2] ss:$0 sm:$0xff] }
  0x1c   :  { %652 = vmatpush.bf16.msra.mxu2 %v1074_v26  ;;  %v787_v26 = vld [vmem:[%s1408_s0 + $0x18] sm:$0xf]  ;;  %v24_v34 = vld [vmem:[%s1408_s0 + $0x50] sm:$0xff] }
  0x1d   :  { %670 = vmatpush.bf16.msra.mxu3 %v1082_v27  ;;  %v1056_v27 = vld [vmem:[%s1408_s0 + $0x34] sm:$0xf0]  ;;  %v190_v36 = vunpack.c.l.b16 %v24_v34  ;;  %v191_v37 = vunpack.c.h.b16 %v24_v34 }
  0x1e   :  { %617 = vmatpush.bf16.msra.mxu0 %v1057_v28  ;;  %v1052_v28 = vld [vmem:[%s1408_s0 + $0x1c] sm:$0xf]  ;;  %v788_v32 = vor.u32 %v1056_v27, %v787_v26 }
  0x1f   :  { %635 = vmatpush.bf16.msra.mxu1 %v1065_v29  ;;  %v789_v29 = vld [vmem:[%s1408_s0 + $0x38] sm:$0xf0] }
  0x20   :  { %653 = vmatpush.bf16.msra.mxu2 %v1073_v30  ;;  %v780_v30 = vor.u32 %v1055_v23, %v779_v22  ;;  %v792_v33 = vor.u32 %v1052_v28, %v789_v29 }
  0x21   :  { %671 = vmatpush.bf16.msra.mxu3 %v1081_v31  ;;  %618 = vmatmul.bf16.vlgmr.msra.gmra.mxu0 %v764_v42  ;;  %v784_v31 = vor.u32 %v1051_v24, %v781_v25  ;;  %v208_v42 = vpack.c.b16 %v192_v38, %v192_v38 }
  0x22   :  { %636 = vmatmul.bf16.vlgmr.msra.gmra.mxu1 %v768_v43  ;;  %682 = vmatpush.bf16.msrb.mxu0 %v1096_v46  ;;  %v209_v43 = vpack.c.b16 %v193_v39, %v193_v39 }
  0x23   :  { %654 = vmatmul.bf16.vlgmr.msra.gmra.mxu2 %v772_v44  ;;  %700 = vmatpush.bf16.msrb.mxu1 %v1104_v47 }
  0x24   :  { %718 = vmatpush.bf16.msrb.mxu2 %v1112_v40  ;;  %672 = vmatmul.bf16.vlgmr.msra.gmra.mxu3 %v776_v45  ;;  %v206_v40 = vpack.c.b16 %v190_v36, %v190_v36 }
  0x25   :  { %736 = vmatpush.bf16.msrb.mxu3 %v1120_v41  ;;  %v207_v41 = vpack.c.b16 %v191_v37, %v191_v37 }
  0x26   :  { %683 = vmatpush.bf16.msrb.mxu0 %v1095_v50 }
  0x27   :  { %701 = vmatpush.bf16.msrb.mxu1 %v1103_v51 }
  0x28   :  { %719 = vmatpush.bf16.msrb.mxu2 %v1111_v48 }
  0x29   :  { %737 = vmatpush.bf16.msrb.mxu3 %v1119_v49 }
  0x2a   :  { %684 = vmatpush.bf16.msrb.mxu0 %v1094_v55 }
  0x2b   :  { %702 = vmatpush.bf16.msrb.mxu1 %v1102_v56 }
  0x2c   :  { %720 = vmatpush.bf16.msrb.mxu2 %v1110_v52 }
  0x2d   :  { %738 = vmatpush.bf16.msrb.mxu3 %v1118_v53 }
  0x2e   :  { %685 = vmatpush.bf16.msrb.mxu0 %v1093_v0 }
  0x2f   :  { %703 = vmatpush.bf16.msrb.mxu1 %v1101_v1 }
  0x30   :  { %721 = vmatpush.bf16.msrb.mxu2 %v1109_v58 }
  0x31   :  { %739 = vmatpush.bf16.msrb.mxu3 %v1117_v59  ;;  %623 = vmatmul.bf16.gmra.mxu0 %v202_v4 }
  0x32   :  { %641 = vmatmul.bf16.gmra.mxu1 %v203_v5  ;;  %686 = vmatpush.bf16.msrb.mxu0 %v1092_v8 }
  0x33   :  { %659 = vmatmul.bf16.gmra.mxu2 %v204_v6  ;;  %704 = vmatpush.bf16.msrb.mxu1 %v1100_v9 }
  0x34   :  { %722 = vmatpush.bf16.msrb.mxu2 %v1108_v2  ;;  %677 = vmatmul.bf16.gmra.mxu3 %v205_v7 }
  0x35   :  { %740 = vmatpush.bf16.msrb.mxu3 %v1116_v3 }
  0x36   :  { %687 = vmatpush.bf16.msrb.mxu0 %v1091_v12 }
  0x37   :  { %705 = vmatpush.bf16.msrb.mxu1 %v1099_v13 }
  0x38   :  { %723 = vmatpush.bf16.msrb.mxu2 %v1107_v10 }
  0x39   :  { %741 = vmatpush.bf16.msrb.mxu3 %v1115_v11 }
  0x3a   :  { %688 = vmatpush.bf16.msrb.mxu0 %v1090_v16 }
  0x3b   :  { %706 = vmatpush.bf16.msrb.mxu1 %v1098_v17 }
  0x3c   :  { %724 = vmatpush.bf16.msrb.mxu2 %v1106_v14 }
  0x3d   :  { %742 = vmatpush.bf16.msrb.mxu3 %v1114_v15 }
  0x3e   :  { %689 = vmatpush.bf16.msrb.mxu0 %v1089_v20 }
  0x3f   :  { %707 = vmatpush.bf16.msrb.mxu1 %v1097_v21 }
  0x40   :  { %725 = vmatpush.bf16.msrb.mxu2 %v1105_v18 }
  0x41   :  { %743 = vmatpush.bf16.msrb.mxu3 %v1113_v19  ;;  %690 = vmatmul.bf16.vlgmr.msrb.gmra.mxu0 %v780_v30 }
  0x42   :  { %708 = vmatmul.bf16.vlgmr.msrb.gmra.mxu1 %v784_v31 }
  0x43   :  { %726 = vmatmul.bf16.vlgmr.msrb.gmra.mxu2 %v788_v32 }
  0x44   :  { %744 = vmatmul.bf16.vlgmr.msrb.gmra.mxu3 %v792_v33 }
  0x51   :  { %695 = vmatmul.bf16.gmra.mxu0 %v206_v40 }
  0x52   :  { %713 = vmatmul.bf16.gmra.mxu1 %v207_v41 }
  0x53   :  { %731 = vmatmul.bf16.gmra.mxu2 %v208_v42 }
  0x54   :  { %749 = vmatmul.bf16.gmra.mxu3 %v209_v43 }
  0x9e   :  { %v619_v44 = vpop.f32.mrf.mxu0 }
  0x9f   :  { %v637_v45 = vpop.f32.mrf.mxu1  ;;  %v620_v55 = vadd.f32 %v1121_v54, %v619_v44 }
  0xa1   :  { %v638_v60 = vadd.f32 %v637_v45, %v620_v55 }
  0xa6   :  { %v655_v46 = vpop.f32.mrf.mxu2  ;;  %v621_v48 = vpop.f32.mrf.mxu0 }
  0xa7   :  { %v673_v47 = vpop.f32.mrf.mxu3  ;;  %v639_v49 = vpop.f32.mrf.mxu1  ;;  %v656_v61 = vadd.f32 %v655_v46, %v638_v60  ;;  %v622_v62 = vadd.f32 %v1121_v54, %v621_v48 }
  0xa9   :  { %v674_v1 = vadd.f32 %v673_v47, %v656_v61  ;;  %v640_v4 = vadd.f32 %v639_v49, %v622_v62 }
  0xae   :  { %v657_v50 = vpop.f32.mrf.mxu2  ;;  %v624_v52 = vpop.f32.mrf.mxu0 }
  0xaf   :  { %v675_v51 = vpop.f32.mrf.mxu3  ;;  %v642_v53 = vpop.f32.mrf.mxu1  ;;  %v658_v6 = vadd.f32 %v657_v50, %v640_v4  ;;  %v625_v7 = vadd.f32 %v1121_v54, %v624_v52 }
  0xb1   :  { %v676_v11 = vadd.f32 %v675_v51, %v658_v6  ;;  %v643_v12 = vadd.f32 %v642_v53, %v625_v7 }
  0xb6   :  { %v660_v56 = vpop.f32.mrf.mxu2  ;;  %v626_v58 = vpop.f32.mrf.mxu0 }
  0xb7   :  { %v678_v57 = vpop.f32.mrf.mxu3  ;;  %v644_v59 = vpop.f32.mrf.mxu1  ;;  %v661_v18 = vadd.f32 %v660_v56, %v643_v12 }
  0xb9   :  { %v679_v22 = vadd.f32 %v678_v57, %v661_v18 }
  0xbe   :  { %v662_v63 = vpop.f32.mrf.mxu2  ;;  %v691_v2 = vpop.f32.mrf.mxu0 }
  0xbf   :  { %v680_v0 = vpop.f32.mrf.mxu3  ;;  %v709_v3 = vpop.f32.mrf.mxu1  ;;  %v692_v5 = vadd.f32 %v691_v2, %v674_v1 }
  0xc1   :  { %v710_v8 = vadd.f32 %v709_v3, %v692_v5 }
  0xc6   :  { %v727_v9 = vpop.f32.mrf.mxu2  ;;  %v693_v14 = vpop.f32.mrf.mxu0 }
  0xc7   :  { %v745_v10 = vpop.f32.mrf.mxu3  ;;  %v728_v13 = vadd.f32 %v727_v9, %v710_v8  ;;  %v711_v15 = vpop.f32.mrf.mxu1  ;;  %v694_v17 = vadd.f32 %v693_v14, %v676_v11 }
  0xc9   :  { %v746_v16 = vadd.f32 %v745_v10, %v728_v13  ;;  %v712_v19 = vadd.f32 %v711_v15, %v694_v17 }
  0xcb   :  { %754 = vst [vmem:[%s1409_s3] sm:$0xff] %v746_v16 }
  0xce   :  { %v729_v20 = vpop.f32.mrf.mxu2  ;;  %v696_v24 = vpop.f32.mrf.mxu0 }
  0xcf   :  { %v747_v21 = vpop.f32.mrf.mxu3  ;;  %v730_v23 = vadd.f32 %v729_v20, %v712_v19  ;;  %v714_v25 = vpop.f32.mrf.mxu1  ;;  %v697_v27 = vadd.f32 %v696_v24, %v679_v22 }
  0xd1   :  { %v748_v26 = vadd.f32 %v747_v21, %v730_v23  ;;  %v715_v28 = vadd.f32 %v714_v25, %v697_v27 }
  0xd3   :  { %755 = vst [vmem:[%s1409_s3 + $0x8] sm:$0xff] %v748_v26 }
  0xd6   :  { %v732_v29 = vpop.f32.mrf.mxu2  ;;  %v698_v32 = vpop.f32.mrf.mxu0 }
  0xd7   :  { %v750_v30 = vpop.f32.mrf.mxu3  ;;  %v733_v31 = vadd.f32 %v732_v29, %v715_v28  ;;  %v716_v33 = vpop.f32.mrf.mxu1 }
  0xd9   :  { %v751_v34 = vadd.f32 %v750_v30, %v733_v31 }
  0xdb   :  { %756 = vst [vmem:[%s1409_s3 + $0x10] sm:$0xff] %v751_v34 }
  0xde   :  { %v734_v35 = vpop.f32.mrf.mxu2 }
  0xdf   :  { %v752_v36 = vpop.f32.mrf.mxu3 }

</bundles_post_ra>
